<compile_context>
chip_gen: v7x
topology: tpu7x:2x2x1
jax: 0.10.0
libtpu: 0.0.40
codegen_flags: <defaults>
</compile_context>

<pallas_src>
import jax
import jax.numpy as jnp
from jax.experimental import pallas as pl
from jax.experimental.pallas import tpu as pltpu


def lstm_kernel(x_ref, wih0_ref, whh0_ref, b0_ref, wih1_ref, whh1_ref, b1_ref,
                fcw_ref, fcb_ref, out_ref):
    B, O = out_ref.shape
    TB, I = x_ref.shape
    T = TB // B
    HP = whh0_ref.shape[0]          # padded per-gate width (128)
    GW = 4 * HP

    # ---- hoisted: layer-0 input projection for the whole sequence ------------
    if I == 1:
        # (T*B,1)@(1,4HP) is an outer product -> VPU broadcast multiply.
        xb = jnp.broadcast_to(x_ref[...], (TB, GW))
        w0 = jnp.broadcast_to(wih0_ref[...], (TB, GW))
        bb = jnp.broadcast_to(b0_ref[...], (TB, GW))
        gx0 = xb * w0 + bb                                   # (T*B, 4*HP)
    else:
        gx0 = (jnp.dot(x_ref[...], wih0_ref[...],
                       preferred_element_type=jnp.float32)
               + b0_ref[...])
    # layer-1 bias pre-broadcast once (no per-step broadcast_in_dim)
    b1b = jnp.broadcast_to(b1_ref[...], (B, GW))
    # ---------------------------------------------------------------------------

    def activate(gates, c):
        # One EUP tanh over all 4 gates; i/f/o pre-activations were pre-scaled
        # by 0.5 at pack time, so sigmoid(z) = 0.5*tanh(z/2)+0.5 is a VPU FMA.
        t = jnp.tanh(gates)                                  # (B, 4*HP)
        ifo = 0.5 * t[:, :3 * HP] + 0.5
        g = t[:, 3 * HP:]
        i_g = ifo[:, :HP]
        f_g = ifo[:, HP:2 * HP]
        o_g = ifo[:, 2 * HP:]
        c_new = f_g * c + i_g * g
        h_new = o_g * jnp.tanh(c_new)
        return h_new, c_new

    zeros = jnp.zeros((B, HP), jnp.float32)                  # matches torch.zeros init
    h0 = c0 = h1 = c1 = zeros
    r1 = b1b                                                 # h1==0 -> Whh1 term is just b1

    # T is small & static -> full unroll. Weight refs are read inside each dot
    # (not hoisted as values) to keep vreg live ranges short.
    for t in range(T):
        gx0_t = gx0[t * B:(t + 1) * B, :]                    # static slice
        # layer 0: only the h-dependent matmul is on the serial chain
        if t == 0:
            g0 = gx0_t                                       # h0 == 0: skip the matmul
        else:
            g0 = jnp.dot(h0, whh0_ref[...],
                         preferred_element_type=jnp.float32) + gx0_t
        h0, c0 = activate(g0, c0)
        # layer 1: K=128 on-path matmul; h1's contribution (r1) came off-path
        g1 = jnp.dot(h0, wih1_ref[...],
                     preferred_element_type=jnp.float32) + r1
        h1, c1 = activate(g1, c1)
        if t + 1 < T:
            # next step's Whh1 term — off the critical path, overlaps layer-0(t+1)
            r1 = jnp.dot(h1, whh1_ref[...],
                         preferred_element_type=jnp.float32) + b1b

    # final Linear on last timestep of the top layer — off the MXU:
    # VPU multiply + lane reduce (padded h1 lanes are exactly zero).
    if O == 1:
        out_ref[...] = (jnp.sum(h1 * fcw_ref[...], axis=-1, keepdims=True)
                        + fcb_ref[...])
    else:
        out_ref[...] = (jnp.dot(h1, fcw_ref[...].T,
                                preferred_element_type=jnp.float32)
                        + fcb_ref[...])


def stock_lstm_forward(x, kparams):
    """x: (B, T, I) batch-first float32; kparams: packed params. Returns (B, O)."""
    B, T, I = x.shape
    O = kparams["fcb"].shape[1]
    # time-major, flattened to (T*B, I) rows [t0:b0,b1, t1:b0,b1, ...]
    x_tm = jnp.transpose(x, (1, 0, 2)).reshape(T * B, I).astype(jnp.float32)

    vmem = pl.BlockSpec(memory_space=pltpu.MemorySpace.VMEM)
    return pl.pallas_call(
        lstm_kernel,
        out_shape=jax.ShapeDtypeStruct((B, O), jnp.float32),
        in_specs=[vmem] * 9,
        out_specs=vmem,
    )(x_tm,
      kparams["wih0"], kparams["whh0"], kparams["b0"],
      kparams["wih1"], kparams["whh1"], kparams["b1"],
      kparams["fcw"], kparams["fcb"])


def init_params(key, input_size=1, hidden_size=50, output_size=1):
    """Logical (unpadded) params. Weights pre-transposed: wih:(in,4H), whh:(H,4H),
    b:(1,4H) (= b_ih + b_hh), gate order [i,f,g,o] (PyTorch); fcw:(H,O), fcb:(1,O)."""
    H = hidden_size
    k = jax.random.split(key, 9)
    bound = 1.0 / jnp.sqrt(H)
    u = lambda kk, shape: jax.random.uniform(kk, shape, jnp.float32, -bound, bound)
    return {
        "wih0": u(k[0], (input_size, 4 * H)),
        "whh0": u(k[1], (H, 4 * H)),
        "b0":   u(k[2], (1, 4 * H)) + u(k[3], (1, 4 * H)),
        "wih1": u(k[4], (H, 4 * H)),
        "whh1": u(k[5], (H, 4 * H)),
        "b1":   u(k[6], (1, 4 * H)) + u(k[7], (1, 4 * H)),
        "fcw":  u(k[8], (H, output_size)),
        "fcb":  jnp.zeros((1, output_size), jnp.float32),
    }


def pack_params(params, hidden_size=50, hp=128):
    """Repack logical params into the kernel layout:
       gate order [i,f,o,g], each gate zero-padded H -> HP lanes; hidden rows
       zero-padded H -> HP; i/f/o columns (weights AND biases) pre-scaled by 0.5
       so sigmoid(z) = 0.5*tanh(z/2)+0.5 becomes one tanh in the kernel;
       layer-1 weights stay split (Wih1, Whh1) so the Whh1 dot is off-path;
       fc weight stored as a (O, HP) row for the VPU+reduce epilogue."""
    H, HP = hidden_size, hp

    def pack_cols(w):  # (..., 4H) [i,f,g,o] -> (..., 4HP) [0.5i, 0.5f, 0.5o, g]
        i, f, g, o = (w[:, k * H:(k + 1) * H] for k in range(4))
        pad = lambda a: jnp.pad(a, ((0, 0), (0, HP - H)))
        return jnp.concatenate(
            [0.5 * pad(i), 0.5 * pad(f), 0.5 * pad(o), pad(g)], axis=1)

    def pad_rows(w):   # (H, N) -> (HP, N) with zero rows
        return jnp.pad(w, ((0, HP - w.shape[0]), (0, 0)))

    return {
        "wih0": pack_cols(params["wih0"]),               # (I, 4HP)
        "whh0": pack_cols(pad_rows(params["whh0"])),     # (HP, 4HP)
        "b0":   pack_cols(params["b0"]),                 # (1, 4HP)
        "wih1": pack_cols(pad_rows(params["wih1"])),     # (HP, 4HP)
        "whh1": pack_cols(pad_rows(params["whh1"])),     # (HP, 4HP)
        "b1":   pack_cols(params["b1"]),                 # (1, 4HP)
        "fcw":  jnp.pad(params["fcw"].T, ((0, 0), (0, HP - H))),  # (O, HP)
        "fcb":  params["fcb"],                           # (1, O)
    }


def reference_forward(x, params):
    """Pure-JAX reference of the same math on the logical (unpadded) params."""
    B, T, I = x.shape
    H = params["whh0"].shape[0]

    def cell(x_t, h, c, wih, whh, b):
        g = x_t @ wih + h @ whh + b
        i = jax.nn.sigmoid(g[:, 0 * H:1 * H])
        f = jax.nn.sigmoid(g[:, 1 * H:2 * H])
        gg = jnp.tanh(g[:, 2 * H:3 * H])
        o = jax.nn.sigmoid(g[:, 3 * H:4 * H])
        c = f * c + i * gg
        return o * jnp.tanh(c), c

    h0 = c0 = h1 = c1 = jnp.zeros((B, H), jnp.float32)
    for t in range(T):
        h0, c0 = cell(x[:, t, :], h0, c0, params["wih0"], params["whh0"], params["b0"])
        h1, c1 = cell(h0, h1, c1, params["wih1"], params["whh1"], params["b1"])
    return h1 @ params["fcw"] + params["fcb"]


if __name__ == "__main__":
    key = jax.random.PRNGKey(0)
    kx, kp = jax.random.split(key)

    B, T, I = 2, 8, 1          # batch, sequence length, input_size (as in StockLSTM)
    H, O = 50, 1               # hidden_size, output_size (module defaults)

    x = jax.random.normal(kx, (B, T, I), jnp.float32)
    params = init_params(kp, input_size=I, hidden_size=H, output_size=O)
    kparams = pack_params(params, hidden_size=H, hp=128)

    out = jax.block_until_ready(stock_lstm_forward(x, kparams))

    ref = reference_forward(x, params)
    assert out.shape == (B, O)
    assert jnp.allclose(out, ref, atol=1e-4, rtol=1e-4), (out, ref)

    print("KERNEL_OK")
</pallas_src>

<mosaic_0001>
module attributes {stable_mosaic.version = 11 : i64} {
  func.func @lstm_kernel(%arg0: memref<16x1xf32, #tpu.memory_space<vmem>>, %arg1: memref<1x512xf32, #tpu.memory_space<vmem>>, %arg2: memref<128x512xf32, #tpu.memory_space<vmem>>, %arg3: memref<1x512xf32, #tpu.memory_space<vmem>>, %arg4: memref<128x512xf32, #tpu.memory_space<vmem>>, %arg5: memref<128x512xf32, #tpu.memory_space<vmem>>, %arg6: memref<1x512xf32, #tpu.memory_space<vmem>>, %arg7: memref<1x128xf32, #tpu.memory_space<vmem>>, %arg8: memref<1x1xf32, #tpu.memory_space<vmem>>, %arg9: memref<2x1xf32, #tpu.memory_space<vmem>>) attributes {dimension_semantics = [], scalar_prefetch = 0 : i64, scratch_operands = 0 : i64, tpu.core_type = #tpu.core_type<tc>} {
    %c0 = arith.constant 0 : index
    %c0_0 = arith.constant 0 : index
    %0 = vector.load %arg0[%c0, %c0_0] : memref<16x1xf32, #tpu.memory_space<vmem>>, vector<16x1xf32>
    %1 = vector.shape_cast %0 : vector<16x1xf32> to vector<16x1xf32>
    %2 = vector.broadcast %1 : vector<16x1xf32> to vector<16x512xf32>
    %c0_1 = arith.constant 0 : index
    %c0_2 = arith.constant 0 : index
    %3 = vector.load %arg1[%c0_1, %c0_2] : memref<1x512xf32, #tpu.memory_space<vmem>>, vector<1x512xf32>
    %4 = vector.shape_cast %3 : vector<1x512xf32> to vector<1x512xf32>
    %5 = vector.broadcast %4 : vector<1x512xf32> to vector<16x512xf32>
    %c0_3 = arith.constant 0 : index
    %c0_4 = arith.constant 0 : index
    %6 = vector.load %arg3[%c0_3, %c0_4] : memref<1x512xf32, #tpu.memory_space<vmem>>, vector<1x512xf32>
    %7 = vector.shape_cast %6 : vector<1x512xf32> to vector<1x512xf32>
    %8 = vector.broadcast %7 : vector<1x512xf32> to vector<16x512xf32>
    %9 = arith.mulf %2, %5 : vector<16x512xf32>
    %10 = arith.addf %9, %8 : vector<16x512xf32>
    %c0_5 = arith.constant 0 : index
    %c0_6 = arith.constant 0 : index
    %11 = vector.load %arg6[%c0_5, %c0_6] : memref<1x512xf32, #tpu.memory_space<vmem>>, vector<1x512xf32>
    %12 = vector.shape_cast %11 : vector<1x512xf32> to vector<1x512xf32>
    %13 = vector.broadcast %12 : vector<1x512xf32> to vector<2x512xf32>
    %cst = arith.constant 0.000000e+00 : f32
    %14 = vector.broadcast %cst : f32 to vector<2x128xf32>
    %15 = vector.extract_strided_slice %10 {offsets = [0, 0], sizes = [2, 512], strides = [1, 1]} : vector<16x512xf32> to vector<2x512xf32>
    %16 = math.tanh %15 : vector<2x512xf32>
    %17 = vector.extract_strided_slice %16 {offsets = [0, 0], sizes = [2, 384], strides = [1, 1]} : vector<2x512xf32> to vector<2x384xf32>
    %cst_7 = arith.constant 5.000000e-01 : f32
    %18 = vector.broadcast %cst_7 : f32 to vector<2x384xf32>
    %19 = arith.mulf %18, %17 : vector<2x384xf32>
    %cst_8 = arith.constant 5.000000e-01 : f32
    %20 = vector.broadcast %cst_8 : f32 to vector<2x384xf32>
    %21 = arith.addf %19, %20 : vector<2x384xf32>
    %22 = vector.extract_strided_slice %16 {offsets = [0, 384], sizes = [2, 128], strides = [1, 1]} : vector<2x512xf32> to vector<2x128xf32>
    %23 = vector.extract_strided_slice %21 {offsets = [0, 0], sizes = [2, 128], strides = [1, 1]} : vector<2x384xf32> to vector<2x128xf32>
    %24 = vector.extract_strided_slice %21 {offsets = [0, 128], sizes = [2, 128], strides = [1, 1]} : vector<2x384xf32> to vector<2x128xf32>
    %25 = vector.extract_strided_slice %21 {offsets = [0, 256], sizes = [2, 128], strides = [1, 1]} : vector<2x384xf32> to vector<2x128xf32>
    %26 = arith.mulf %24, %14 : vector<2x128xf32>
    %27 = arith.mulf %23, %22 : vector<2x128xf32>
    %28 = arith.addf %26, %27 : vector<2x128xf32>
    %29 = math.tanh %28 : vector<2x128xf32>
    %30 = arith.mulf %25, %29 : vector<2x128xf32>
    %c0_9 = arith.constant 0 : index
    %c0_10 = arith.constant 0 : index
    %31 = vector.load %arg4[%c0_9, %c0_10] : memref<128x512xf32, #tpu.memory_space<vmem>>, vector<128x512xf32>
    %cst_11 = arith.constant dense<0.000000e+00> : vector<2x512xf32>
    %32 = tpu.matmul %30, %31, %cst_11 {dimension_numbers = #tpu.dot_dimension_numbers<[1], [0], [0], [1], [0, 0, 1, 1], [], []>} : vector<2x128xf32>, vector<128x512xf32>, vector<2x512xf32> -> vector<2x512xf32>
    %33 = arith.addf %32, %13 : vector<2x512xf32>
    %34 = math.tanh %33 : vector<2x512xf32>
    %35 = vector.extract_strided_slice %34 {offsets = [0, 0], sizes = [2, 384], strides = [1, 1]} : vector<2x512xf32> to vector<2x384xf32>
    %cst_12 = arith.constant 5.000000e-01 : f32
    %36 = vector.broadcast %cst_12 : f32 to vector<2x384xf32>
    %37 = arith.mulf %36, %35 : vector<2x384xf32>
    %cst_13 = arith.constant 5.000000e-01 : f32
    %38 = vector.broadcast %cst_13 : f32 to vector<2x384xf32>
    %39 = arith.addf %37, %38 : vector<2x384xf32>
    %40 = vector.extract_strided_slice %34 {offsets = [0, 384], sizes = [2, 128], strides = [1, 1]} : vector<2x512xf32> to vector<2x128xf32>
    %41 = vector.extract_strided_slice %39 {offsets = [0, 0], sizes = [2, 128], strides = [1, 1]} : vector<2x384xf32> to vector<2x128xf32>
    %42 = vector.extract_strided_slice %39 {offsets = [0, 128], sizes = [2, 128], strides = [1, 1]} : vector<2x384xf32> to vector<2x128xf32>
    %43 = vector.extract_strided_slice %39 {offsets = [0, 256], sizes = [2, 128], strides = [1, 1]} : vector<2x384xf32> to vector<2x128xf32>
    %44 = arith.mulf %42, %14 : vector<2x128xf32>
    %45 = arith.mulf %41, %40 : vector<2x128xf32>
    %46 = arith.addf %44, %45 : vector<2x128xf32>
    %47 = math.tanh %46 : vector<2x128xf32>
    %48 = arith.mulf %43, %47 : vector<2x128xf32>
    %c0_14 = arith.constant 0 : index
    %c0_15 = arith.constant 0 : index
    %49 = vector.load %arg5[%c0_14, %c0_15] : memref<128x512xf32, #tpu.memory_space<vmem>>, vector<128x512xf32>
    %cst_16 = arith.constant dense<0.000000e+00> : vector<2x512xf32>
    %50 = tpu.matmul %48, %49, %cst_16 {dimension_numbers = #tpu.dot_dimension_numbers<[1], [0], [0], [1], [0, 0, 1, 1], [], []>} : vector<2x128xf32>, vector<128x512xf32>, vector<2x512xf32> -> vector<2x512xf32>
    %51 = arith.addf %50, %13 : vector<2x512xf32>
    %52 = vector.extract_strided_slice %10 {offsets = [2, 0], sizes = [2, 512], strides = [1, 1]} : vector<16x512xf32> to vector<2x512xf32>
    %c0_17 = arith.constant 0 : index
    %c0_18 = arith.constant 0 : index
    %53 = vector.load %arg2[%c0_17, %c0_18] : memref<128x512xf32, #tpu.memory_space<vmem>>, vector<128x512xf32>
    %cst_19 = arith.constant dense<0.000000e+00> : vector<2x512xf32>
    %54 = tpu.matmul %30, %53, %cst_19 {dimension_numbers = #tpu.dot_dimension_numbers<[1], [0], [0], [1], [0, 0, 1, 1], [], []>} : vector<2x128xf32>, vector<128x512xf32>, vector<2x512xf32> -> vector<2x512xf32>
    %55 = arith.addf %54, %52 : vector<2x512xf32>
    %56 = math.tanh %55 : vector<2x512xf32>
    %57 = vector.extract_strided_slice %56 {offsets = [0, 0], sizes = [2, 384], strides = [1, 1]} : vector<2x512xf32> to vector<2x384xf32>
    %cst_20 = arith.constant 5.000000e-01 : f32
    %58 = vector.broadcast %cst_20 : f32 to vector<2x384xf32>
    %59 = arith.mulf %58, %57 : vector<2x384xf32>
    %cst_21 = arith.constant 5.000000e-01 : f32
    %60 = vector.broadcast %cst_21 : f32 to vector<2x384xf32>
    %61 = arith.addf %59, %60 : vector<2x384xf32>
    %62 = vector.extract_strided_slice %56 {offsets = [0, 384], sizes = [2, 128], strides = [1, 1]} : vector<2x512xf32> to vector<2x128xf32>
    %63 = vector.extract_strided_slice %61 {offsets = [0, 0], sizes = [2, 128], strides = [1, 1]} : vector<2x384xf32> to vector<2x128xf32>
    %64 = vector.extract_strided_slice %61 {offsets = [0, 128], sizes = [2, 128], strides = [1, 1]} : vector<2x384xf32> to vector<2x128xf32>
    %65 = vector.extract_strided_slice %61 {offsets = [0, 256], sizes = [2, 128], strides = [1, 1]} : vector<2x384xf32> to vector<2x128xf32>
    %66 = arith.mulf %64, %28 : vector<2x128xf32>
    %67 = arith.mulf %63, %62 : vector<2x128xf32>
    %68 = arith.addf %66, %67 : vector<2x128xf32>
    %69 = math.tanh %68 : vector<2x128xf32>
    %70 = arith.mulf %65, %69 : vector<2x128xf32>
    %c0_22 = arith.constant 0 : index
    %c0_23 = arith.constant 0 : index
    %71 = vector.load %arg4[%c0_22, %c0_23] : memref<128x512xf32, #tpu.memory_space<vmem>>, vector<128x512xf32>
    %cst_24 = arith.constant dense<0.000000e+00> : vector<2x512xf32>
    %72 = tpu.matmul %70, %71, %cst_24 {dimension_numbers = #tpu.dot_dimension_numbers<[1], [0], [0], [1], [0, 0, 1, 1], [], []>} : vector<2x128xf32>, vector<128x512xf32>, vector<2x512xf32> -> vector<2x512xf32>
    %73 = arith.addf %72, %51 : vector<2x512xf32>
    %74 = math.tanh %73 : vector<2x512xf32>
    %75 = vector.extract_strided_slice %74 {offsets = [0, 0], sizes = [2, 384], strides = [1, 1]} : vector<2x512xf32> to vector<2x384xf32>
    %cst_25 = arith.constant 5.000000e-01 : f32
    %76 = vector.broadcast %cst_25 : f32 to vector<2x384xf32>
    %77 = arith.mulf %76, %75 : vector<2x384xf32>
    %cst_26 = arith.constant 5.000000e-01 : f32
    %78 = vector.broadcast %cst_26 : f32 to vector<2x384xf32>
    %79 = arith.addf %77, %78 : vector<2x384xf32>
    %80 = vector.extract_strided_slice %74 {offsets = [0, 384], sizes = [2, 128], strides = [1, 1]} : vector<2x512xf32> to vector<2x128xf32>
    %81 = vector.extract_strided_slice %79 {offsets = [0, 0], sizes = [2, 128], strides = [1, 1]} : vector<2x384xf32> to vector<2x128xf32>
    %82 = vector.extract_strided_slice %79 {offsets = [0, 128], sizes = [2, 128], strides = [1, 1]} : vector<2x384xf32> to vector<2x128xf32>
    %83 = vector.extract_strided_slice %79 {offsets = [0, 256], sizes = [2, 128], strides = [1, 1]} : vector<2x384xf32> to vector<2x128xf32>
    %84 = arith.mulf %82, %46 : vector<2x128xf32>
    %85 = arith.mulf %81, %80 : vector<2x128xf32>
    %86 = arith.addf %84, %85 : vector<2x128xf32>
    %87 = math.tanh %86 : vector<2x128xf32>
    %88 = arith.mulf %83, %87 : vector<2x128xf32>
    %c0_27 = arith.constant 0 : index
    %c0_28 = arith.constant 0 : index
    %89 = vector.load %arg5[%c0_27, %c0_28] : memref<128x512xf32, #tpu.memory_space<vmem>>, vector<128x512xf32>
    %cst_29 = arith.constant dense<0.000000e+00> : vector<2x512xf32>
    %90 = tpu.matmul %88, %89, %cst_29 {dimension_numbers = #tpu.dot_dimension_numbers<[1], [0], [0], [1], [0, 0, 1, 1], [], []>} : vector<2x128xf32>, vector<128x512xf32>, vector<2x512xf32> -> vector<2x512xf32>
    %91 = arith.addf %90, %13 : vector<2x512xf32>
    %92 = vector.extract_strided_slice %10 {offsets = [4, 0], sizes = [2, 512], strides = [1, 1]} : vector<16x512xf32> to vector<2x512xf32>
    %c0_30 = arith.constant 0 : index
    %c0_31 = arith.constant 0 : index
    %93 = vector.load %arg2[%c0_30, %c0_31] : memref<128x512xf32, #tpu.memory_space<vmem>>, vector<128x512xf32>
    %cst_32 = arith.constant dense<0.000000e+00> : vector<2x512xf32>
    %94 = tpu.matmul %70, %93, %cst_32 {dimension_numbers = #tpu.dot_dimension_numbers<[1], [0], [0], [1], [0, 0, 1, 1], [], []>} : vector<2x128xf32>, vector<128x512xf32>, vector<2x512xf32> -> vector<2x512xf32>
    %95 = arith.addf %94, %92 : vector<2x512xf32>
    %96 = math.tanh %95 : vector<2x512xf32>
    %97 = vector.extract_strided_slice %96 {offsets = [0, 0], sizes = [2, 384], strides = [1, 1]} : vector<2x512xf32> to vector<2x384xf32>
    %cst_33 = arith.constant 5.000000e-01 : f32
    %98 = vector.broadcast %cst_33 : f32 to vector<2x384xf32>
    %99 = arith.mulf %98, %97 : vector<2x384xf32>
    %cst_34 = arith.constant 5.000000e-01 : f32
    %100 = vector.broadcast %cst_34 : f32 to vector<2x384xf32>
    %101 = arith.addf %99, %100 : vector<2x384xf32>
    %102 = vector.extract_strided_slice %96 {offsets = [0, 384], sizes = [2, 128], strides = [1, 1]} : vector<2x512xf32> to vector<2x128xf32>
    %103 = vector.extract_strided_slice %101 {offsets = [0, 0], sizes = [2, 128], strides = [1, 1]} : vector<2x384xf32> to vector<2x128xf32>
    %104 = vector.extract_strided_slice %101 {offsets = [0, 128], sizes = [2, 128], strides = [1, 1]} : vector<2x384xf32> to vector<2x128xf32>
    %105 = vector.extract_strided_slice %101 {offsets = [0, 256], sizes = [2, 128], strides = [1, 1]} : vector<2x384xf32> to vector<2x128xf32>
    %106 = arith.mulf %104, %68 : vector<2x128xf32>
    %107 = arith.mulf %103, %102 : vector<2x128xf32>
    %108 = arith.addf %106, %107 : vector<2x128xf32>
    %109 = math.tanh %108 : vector<2x128xf32>
    %110 = arith.mulf %105, %109 : vector<2x128xf32>
    %c0_35 = arith.constant 0 : index
    %c0_36 = arith.constant 0 : index
    %111 = vector.load %arg4[%c0_35, %c0_36] : memref<128x512xf32, #tpu.memory_space<vmem>>, vector<128x512xf32>
    %cst_37 = arith.constant dense<0.000000e+00> : vector<2x512xf32>
    %112 = tpu.matmul %110, %111, %cst_37 {dimension_numbers = #tpu.dot_dimension_numbers<[1], [0], [0], [1], [0, 0, 1, 1], [], []>} : vector<2x128xf32>, vector<128x512xf32>, vector<2x512xf32> -> vector<2x512xf32>
    %113 = arith.addf %112, %91 : vector<2x512xf32>
    %114 = math.tanh %113 : vector<2x512xf32>
    %115 = vector.extract_strided_slice %114 {offsets = [0, 0], sizes = [2, 384], strides = [1, 1]} : vector<2x512xf32> to vector<2x384xf32>
    %cst_38 = arith.constant 5.000000e-01 : f32
    %116 = vector.broadcast %cst_38 : f32 to vector<2x384xf32>
    %117 = arith.mulf %116, %115 : vector<2x384xf32>
    %cst_39 = arith.constant 5.000000e-01 : f32
    %118 = vector.broadcast %cst_39 : f32 to vector<2x384xf32>
    %119 = arith.addf %117, %118 : vector<2x384xf32>
    %120 = vector.extract_strided_slice %114 {offsets = [0, 384], sizes = [2, 128], strides = [1, 1]} : vector<2x512xf32> to vector<2x128xf32>
    %121 = vector.extract_strided_slice %119 {offsets = [0, 0], sizes = [2, 128], strides = [1, 1]} : vector<2x384xf32> to vector<2x128xf32>
    %122 = vector.extract_strided_slice %119 {offsets = [0, 128], sizes = [2, 128], strides = [1, 1]} : vector<2x384xf32> to vector<2x128xf32>
    %123 = vector.extract_strided_slice %119 {offsets = [0, 256], sizes = [2, 128], strides = [1, 1]} : vector<2x384xf32> to vector<2x128xf32>
    %124 = arith.mulf %122, %86 : vector<2x128xf32>
    %125 = arith.mulf %121, %120 : vector<2x128xf32>
    %126 = arith.addf %124, %125 : vector<2x128xf32>
    %127 = math.tanh %126 : vector<2x128xf32>
    %128 = arith.mulf %123, %127 : vector<2x128xf32>
    %c0_40 = arith.constant 0 : index
    %c0_41 = arith.constant 0 : index
    %129 = vector.load %arg5[%c0_40, %c0_41] : memref<128x512xf32, #tpu.memory_space<vmem>>, vector<128x512xf32>
    %cst_42 = arith.constant dense<0.000000e+00> : vector<2x512xf32>
    %130 = tpu.matmul %128, %129, %cst_42 {dimension_numbers = #tpu.dot_dimension_numbers<[1], [0], [0], [1], [0, 0, 1, 1], [], []>} : vector<2x128xf32>, vector<128x512xf32>, vector<2x512xf32> -> vector<2x512xf32>
    %131 = arith.addf %130, %13 : vector<2x512xf32>
    %132 = vector.extract_strided_slice %10 {offsets = [6, 0], sizes = [2, 512], strides = [1, 1]} : vector<16x512xf32> to vector<2x512xf32>
    %c0_43 = arith.constant 0 : index
    %c0_44 = arith.constant 0 : index
    %133 = vector.load %arg2[%c0_43, %c0_44] : memref<128x512xf32, #tpu.memory_space<vmem>>, vector<128x512xf32>
    %cst_45 = arith.constant dense<0.000000e+00> : vector<2x512xf32>
    %134 = tpu.matmul %110, %133, %cst_45 {dimension_numbers = #tpu.dot_dimension_numbers<[1], [0], [0], [1], [0, 0, 1, 1], [], []>} : vector<2x128xf32>, vector<128x512xf32>, vector<2x512xf32> -> vector<2x512xf32>
    %135 = arith.addf %134, %132 : vector<2x512xf32>
    %136 = math.tanh %135 : vector<2x512xf32>
    %137 = vector.extract_strided_slice %136 {offsets = [0, 0], sizes = [2, 384], strides = [1, 1]} : vector<2x512xf32> to vector<2x384xf32>
    %cst_46 = arith.constant 5.000000e-01 : f32
    %138 = vector.broadcast %cst_46 : f32 to vector<2x384xf32>
    %139 = arith.mulf %138, %137 : vector<2x384xf32>
    %cst_47 = arith.constant 5.000000e-01 : f32
    %140 = vector.broadcast %cst_47 : f32 to vector<2x384xf32>
    %141 = arith.addf %139, %140 : vector<2x384xf32>
    %142 = vector.extract_strided_slice %136 {offsets = [0, 384], sizes = [2, 128], strides = [1, 1]} : vector<2x512xf32> to vector<2x128xf32>
    %143 = vector.extract_strided_slice %141 {offsets = [0, 0], sizes = [2, 128], strides = [1, 1]} : vector<2x384xf32> to vector<2x128xf32>
    %144 = vector.extract_strided_slice %141 {offsets = [0, 128], sizes = [2, 128], strides = [1, 1]} : vector<2x384xf32> to vector<2x128xf32>
    %145 = vector.extract_strided_slice %141 {offsets = [0, 256], sizes = [2, 128], strides = [1, 1]} : vector<2x384xf32> to vector<2x128xf32>
    %146 = arith.mulf %144, %108 : vector<2x128xf32>
    %147 = arith.mulf %143, %142 : vector<2x128xf32>
    %148 = arith.addf %146, %147 : vector<2x128xf32>
    %149 = math.tanh %148 : vector<2x128xf32>
    %150 = arith.mulf %145, %149 : vector<2x128xf32>
    %c0_48 = arith.constant 0 : index
    %c0_49 = arith.constant 0 : index
    %151 = vector.load %arg4[%c0_48, %c0_49] : memref<128x512xf32, #tpu.memory_space<vmem>>, vector<128x512xf32>
    %cst_50 = arith.constant dense<0.000000e+00> : vector<2x512xf32>
    %152 = tpu.matmul %150, %151, %cst_50 {dimension_numbers = #tpu.dot_dimension_numbers<[1], [0], [0], [1], [0, 0, 1, 1], [], []>} : vector<2x128xf32>, vector<128x512xf32>, vector<2x512xf32> -> vector<2x512xf32>
    %153 = arith.addf %152, %131 : vector<2x512xf32>
    %154 = math.tanh %153 : vector<2x512xf32>
    %155 = vector.extract_strided_slice %154 {offsets = [0, 0], sizes = [2, 384], strides = [1, 1]} : vector<2x512xf32> to vector<2x384xf32>
    %cst_51 = arith.constant 5.000000e-01 : f32
    %156 = vector.broadcast %cst_51 : f32 to vector<2x384xf32>
    %157 = arith.mulf %156, %155 : vector<2x384xf32>
    %cst_52 = arith.constant 5.000000e-01 : f32
    %158 = vector.broadcast %cst_52 : f32 to vector<2x384xf32>
    %159 = arith.addf %157, %158 : vector<2x384xf32>
    %160 = vector.extract_strided_slice %154 {offsets = [0, 384], sizes = [2, 128], strides = [1, 1]} : vector<2x512xf32> to vector<2x128xf32>
    %161 = vector.extract_strided_slice %159 {offsets = [0, 0], sizes = [2, 128], strides = [1, 1]} : vector<2x384xf32> to vector<2x128xf32>
    %162 = vector.extract_strided_slice %159 {offsets = [0, 128], sizes = [2, 128], strides = [1, 1]} : vector<2x384xf32> to vector<2x128xf32>
    %163 = vector.extract_strided_slice %159 {offsets = [0, 256], sizes = [2, 128], strides = [1, 1]} : vector<2x384xf32> to vector<2x128xf32>
    %164 = arith.mulf %162, %126 : vector<2x128xf32>
    %165 = arith.mulf %161, %160 : vector<2x128xf32>
    %166 = arith.addf %164, %165 : vector<2x128xf32>
    %167 = math.tanh %166 : vector<2x128xf32>
    %168 = arith.mulf %163, %167 : vector<2x128xf32>
    %c0_53 = arith.constant 0 : index
    %c0_54 = arith.constant 0 : index
    %169 = vector.load %arg5[%c0_53, %c0_54] : memref<128x512xf32, #tpu.memory_space<vmem>>, vector<128x512xf32>
    %cst_55 = arith.constant dense<0.000000e+00> : vector<2x512xf32>
    %170 = tpu.matmul %168, %169, %cst_55 {dimension_numbers = #tpu.dot_dimension_numbers<[1], [0], [0], [1], [0, 0, 1, 1], [], []>} : vector<2x128xf32>, vector<128x512xf32>, vector<2x512xf32> -> vector<2x512xf32>
    %171 = arith.addf %170, %13 : vector<2x512xf32>
    %172 = vector.extract_strided_slice %10 {offsets = [8, 0], sizes = [2, 512], strides = [1, 1]} : vector<16x512xf32> to vector<2x512xf32>
    %c0_56 = arith.constant 0 : index
    %c0_57 = arith.constant 0 : index
    %173 = vector.load %arg2[%c0_56, %c0_57] : memref<128x512xf32, #tpu.memory_space<vmem>>, vector<128x512xf32>
    %cst_58 = arith.constant dense<0.000000e+00> : vector<2x512xf32>
    %174 = tpu.matmul %150, %173, %cst_58 {dimension_numbers = #tpu.dot_dimension_numbers<[1], [0], [0], [1], [0, 0, 1, 1], [], []>} : vector<2x128xf32>, vector<128x512xf32>, vector<2x512xf32> -> vector<2x512xf32>
    %175 = arith.addf %174, %172 : vector<2x512xf32>
    %176 = math.tanh %175 : vector<2x512xf32>
    %177 = vector.extract_strided_slice %176 {offsets = [0, 0], sizes = [2, 384], strides = [1, 1]} : vector<2x512xf32> to vector<2x384xf32>
    %cst_59 = arith.constant 5.000000e-01 : f32
    %178 = vector.broadcast %cst_59 : f32 to vector<2x384xf32>
    %179 = arith.mulf %178, %177 : vector<2x384xf32>
    %cst_60 = arith.constant 5.000000e-01 : f32
    %180 = vector.broadcast %cst_60 : f32 to vector<2x384xf32>
    %181 = arith.addf %179, %180 : vector<2x384xf32>
    %182 = vector.extract_strided_slice %176 {offsets = [0, 384], sizes = [2, 128], strides = [1, 1]} : vector<2x512xf32> to vector<2x128xf32>
    %183 = vector.extract_strided_slice %181 {offsets = [0, 0], sizes = [2, 128], strides = [1, 1]} : vector<2x384xf32> to vector<2x128xf32>
    %184 = vector.extract_strided_slice %181 {offsets = [0, 128], sizes = [2, 128], strides = [1, 1]} : vector<2x384xf32> to vector<2x128xf32>
    %185 = vector.extract_strided_slice %181 {offsets = [0, 256], sizes = [2, 128], strides = [1, 1]} : vector<2x384xf32> to vector<2x128xf32>
    %186 = arith.mulf %184, %148 : vector<2x128xf32>
    %187 = arith.mulf %183, %182 : vector<2x128xf32>
    %188 = arith.addf %186, %187 : vector<2x128xf32>
    %189 = math.tanh %188 : vector<2x128xf32>
    %190 = arith.mulf %185, %189 : vector<2x128xf32>
    %c0_61 = arith.constant 0 : index
    %c0_62 = arith.constant 0 : index
    %191 = vector.load %arg4[%c0_61, %c0_62] : memref<128x512xf32, #tpu.memory_space<vmem>>, vector<128x512xf32>
    %cst_63 = arith.constant dense<0.000000e+00> : vector<2x512xf32>
    %192 = tpu.matmul %190, %191, %cst_63 {dimension_numbers = #tpu.dot_dimension_numbers<[1], [0], [0], [1], [0, 0, 1, 1], [], []>} : vector<2x128xf32>, vector<128x512xf32>, vector<2x512xf32> -> vector<2x512xf32>
    %193 = arith.addf %192, %171 : vector<2x512xf32>
    %194 = math.tanh %193 : vector<2x512xf32>
    %195 = vector.extract_strided_slice %194 {offsets = [0, 0], sizes = [2, 384], strides = [1, 1]} : vector<2x512xf32> to vector<2x384xf32>
    %cst_64 = arith.constant 5.000000e-01 : f32
    %196 = vector.broadcast %cst_64 : f32 to vector<2x384xf32>
    %197 = arith.mulf %196, %195 : vector<2x384xf32>
    %cst_65 = arith.constant 5.000000e-01 : f32
    %198 = vector.broadcast %cst_65 : f32 to vector<2x384xf32>
    %199 = arith.addf %197, %198 : vector<2x384xf32>
    %200 = vector.extract_strided_slice %194 {offsets = [0, 384], sizes = [2, 128], strides = [1, 1]} : vector<2x512xf32> to vector<2x128xf32>
    %201 = vector.extract_strided_slice %199 {offsets = [0, 0], sizes = [2, 128], strides = [1, 1]} : vector<2x384xf32> to vector<2x128xf32>
    %202 = vector.extract_strided_slice %199 {offsets = [0, 128], sizes = [2, 128], strides = [1, 1]} : vector<2x384xf32> to vector<2x128xf32>
    %203 = vector.extract_strided_slice %199 {offsets = [0, 256], sizes = [2, 128], strides = [1, 1]} : vector<2x384xf32> to vector<2x128xf32>
    %204 = arith.mulf %202, %166 : vector<2x128xf32>
    %205 = arith.mulf %201, %200 : vector<2x128xf32>
    %206 = arith.addf %204, %205 : vector<2x128xf32>
    %207 = math.tanh %206 : vector<2x128xf32>
    %208 = arith.mulf %203, %207 : vector<2x128xf32>
    %c0_66 = arith.constant 0 : index
    %c0_67 = arith.constant 0 : index
    %209 = vector.load %arg5[%c0_66, %c0_67] : memref<128x512xf32, #tpu.memory_space<vmem>>, vector<128x512xf32>
    %cst_68 = arith.constant dense<0.000000e+00> : vector<2x512xf32>
    %210 = tpu.matmul %208, %209, %cst_68 {dimension_numbers = #tpu.dot_dimension_numbers<[1], [0], [0], [1], [0, 0, 1, 1], [], []>} : vector<2x128xf32>, vector<128x512xf32>, vector<2x512xf32> -> vector<2x512xf32>
    %211 = arith.addf %210, %13 : vector<2x512xf32>
    %212 = vector.extract_strided_slice %10 {offsets = [10, 0], sizes = [2, 512], strides = [1, 1]} : vector<16x512xf32> to vector<2x512xf32>
    %c0_69 = arith.constant 0 : index
    %c0_70 = arith.constant 0 : index
    %213 = vector.load %arg2[%c0_69, %c0_70] : memref<128x512xf32, #tpu.memory_space<vmem>>, vector<128x512xf32>
    %cst_71 = arith.constant dense<0.000000e+00> : vector<2x512xf32>
    %214 = tpu.matmul %190, %213, %cst_71 {dimension_numbers = #tpu.dot_dimension_numbers<[1], [0], [0], [1], [0, 0, 1, 1], [], []>} : vector<2x128xf32>, vector<128x512xf32>, vector<2x512xf32> -> vector<2x512xf32>
    %215 = arith.addf %214, %212 : vector<2x512xf32>
    %216 = math.tanh %215 : vector<2x512xf32>
    %217 = vector.extract_strided_slice %216 {offsets = [0, 0], sizes = [2, 384], strides = [1, 1]} : vector<2x512xf32> to vector<2x384xf32>
    %cst_72 = arith.constant 5.000000e-01 : f32
    %218 = vector.broadcast %cst_72 : f32 to vector<2x384xf32>
    %219 = arith.mulf %218, %217 : vector<2x384xf32>
    %cst_73 = arith.constant 5.000000e-01 : f32
    %220 = vector.broadcast %cst_73 : f32 to vector<2x384xf32>
    %221 = arith.addf %219, %220 : vector<2x384xf32>
    %222 = vector.extract_strided_slice %216 {offsets = [0, 384], sizes = [2, 128], strides = [1, 1]} : vector<2x512xf32> to vector<2x128xf32>
    %223 = vector.extract_strided_slice %221 {offsets = [0, 0], sizes = [2, 128], strides = [1, 1]} : vector<2x384xf32> to vector<2x128xf32>
    %224 = vector.extract_strided_slice %221 {offsets = [0, 128], sizes = [2, 128], strides = [1, 1]} : vector<2x384xf32> to vector<2x128xf32>
    %225 = vector.extract_strided_slice %221 {offsets = [0, 256], sizes = [2, 128], strides = [1, 1]} : vector<2x384xf32> to vector<2x128xf32>
    %226 = arith.mulf %224, %188 : vector<2x128xf32>
    %227 = arith.mulf %223, %222 : vector<2x128xf32>
    %228 = arith.addf %226, %227 : vector<2x128xf32>
    %229 = math.tanh %228 : vector<2x128xf32>
    %230 = arith.mulf %225, %229 : vector<2x128xf32>
    %c0_74 = arith.constant 0 : index
    %c0_75 = arith.constant 0 : index
    %231 = vector.load %arg4[%c0_74, %c0_75] : memref<128x512xf32, #tpu.memory_space<vmem>>, vector<128x512xf32>
    %cst_76 = arith.constant dense<0.000000e+00> : vector<2x512xf32>
    %232 = tpu.matmul %230, %231, %cst_76 {dimension_numbers = #tpu.dot_dimension_numbers<[1], [0], [0], [1], [0, 0, 1, 1], [], []>} : vector<2x128xf32>, vector<128x512xf32>, vector<2x512xf32> -> vector<2x512xf32>
    %233 = arith.addf %232, %211 : vector<2x512xf32>
    %234 = math.tanh %233 : vector<2x512xf32>
    %235 = vector.extract_strided_slice %234 {offsets = [0, 0], sizes = [2, 384], strides = [1, 1]} : vector<2x512xf32> to vector<2x384xf32>
    %cst_77 = arith.constant 5.000000e-01 : f32
    %236 = vector.broadcast %cst_77 : f32 to vector<2x384xf32>
    %237 = arith.mulf %236, %235 : vector<2x384xf32>
    %cst_78 = arith.constant 5.000000e-01 : f32
    %238 = vector.broadcast %cst_78 : f32 to vector<2x384xf32>
    %239 = arith.addf %237, %238 : vector<2x384xf32>
    %240 = vector.extract_strided_slice %234 {offsets = [0, 384], sizes = [2, 128], strides = [1, 1]} : vector<2x512xf32> to vector<2x128xf32>
    %241 = vector.extract_strided_slice %239 {offsets = [0, 0], sizes = [2, 128], strides = [1, 1]} : vector<2x384xf32> to vector<2x128xf32>
    %242 = vector.extract_strided_slice %239 {offsets = [0, 128], sizes = [2, 128], strides = [1, 1]} : vector<2x384xf32> to vector<2x128xf32>
    %243 = vector.extract_strided_slice %239 {offsets = [0, 256], sizes = [2, 128], strides = [1, 1]} : vector<2x384xf32> to vector<2x128xf32>
    %244 = arith.mulf %242, %206 : vector<2x128xf32>
    %245 = arith.mulf %241, %240 : vector<2x128xf32>
    %246 = arith.addf %244, %245 : vector<2x128xf32>
    %247 = math.tanh %246 : vector<2x128xf32>
    %248 = arith.mulf %243, %247 : vector<2x128xf32>
    %c0_79 = arith.constant 0 : index
    %c0_80 = arith.constant 0 : index
    %249 = vector.load %arg5[%c0_79, %c0_80] : memref<128x512xf32, #tpu.memory_space<vmem>>, vector<128x512xf32>
    %cst_81 = arith.constant dense<0.000000e+00> : vector<2x512xf32>
    %250 = tpu.matmul %248, %249, %cst_81 {dimension_numbers = #tpu.dot_dimension_numbers<[1], [0], [0], [1], [0, 0, 1, 1], [], []>} : vector<2x128xf32>, vector<128x512xf32>, vector<2x512xf32> -> vector<2x512xf32>
    %251 = arith.addf %250, %13 : vector<2x512xf32>
    %252 = vector.extract_strided_slice %10 {offsets = [12, 0], sizes = [2, 512], strides = [1, 1]} : vector<16x512xf32> to vector<2x512xf32>
    %c0_82 = arith.constant 0 : index
    %c0_83 = arith.constant 0 : index
    %253 = vector.load %arg2[%c0_82, %c0_83] : memref<128x512xf32, #tpu.memory_space<vmem>>, vector<128x512xf32>
    %cst_84 = arith.constant dense<0.000000e+00> : vector<2x512xf32>
    %254 = tpu.matmul %230, %253, %cst_84 {dimension_numbers = #tpu.dot_dimension_numbers<[1], [0], [0], [1], [0, 0, 1, 1], [], []>} : vector<2x128xf32>, vector<128x512xf32>, vector<2x512xf32> -> vector<2x512xf32>
    %255 = arith.addf %254, %252 : vector<2x512xf32>
    %256 = math.tanh %255 : vector<2x512xf32>
    %257 = vector.extract_strided_slice %256 {offsets = [0, 0], sizes = [2, 384], strides = [1, 1]} : vector<2x512xf32> to vector<2x384xf32>
    %cst_85 = arith.constant 5.000000e-01 : f32
    %258 = vector.broadcast %cst_85 : f32 to vector<2x384xf32>
    %259 = arith.mulf %258, %257 : vector<2x384xf32>
    %cst_86 = arith.constant 5.000000e-01 : f32
    %260 = vector.broadcast %cst_86 : f32 to vector<2x384xf32>
    %261 = arith.addf %259, %260 : vector<2x384xf32>
    %262 = vector.extract_strided_slice %256 {offsets = [0, 384], sizes = [2, 128], strides = [1, 1]} : vector<2x512xf32> to vector<2x128xf32>
    %263 = vector.extract_strided_slice %261 {offsets = [0, 0], sizes = [2, 128], strides = [1, 1]} : vector<2x384xf32> to vector<2x128xf32>
    %264 = vector.extract_strided_slice %261 {offsets = [0, 128], sizes = [2, 128], strides = [1, 1]} : vector<2x384xf32> to vector<2x128xf32>
    %265 = vector.extract_strided_slice %261 {offsets = [0, 256], sizes = [2, 128], strides = [1, 1]} : vector<2x384xf32> to vector<2x128xf32>
    %266 = arith.mulf %264, %228 : vector<2x128xf32>
    %267 = arith.mulf %263, %262 : vector<2x128xf32>
    %268 = arith.addf %266, %267 : vector<2x128xf32>
    %269 = math.tanh %268 : vector<2x128xf32>
    %270 = arith.mulf %265, %269 : vector<2x128xf32>
    %c0_87 = arith.constant 0 : index
    %c0_88 = arith.constant 0 : index
    %271 = vector.load %arg4[%c0_87, %c0_88] : memref<128x512xf32, #tpu.memory_space<vmem>>, vector<128x512xf32>
    %cst_89 = arith.constant dense<0.000000e+00> : vector<2x512xf32>
    %272 = tpu.matmul %270, %271, %cst_89 {dimension_numbers = #tpu.dot_dimension_numbers<[1], [0], [0], [1], [0, 0, 1, 1], [], []>} : vector<2x128xf32>, vector<128x512xf32>, vector<2x512xf32> -> vector<2x512xf32>
    %273 = arith.addf %272, %251 : vector<2x512xf32>
    %274 = math.tanh %273 : vector<2x512xf32>
    %275 = vector.extract_strided_slice %274 {offsets = [0, 0], sizes = [2, 384], strides = [1, 1]} : vector<2x512xf32> to vector<2x384xf32>
    %cst_90 = arith.constant 5.000000e-01 : f32
    %276 = vector.broadcast %cst_90 : f32 to vector<2x384xf32>
    %277 = arith.mulf %276, %275 : vector<2x384xf32>
    %cst_91 = arith.constant 5.000000e-01 : f32
    %278 = vector.broadcast %cst_91 : f32 to vector<2x384xf32>
    %279 = arith.addf %277, %278 : vector<2x384xf32>
    %280 = vector.extract_strided_slice %274 {offsets = [0, 384], sizes = [2, 128], strides = [1, 1]} : vector<2x512xf32> to vector<2x128xf32>
    %281 = vector.extract_strided_slice %279 {offsets = [0, 0], sizes = [2, 128], strides = [1, 1]} : vector<2x384xf32> to vector<2x128xf32>
    %282 = vector.extract_strided_slice %279 {offsets = [0, 128], sizes = [2, 128], strides = [1, 1]} : vector<2x384xf32> to vector<2x128xf32>
    %283 = vector.extract_strided_slice %279 {offsets = [0, 256], sizes = [2, 128], strides = [1, 1]} : vector<2x384xf32> to vector<2x128xf32>
    %284 = arith.mulf %282, %246 : vector<2x128xf32>
    %285 = arith.mulf %281, %280 : vector<2x128xf32>
    %286 = arith.addf %284, %285 : vector<2x128xf32>
    %287 = math.tanh %286 : vector<2x128xf32>
    %288 = arith.mulf %283, %287 : vector<2x128xf32>
    %c0_92 = arith.constant 0 : index
    %c0_93 = arith.constant 0 : index
    %289 = vector.load %arg5[%c0_92, %c0_93] : memref<128x512xf32, #tpu.memory_space<vmem>>, vector<128x512xf32>
    %cst_94 = arith.constant dense<0.000000e+00> : vector<2x512xf32>
    %290 = tpu.matmul %288, %289, %cst_94 {dimension_numbers = #tpu.dot_dimension_numbers<[1], [0], [0], [1], [0, 0, 1, 1], [], []>} : vector<2x128xf32>, vector<128x512xf32>, vector<2x512xf32> -> vector<2x512xf32>
    %291 = arith.addf %290, %13 : vector<2x512xf32>
    %292 = vector.extract_strided_slice %10 {offsets = [14, 0], sizes = [2, 512], strides = [1, 1]} : vector<16x512xf32> to vector<2x512xf32>
    %c0_95 = arith.constant 0 : index
    %c0_96 = arith.constant 0 : index
    %293 = vector.load %arg2[%c0_95, %c0_96] : memref<128x512xf32, #tpu.memory_space<vmem>>, vector<128x512xf32>
    %cst_97 = arith.constant dense<0.000000e+00> : vector<2x512xf32>
    %294 = tpu.matmul %270, %293, %cst_97 {dimension_numbers = #tpu.dot_dimension_numbers<[1], [0], [0], [1], [0, 0, 1, 1], [], []>} : vector<2x128xf32>, vector<128x512xf32>, vector<2x512xf32> -> vector<2x512xf32>
    %295 = arith.addf %294, %292 : vector<2x512xf32>
    %296 = math.tanh %295 : vector<2x512xf32>
    %297 = vector.extract_strided_slice %296 {offsets = [0, 0], sizes = [2, 384], strides = [1, 1]} : vector<2x512xf32> to vector<2x384xf32>
    %cst_98 = arith.constant 5.000000e-01 : f32
    %298 = vector.broadcast %cst_98 : f32 to vector<2x384xf32>
    %299 = arith.mulf %298, %297 : vector<2x384xf32>
    %cst_99 = arith.constant 5.000000e-01 : f32
    %300 = vector.broadcast %cst_99 : f32 to vector<2x384xf32>
    %301 = arith.addf %299, %300 : vector<2x384xf32>
    %302 = vector.extract_strided_slice %296 {offsets = [0, 384], sizes = [2, 128], strides = [1, 1]} : vector<2x512xf32> to vector<2x128xf32>
    %303 = vector.extract_strided_slice %301 {offsets = [0, 0], sizes = [2, 128], strides = [1, 1]} : vector<2x384xf32> to vector<2x128xf32>
    %304 = vector.extract_strided_slice %301 {offsets = [0, 128], sizes = [2, 128], strides = [1, 1]} : vector<2x384xf32> to vector<2x128xf32>
    %305 = vector.extract_strided_slice %301 {offsets = [0, 256], sizes = [2, 128], strides = [1, 1]} : vector<2x384xf32> to vector<2x128xf32>
    %306 = arith.mulf %304, %268 : vector<2x128xf32>
    %307 = arith.mulf %303, %302 : vector<2x128xf32>
    %308 = arith.addf %306, %307 : vector<2x128xf32>
    %309 = math.tanh %308 : vector<2x128xf32>
    %310 = arith.mulf %305, %309 : vector<2x128xf32>
    %c0_100 = arith.constant 0 : index
    %c0_101 = arith.constant 0 : index
    %311 = vector.load %arg4[%c0_100, %c0_101] : memref<128x512xf32, #tpu.memory_space<vmem>>, vector<128x512xf32>
    %cst_102 = arith.constant dense<0.000000e+00> : vector<2x512xf32>
    %312 = tpu.matmul %310, %311, %cst_102 {dimension_numbers = #tpu.dot_dimension_numbers<[1], [0], [0], [1], [0, 0, 1, 1], [], []>} : vector<2x128xf32>, vector<128x512xf32>, vector<2x512xf32> -> vector<2x512xf32>
    %313 = arith.addf %312, %291 : vector<2x512xf32>
    %314 = math.tanh %313 : vector<2x512xf32>
    %315 = vector.extract_strided_slice %314 {offsets = [0, 0], sizes = [2, 384], strides = [1, 1]} : vector<2x512xf32> to vector<2x384xf32>
    %cst_103 = arith.constant 5.000000e-01 : f32
    %316 = vector.broadcast %cst_103 : f32 to vector<2x384xf32>
    %317 = arith.mulf %316, %315 : vector<2x384xf32>
    %cst_104 = arith.constant 5.000000e-01 : f32
    %318 = vector.broadcast %cst_104 : f32 to vector<2x384xf32>
    %319 = arith.addf %317, %318 : vector<2x384xf32>
    %320 = vector.extract_strided_slice %314 {offsets = [0, 384], sizes = [2, 128], strides = [1, 1]} : vector<2x512xf32> to vector<2x128xf32>
    %321 = vector.extract_strided_slice %319 {offsets = [0, 0], sizes = [2, 128], strides = [1, 1]} : vector<2x384xf32> to vector<2x128xf32>
    %322 = vector.extract_strided_slice %319 {offsets = [0, 128], sizes = [2, 128], strides = [1, 1]} : vector<2x384xf32> to vector<2x128xf32>
    %323 = vector.extract_strided_slice %319 {offsets = [0, 256], sizes = [2, 128], strides = [1, 1]} : vector<2x384xf32> to vector<2x128xf32>
    %324 = arith.mulf %322, %286 : vector<2x128xf32>
    %325 = arith.mulf %321, %320 : vector<2x128xf32>
    %326 = arith.addf %324, %325 : vector<2x128xf32>
    %327 = math.tanh %326 : vector<2x128xf32>
    %328 = arith.mulf %323, %327 : vector<2x128xf32>
    %c0_105 = arith.constant 0 : index
    %c0_106 = arith.constant 0 : index
    %329 = vector.load %arg7[%c0_105, %c0_106] : memref<1x128xf32, #tpu.memory_space<vmem>>, vector<1x128xf32>
    %330 = vector.broadcast %329 : vector<1x128xf32> to vector<2x128xf32>
    %331 = arith.mulf %328, %330 : vector<2x128xf32>
    %cst_107 = arith.constant dense<0.000000e+00> : vector<2xf32>
    %332 = vector.multi_reduction <add>, %331, %cst_107 [1] : vector<2x128xf32> to vector<2xf32>
    %333 = vector.shape_cast %332 : vector<2xf32> to vector<2x1xf32>
    %c0_108 = arith.constant 0 : index
    %c0_109 = arith.constant 0 : index
    %334 = vector.load %arg8[%c0_108, %c0_109] : memref<1x1xf32, #tpu.memory_space<vmem>>, vector<1x1xf32>
    %335 = vector.broadcast %334 : vector<1x1xf32> to vector<2x1xf32>
    %336 = arith.addf %333, %335 : vector<2x1xf32>
    %c0_110 = arith.constant 0 : index
    %c0_111 = arith.constant 0 : index
    %337 = vector.load %arg9[%c0_110, %c0_111] : memref<2x1xf32, #tpu.memory_space<vmem>>, vector<2x1xf32>
    tpu.vector_store %arg9[%c0_110, %c0_111], %336 {strides = array<i32>} : memref<2x1xf32, #tpu.memory_space<vmem>>, vector<2x1xf32>,
    return
  }
}

</mosaic_0001>

<bundles_post_ra>
// kernel: tpu_custom_call.1
= control target key start
LH: loop header
LB: loop body
LE: loop exit
PB: predicated region body
PF: predicated region fallthrough
CT: control target
= control target key end

     0   :  { %s6792_s0 = inlined_call_operand.vmem [shape: f32[16,1], index: 0, kind: input, shape index: {}]   ;;  %s6793_s1 = inlined_call_operand.vmem [shape: f32[1,512], index: 1, kind: input, shape index: {}]   ;;  %s6794_s2 = inlined_call_operand.hbm [shape: f32[128,512], index: 2, kind: input, shape index: {}]   ;;  %s6795_s3 = inlined_call_operand.vmem [shape: f32[1,512], index: 3, kind: input, shape index: {}]   ;;  %s6796_s4 = inlined_call_operand.hbm [shape: f32[128,512], index: 4, kind: input, shape index: {}]   ;;  %s6797_s5 = inlined_call_operand.hbm [shape: f32[128,512], index: 5, kind: input, shape index: {}]   ;;  %s6798_s6 = inlined_call_operand.vmem [shape: f32[1,512], index: 6, kind: input, shape index: {}]   ;;  %s6799_s7 = inlined_call_operand.vmem [shape: f32[1,128], index: 7, kind: input, shape index: {}]   ;;  %s6800_s8 = inlined_call_operand.<no memory space> [shape: f32[1,1], index: 8, kind: input, shape index: {}]   ;;  %s6801_s9 = inlined_call_operand.vmem [shape: f32[2,1], index: 9, kind: output, shape index: {}]  }
   0x1   :  { %v14_v0 = vstv %s6800_s8 }
   0x2   :  { %15 = vst [vmem:[#allocation2] sm:$0x1] %v14_v0 }
   0x3   :  { %16 = vsyncpa [#allocation4], 0 }
   0x4   :  { %17 = vsyncpa [#allocation6], 0  ;;  %s5513_s11 = smov [#allocation5]   ;;  %s5514_s13 = smov [#allocation3]  }
   0x5   :  { %s41_s12 = sshll.u32 %s5513_s11, 4  ;;  %s27_s14 = sshll.u32 %s5514_s13, 4  ;;  %s42_s12 = int_to_ptr.vmem [resolvable:$true] %s41_s12  ;;  %s5573_s14 = int_to_ptr.vmem [resolvable:$true] %s27_s14 }
   0x6   :  { %s5443_s17 = scalar_lea.hbm %s6796_s4, 8192 }
   0x7   :  { %p5444_p0 = scmp.ne.s32.totalorder %s6796_s4, %s5443_s17  ;;  %p5447_p1 = scmp.lt.u32.totalorder %s5443_s17, %s6796_s4 }
   0x9   :  { %p5449_p2 = pnand %p5447_p1, %p5444_p0 }
   0xb   :  { %5452 = shalt.err (!%p5449_p2)
}
   0xc   :  { %s5453_s21 = scalar_lea.vmem %s42_s12, 8192  ;;  %p5458_p4 = scmp.lt.s32.totalorder %s42_s12, %s42_s12 }
   0xd   :  { %p5454_p3 = scmp.ne.s32.totalorder %s42_s12, %s5453_s21  ;;  %p5459_p5 = scmp.lt.s32.totalorder %s5453_s21, %s5453_s21 }
   0xf   :  { %p5460_p6 = por %p5459_p5, %p5458_p4 }
  0x11   :  { %p5461_p7 = pnand %p5460_p6, %p5454_p3 }
  0x13   :  { %5464 = shalt.err (!%p5461_p7)
}
  0x14   :  { %s5515_s22 = smov 512   ;;  %s5516_s23 = smov 32  }
  0x15   :  { %47 = dma.hbm_to_vmem [thread:$0]  %s6796_s4, 8192, %s42_s12, [#allocation6], %s5515_s22, %s5515_s22, %s5516_s23  }
  0x16   :  { %s5465_s28 = scalar_lea.hbm %s6794_s2, 8192 }
  0x17   :  { %p5466_p8 = scmp.ne.s32.totalorder %s6794_s2, %s5465_s28  ;;  %p5469_p9 = scmp.lt.u32.totalorder %s5465_s28, %s6794_s2 }
  0x19   :  { %p5471_p10 = pnand %p5469_p9, %p5466_p8 }
  0x1b   :  { %5474 = shalt.err (!%p5471_p10)
}
  0x1c   :  { %s5475_s13 = scalar_lea.vmem %s5573_s14, 8192  ;;  %p5480_p12 = scmp.lt.s32.totalorder %s5573_s14, %s5573_s14 }
  0x1d   :  { %p5476_p11 = scmp.ne.s32.totalorder %s5573_s14, %s5475_s13  ;;  %p5481_p13 = scmp.lt.s32.totalorder %s5475_s13, %s5475_s13 }
  0x1f   :  { %p5482_p0 = por %p5481_p13, %p5480_p12 }
  0x21   :  { %p5483_p1 = pnand %p5482_p0, %p5476_p11 }
  0x23   :  { %5486 = shalt.err (!%p5483_p1)
}
  0x24   :  { %33 = dma.hbm_to_vmem [thread:$0]  %s6794_s2, 8192, %s5573_s14, [#allocation4], %s5515_s22, %s5515_s22, %s5516_s23  }
  0x25   :  { %s5517_s15 = smov [#allocation7]   ;;  %s5487_s19 = scalar_lea.hbm %s6797_s5, 8192 }
  0x26   :  { %s53_s16 = sshll.u32 %s5517_s15, 4  ;;  %p5488_p2 = scmp.ne.s32.totalorder %s6797_s5, %s5487_s19  ;;  %s54_s16 = int_to_ptr.vmem [resolvable:$true] %s53_s16 }
  0x27   :  { %p5491_p3 = scmp.lt.u32.totalorder %s5487_s19, %s6797_s5 }
  0x29   :  { %p5493_p4 = pnand %p5491_p3, %p5488_p2 }
  0x2b   :  { %5496 = shalt.err (!%p5493_p4)
}
  0x2c   :  { %s5497_s25 = scalar_lea.vmem %s54_s16, 8192  ;;  %p5502_p6 = scmp.lt.s32.totalorder %s54_s16, %s54_s16 }
  0x2d   :  { %p5498_p5 = scmp.ne.s32.totalorder %s54_s16, %s5497_s25  ;;  %p5503_p7 = scmp.lt.s32.totalorder %s5497_s25, %s5497_s25 }
  0x2f   :  { %p5504_p8 = por %p5503_p7, %p5502_p6 }
  0x31   :  { %p5505_p9 = pnand %p5504_p8, %p5498_p5 }
  0x33   :  { %5508 = shalt.err (!%p5505_p9)
}
  0x34   :  { %59 = dma.hbm_to_vmem [thread:$0]  %s6797_s5, 8192, %s54_s16, [#allocation6], %s5515_s22, %s5515_s22, %s5516_s23  }
  0x35   :  { %5509 = dma.done.wait [#allocation4], 8192  }
  0x36   :  { %5510 = vsyncadd [#allocation4], 4294959104 }
  0x37   :  { %5511 = dma.done.wait [#allocation6], 16384  }
  0x38   :  { %5512 = vsyncadd [#allocation6], 4294950912  ;;  %v5518_v1 = vmov 0   ;;  %v75_v2 = vld [vmem:[%s6792_s0] sm:$0xff]  ;;  %v76_v3 = vld [vmem:[%s6792_s0 + $0x8] sm:$0xff]  ;;  %v6802_v0 = vmov 0.0  }
  0x39   :  { %5282 = vset.pattern.permute.xlu0 %v5518_v1  ;;  %v185_v4 = vld [vmem:[#allocation5 + $0x8] sm:$0xff]  ;;  %v187_v6 = vld [vmem:[#allocation5 + $0x18] sm:$0xff]  ;;  %v184_v9 = vld [vmem:[#allocation5] sm:$0xff]  ;;  %312 = vmatprep.mubr.f32.mxu0 %v6802_v0  ;;  %vm3789_vm0 = vcmask 1041408   ;;  %vm3801_vm1 = vcmask 1024  }
  0x3a   :  { %79 = vperm.xlu0 %5282, %v75_v2   ;;  %v189_v5 = vld [vmem:[#allocation5 + $0x28] sm:$0xff]  ;;  %v191_v8 = vld [vmem:[#allocation5 + $0x38] sm:$0xff]  ;;  %v188_v10 = vld [vmem:[#allocation5 + $0x20] sm:$0xff]  ;;  %383 = vmatprep.mubr.f32.mxu1 %v6802_v0 }
  0x3b   :  { %v5631_v7 = vpack.c.bf16 %v189_v5, %v185_v4  ;;  %v5633_v11 = vpack.c.bf16 %v191_v8, %v187_v6  ;;  %v5635_v12 = vpack.c.bf16 %v188_v10, %v184_v9  ;;  %v186_v13 = vld [vmem:[#allocation5 + $0x10] sm:$0xff]  ;;  %v193_v16 = vld [vmem:[#allocation5 + $0x48] sm:$0xff]  ;;  %v195_v18 = vld [vmem:[#allocation5 + $0x58] sm:$0xff] }
  0x3c   :  { %v190_v14 = vld [vmem:[#allocation5 + $0x30] sm:$0xff]  ;;  %v197_v17 = vld [vmem:[#allocation5 + $0x68] sm:$0xff]  ;;  %v199_v20 = vld [vmem:[#allocation5 + $0x78] sm:$0xff] }
  0x3d   :  { %6993 = vst [vmem:[#allocation10_spill] sm:$0xff] %v5631_v7  ;;  %6994 = vst [vmem:[#allocation11_spill] sm:$0xff] %v5633_v11  ;;  %3812 = vmatprep.subr.bf16.mxu0 %v5631_v7  ;;  %v5638_v15 = vpack.c.bf16 %v190_v14, %v186_v13  ;;  %3844 = vmatprep.subr.bf16.mxu1 %v5633_v11  ;;  %v5643_v19 = vpack.c.bf16 %v197_v17, %v193_v16  ;;  %v192_v21 = vld [vmem:[#allocation5 + $0x40] sm:$0xff]  ;;  %v194_v25 = vld [vmem:[#allocation5 + $0x50] sm:$0xff] }
  0x3e   :  { %84 = vperm.xlu0 %5282, %v76_v3   ;;  %6995 = vst [vmem:[#allocation12_spill] sm:$0xff] %v5635_v12  ;;  %3814 = vmatpush1.bf16.msra.mxu0 %v5635_v12  ;;  %v196_v22 = vld [vmem:[#allocation5 + $0x60] sm:$0xff]  ;;  %v5645_v23 = vpack.c.bf16 %v199_v20, %v195_v18  ;;  %v198_v26 = vld [vmem:[#allocation5 + $0x70] sm:$0xff]  ;;  %v201_v28 = vld [vmem:[#allocation5 + $0x88] sm:$0xff] }
  0x3f   :  { %6996 = vst [vmem:[#allocation13_spill] sm:$0xff] %v5638_v15  ;;  %3846 = vmatpush1.bf16.msra.mxu1 %v5638_v15  ;;  %6997 = vst [vmem:[#allocation14_spill] sm:$0xff] %v5643_v19  ;;  %v5647_v24 = vpack.c.bf16 %v196_v22, %v192_v21  ;;  %3816 = vmatprep.subr.bf16.mxu0 %v5643_v19  ;;  %v5650_v27 = vpack.c.bf16 %v198_v26, %v194_v25  ;;  %v205_v29 = vld [vmem:[#allocation5 + $0xa8] sm:$0xff]  ;;  %v203_v30 = vld [vmem:[#allocation5 + $0x98] sm:$0xff] }
  0x40   :  { %6998 = vst [vmem:[#allocation15_spill] sm:$0xff] %v5645_v23  ;;  %3848 = vmatprep.subr.bf16.mxu1 %v5645_v23  ;;  %v5655_v31 = vpack.c.bf16 %v205_v29, %v201_v28  ;;  %v207_v32 = vld [vmem:[#allocation5 + $0xb8] sm:$0xff]  ;;  %v200_v33 = vld [vmem:[#allocation5 + $0x80] sm:$0xff]  ;;  %v202_v37 = vld [vmem:[#allocation5 + $0x90] sm:$0xff] }
  0x41   :  { %6999 = vst [vmem:[#allocation16_spill] sm:$0xff] %v5647_v24  ;;  %7000 = vst [vmem:[#allocation17_spill] sm:$0xff] %v5650_v27  ;;  %v204_v34 = vld [vmem:[#allocation5 + $0xa0] sm:$0xff]  ;;  %v5657_v35 = vpack.c.bf16 %v207_v32, %v203_v30  ;;  %v206_v38 = vld [vmem:[#allocation5 + $0xb0] sm:$0xff] }
  0x42   :  { %3818 = vmatpush1.bf16.msra.mxu0 %v5647_v24  ;;  %7001 = vst [vmem:[#allocation18_spill] sm:$0xff] %v5655_v31  ;;  %v5659_v36 = vpack.c.bf16 %v204_v34, %v200_v33  ;;  %v5662_v39 = vpack.c.bf16 %v206_v38, %v202_v37  ;;  %v209_v40 = vld [vmem:[#allocation5 + $0xc8] sm:$0xff]  ;;  %v211_v42 = vld [vmem:[#allocation5 + $0xd8] sm:$0xff]  ;;  %v208_v45 = vld [vmem:[#allocation5 + $0xc0] sm:$0xff] }
  0x43   :  { %3850 = vmatpush1.bf16.msra.mxu1 %v5650_v27  ;;  %7002 = vst [vmem:[#allocation19_spill] sm:$0xff] %v5657_v35  ;;  %3820 = vmatprep.subr.bf16.mxu0 %v5655_v31  ;;  %v213_v41 = vld [vmem:[#allocation5 + $0xe8] sm:$0xff]  ;;  %v215_v44 = vld [vmem:[#allocation5 + $0xf8] sm:$0xff]  ;;  %v212_v46 = vld [vmem:[#allocation5 + $0xe0] sm:$0xff] }
  0x44   :  { %7003 = vst [vmem:[#allocation20_spill] sm:$0xff] %v5659_v36  ;;  %7004 = vst [vmem:[#allocation21_spill] sm:$0xff] %v5662_v39  ;;  %3852 = vmatprep.subr.bf16.mxu1 %v5657_v35  ;;  %v5667_v43 = vpack.c.bf16 %v213_v41, %v209_v40  ;;  %v5669_v47 = vpack.c.bf16 %v215_v44, %v211_v42  ;;  %v5671_v48 = vpack.c.bf16 %v212_v46, %v208_v45  ;;  %v210_v49 = vld [vmem:[#allocation5 + $0xd0] sm:$0xff]  ;;  %v217_v52 = vld [vmem:[#allocation5 + $0x108] sm:$0xff] }
  0x45   :  { %v214_v50 = vld [vmem:[#allocation5 + $0xf0] sm:$0xff]  ;;  %v221_v53 = vld [vmem:[#allocation5 + $0x128] sm:$0xff]  ;;  %v219_v54 = vld [vmem:[#allocation5 + $0x118] sm:$0xff] }
  0x46   :  { %3822 = vmatpush1.bf16.msra.mxu0 %v5659_v36  ;;  %7005 = vst [vmem:[#allocation22_spill] sm:$0xff] %v5667_v43  ;;  %7006 = vst [vmem:[#allocation23_spill] sm:$0xff] %v5669_v47  ;;  %v5674_v51 = vpack.c.bf16 %v214_v50, %v210_v49  ;;  %v5679_v55 = vpack.c.bf16 %v221_v53, %v217_v52  ;;  %v223_v56 = vld [vmem:[#allocation5 + $0x138] sm:$0xff]  ;;  %v216_v57 = vld [vmem:[#allocation5 + $0x100] sm:$0xff]  ;;  %v89_v53 = vlaneseq }
  0x47   :  { %3854 = vmatpush1.bf16.msra.mxu1 %v5662_v39  ;;  %7007 = vst [vmem:[#allocation24_spill] sm:$0xff] %v5671_v48  ;;  %3824 = vmatprep.subr.bf16.mxu0 %v5667_v43  ;;  %v220_v58 = vld [vmem:[#allocation5 + $0x120] sm:$0xff]  ;;  %v5681_v59 = vpack.c.bf16 %v223_v56, %v219_v54  ;;  %v218_v61 = vld [vmem:[#allocation5 + $0x110] sm:$0xff]  ;;  %v225_v63 = vld [vmem:[#allocation5 + $0x148] sm:$0xff] }
  0x48   :  { %7008 = vst [vmem:[#allocation25_spill] sm:$0xff] %v5674_v51  ;;  %3856 = vmatprep.subr.bf16.mxu1 %v5669_v47  ;;  %7009 = vst [vmem:[#allocation26_spill] sm:$0xff] %v5679_v55  ;;  %v5683_v60 = vpack.c.bf16 %v220_v58, %v216_v57  ;;  %v222_v62 = vld [vmem:[#allocation5 + $0x130] sm:$0xff]  ;;  %v229_v2 = vld [vmem:[#allocation5 + $0x168] sm:$0xff]  ;;  %v90_v54 = vshrl.u32 %v89_v53, 7 }
  0x49   :  { %7010 = vst [vmem:[#allocation27_spill] sm:$0xff] %v5681_v59  ;;  %v5688_v1 = vpack.c.bf16 %v222_v62, %v218_v61  ;;  %v227_v3 = vld [vmem:[#allocation5 + $0x158] sm:$0xff]  ;;  %v5692_v5 = vpack.c.bf16 %v229_v2, %v225_v63  ;;  %v224_v8 = vld [vmem:[#allocation5 + $0x140] sm:$0xff]  ;;  %v226_v10 = vld [vmem:[#allocation5 + $0x150] sm:$0xff] }
  0x4a   :  { %3826 = vmatpush1.bf16.msra.mxu0 %v5671_v48  ;;  %7011 = vst [vmem:[#allocation28_spill] sm:$0xff] %v5683_v60  ;;  %v231_v4 = vld [vmem:[#allocation5 + $0x178] sm:$0xff]  ;;  %v228_v9 = vld [vmem:[#allocation5 + $0x160] sm:$0xff]  ;;  %v230_v14 = vld [vmem:[#allocation5 + $0x170] sm:$0xff]  ;;  %v5729_v56 = vsub.s32 0, %v90_v54  ;;  %v5731_v57 = vsub.s32 1, %v90_v54 }
  0x4b   :  { %3858 = vmatpush1.bf16.msra.mxu1 %v5674_v51  ;;  %3828 = vmatprep.subr.bf16.mxu0 %v5679_v55  ;;  %7012 = vst [vmem:[#allocation29_spill] sm:$0xff] %v5688_v1  ;;  %7013 = vst [vmem:[#allocation30_spill] sm:$0xff] %v5692_v5  ;;  %v5694_v6 = vpack.c.bf16 %v231_v4, %v227_v3  ;;  %v5697_v13 = vpack.c.bf16 %v228_v9, %v224_v8  ;;  %v233_v16 = vld [vmem:[#allocation5 + $0x188] sm:$0xff]  ;;  %v235_v21 = vld [vmem:[#allocation5 + $0x198] sm:$0xff]  ;;  %v5733_v58 = vsub.s32 3, %v90_v54 }
  0x4c   :  { %3860 = vmatprep.subr.bf16.mxu1 %v5681_v59  ;;  %v237_v17 = vld [vmem:[#allocation5 + $0x1a8] sm:$0xff]  ;;  %v5701_v18 = vpack.c.bf16 %v230_v14, %v226_v10  ;;  %v239_v22 = vld [vmem:[#allocation5 + $0x1b8] sm:$0xff]  ;;  %v232_v25 = vld [vmem:[#allocation5 + $0x180] sm:$0xff]  ;;  %v5744_v4 = vsub.s32 2, %v90_v54 }
  0x4d   :  { %7014 = vst [vmem:[#allocation31_spill] sm:$0xff] %v5694_v6  ;;  %7015 = vst [vmem:[#allocation32_spill] sm:$0xff] %v5697_v13  ;;  %v5703_v20 = vpack.c.bf16 %v237_v17, %v233_v16  ;;  %v5705_v26 = vpack.c.bf16 %v239_v22, %v235_v21  ;;  %v236_v28 = vld [vmem:[#allocation5 + $0x1a0] sm:$0xff]  ;;  %v234_v29 = vld [vmem:[#allocation5 + $0x190] sm:$0xff] }
  0x4e   :  { %3830 = vmatpush1.bf16.msra.mxu0 %v5683_v60  ;;  %7016 = vst [vmem:[#allocation33_spill] sm:$0xff] %v5701_v18  ;;  %v238_v30 = vld [vmem:[#allocation5 + $0x1b0] sm:$0xff]  ;;  %v5708_v32 = vpack.c.bf16 %v236_v28, %v232_v25  ;;  %v241_v33 = vld [vmem:[#allocation5 + $0x1c8] sm:$0xff]  ;;  %v243_v37 = vld [vmem:[#allocation5 + $0x1d8] sm:$0xff] }
  0x4f   :  { %3862 = vmatpush1.bf16.msra.mxu1 %v5688_v1  ;;  %3832 = vmatprep.subr.bf16.mxu0 %v5692_v5  ;;  %7017 = vst [vmem:[#allocation34_spill] sm:$0xff] %v5703_v20  ;;  %7018 = vst [vmem:[#allocation35_spill] sm:$0xff] %v5705_v26  ;;  %v245_v34 = vld [vmem:[#allocation5 + $0x1e8] sm:$0xff]  ;;  %v5712_v38 = vpack.c.bf16 %v238_v30, %v234_v29  ;;  %v247_v41 = vld [vmem:[#allocation5 + $0x1f8] sm:$0xff] }
  0x50   :  { %3864 = vmatprep.subr.bf16.mxu1 %v5694_v6  ;;  %7019 = vst [vmem:[#allocation36_spill] sm:$0xff] %v5708_v32  ;;  %v5714_v40 = vpack.c.bf16 %v245_v34, %v241_v33  ;;  %v240_v42 = vld [vmem:[#allocation5 + $0x1c0] sm:$0xff]  ;;  %v5717_v45 = vpack.c.bf16 %v247_v41, %v243_v37  ;;  %v242_v46 = vld [vmem:[#allocation5 + $0x1d0] sm:$0xff] }
  0x51   :  { %7020 = vst [vmem:[#allocation37_spill] sm:$0xff] %v5712_v38  ;;  %v244_v44 = vld [vmem:[#allocation5 + $0x1e0] sm:$0xff]  ;;  %v246_v49 = vld [vmem:[#allocation5 + $0x1f0] sm:$0xff] }
  0x52   :  { %3834 = vmatpush1.bf16.msra.mxu0 %v5697_v13  ;;  %7021 = vst [vmem:[#allocation38_spill] sm:$0xff] %v5714_v40  ;;  %7022 = vst [vmem:[#allocation39_spill] sm:$0xff] %v5717_v45  ;;  %v5720_v50 = vpack.c.bf16 %v244_v44, %v240_v42  ;;  %v5724_v52 = vpack.c.bf16 %v246_v49, %v242_v46  ;;  %v87_v61 = vld [vmem:[%s6793_s1] sm:$0xf] }
  0x53   :  { %3866 = vmatpush1.bf16.msra.mxu1 %v5701_v18  ;;  %3836 = vmatprep.subr.bf16.mxu0 %v5703_v20  ;;  %v109_v62 = vld [vmem:[%s6795_s3] sm:$0xf]  ;;  %v92_v63 = vrot.slane %v87_v61, %v5729_v56  ;;  %v96_v2 = vrot.slane %v87_v61, %v5731_v57  ;;  %v104_v3 = vrot.slane %v87_v61, %v5733_v58 }
  0x54   :  { %3868 = vmatprep.subr.bf16.mxu1 %v5705_v26  ;;  %7023 = vst [vmem:[#allocation40_spill] sm:$0xff] %v5720_v50  ;;  %7024 = vst [vmem:[#allocation41_spill] sm:$0xff] %v5724_v52  ;;  %v114_v8 = vrot.slane %v109_v62, %v5729_v56  ;;  %v118_v9 = vrot.slane %v109_v62, %v5731_v57  ;;  %v126_v14 = vrot.slane %v109_v62, %v5733_v58 }
  0x55   :  { %v100_v22 = vrot.slane %v87_v61, %v5744_v4  ;;  %v122_v29 = vrot.slane %v109_v62, %v5744_v4 }
  0x56   :  { %3838 = vmatpush1.bf16.msra.mxu0 %v5708_v32 }
  0x57   :  { %3870 = vmatpush1.bf16.msra.mxu1 %v5712_v38  ;;  %3840 = vmatprep.subr.bf16.mxu0 %v5714_v40 }
  0x58   :  { %3872 = vmatprep.subr.bf16.mxu1 %v5717_v45 }
  0x5a   :  { %3842 = vmatpush1.bf16.msra.mxu0 %v5720_v50 }
  0x5b   :  { %3874 = vmatpush1.bf16.msra.mxu1 %v5724_v52 }
  0xb9   :  { %v80_v10 = vpop.permute.xlu0 %79 }
  0xba   :  { %v131_v16 = vmul.f32 %v92_v63, %v80_v10  ;;  %v132_v17 = vmul.f32 %v96_v2, %v80_v10  ;;  %v134_v21 = vmul.f32 %v104_v3, %v80_v10  ;;  %v133_v54 = vmul.f32 %v100_v22, %v80_v10 }
  0xbc   :  { %v5750_v25 = vadd.f32 %v131_v16, %v114_v8  ;;  %v5752_v28 = vadd.f32 %v132_v17, %v118_v9  ;;  %v5755_v30 = vadd.f32 %v134_v21, %v126_v14  ;;  %v5768_v61 = vadd.f32 %v133_v54, %v122_v29 }
  0xbd   :  { %v85_v33 = vpop.permute.xlu0 %84 }
  0xbe   :  { %7025 = vst [vmem:[#allocation42_spill] sm:$0xff] %v5750_v25  ;;  %7026 = vst [vmem:[#allocation43_spill] sm:$0xff] %v5752_v28  ;;  %5283 = vtanh.f32 %v5750_v25  ;;  %v135_v34 = vmul.f32 %v92_v63, %v85_v33  ;;  %v136_v37 = vmul.f32 %v96_v2, %v85_v33  ;;  %v137_v41 = vmul.f32 %v100_v22, %v85_v33 }
  0xbf   :  { %7027 = vst [vmem:[#allocation44_spill] sm:$0xff] %v5755_v30  ;;  %5285 = vtanh.f32 %v5752_v28  ;;  %v138_v42 = vmul.f32 %v104_v3, %v85_v33  ;;  %7032 = vst [vmem:[#allocation49_spill] sm:$0xff] %v5768_v61 }
  0xc0   :  { %v5759_v44 = vadd.f32 %v135_v34, %v114_v8  ;;  %v5761_v46 = vadd.f32 %v136_v37, %v118_v9  ;;  %v5763_v49 = vadd.f32 %v137_v41, %v122_v29  ;;  %5287 = vtanh.f32 %v5755_v30  ;;  %v406_v37 = vld [vmem:[#allocation7 + $0x8] sm:$0xff] }
  0xc1   :  { %v5765_v53 = vadd.f32 %v138_v42, %v126_v14  ;;  %5289 = vtanh.f32 %v5768_v61  ;;  %v410_v41 = vld [vmem:[#allocation7 + $0x28] sm:$0xff]  ;;  %v408_v42 = vld [vmem:[#allocation7 + $0x18] sm:$0xff] }
  0xc2   :  { %7028 = vst [vmem:[#allocation45_spill] sm:$0xff] %v5759_v44  ;;  %7029 = vst [vmem:[#allocation46_spill] sm:$0xff] %v5761_v46  ;;  %v5780_v54 = vpack.c.bf16 %v410_v41, %v406_v37  ;;  %v413_v37 = vld [vmem:[#allocation7 + $0x40] sm:$0xff]  ;;  %v430_v46 = vld [vmem:[#allocation7 + $0xc8] sm:$0xff] }
  0xc3   :  { %7030 = vst [vmem:[#allocation47_spill] sm:$0xff] %v5763_v49  ;;  %7031 = vst [vmem:[#allocation48_spill] sm:$0xff] %v5765_v53  ;;  %v417_v41 = vld [vmem:[#allocation7 + $0x60] sm:$0xff] }
  0xc4   :  { %7033 = vst [vmem:[#allocation50_spill] sm:$0xff] %v5780_v54  ;;  %3876 = vmatprep.subr.bf16.mxu0 %v5780_v54 }
  0xc8   :  { %v5284_v62 = vpop.eup %5283 }
  0xc9   :  { %v5286_v63 = vpop.eup %5285  ;;  %v173_v2 = vmul.f32 0.5, %v5284_v62  ;;  %v412_v62 = vld [vmem:[#allocation7 + $0x38] sm:$0xff] }
  0xca   :  { %v174_v16 = vmul.f32 0.5, %v5286_v63  ;;  %v5288_v8 = vpop.eup %5287  ;;  %v405_v63 = vld [vmem:[#allocation7] sm:$0xff] }
  0xcb   :  { %v176_v3 = vadd.f32 0.5, %v173_v2  ;;  %v5290_v10 = vpop.eup %5289  ;;  %v409_v2 = vld [vmem:[#allocation7 + $0x20] sm:$0xff] }
  0xcc   :  { %v177_v17 = vadd.f32 0.5, %v174_v16  ;;  %v175_v14 = vmul.f32 0.5, %v5290_v10  ;;  %v5782_v16 = vpack.c.bf16 %v412_v62, %v408_v42  ;;  %v418_v10 = vld [vmem:[#allocation7 + $0x68] sm:$0xff]  ;;  %v5796_v62 = vpack.c.bf16 %v417_v41, %v413_v37  ;;  %v425_v37 = vld [vmem:[#allocation7 + $0xa0] sm:$0xff] }
  0xcd   :  { %v180_v9 = vmul.f32 %v5288_v8, %v176_v3  ;;  %v5784_v3 = vpack.c.bf16 %v409_v2, %v405_v63  ;;  %v407_v8 = vld [vmem:[#allocation7 + $0x10] sm:$0xff] }
  0xce   :  { %v179_v21 = vmul.f32 0.0, %v177_v17  ;;  %v178_v22 = vadd.f32 0.5, %v175_v14  ;;  %7034 = vst [vmem:[#allocation51_spill] sm:$0xff] %v5782_v16  ;;  %v411_v17 = vld [vmem:[#allocation7 + $0x30] sm:$0xff]  ;;  %3908 = vmatprep.subr.bf16.mxu1 %v5782_v16  ;;  %v416_v14 = vld [vmem:[#allocation7 + $0x58] sm:$0xff]  ;;  %7039 = vst [vmem:[#allocation56_spill] sm:$0xff] %v5796_v62 }
  0xcf   :  { %7035 = vst [vmem:[#allocation52_spill] sm:$0xff] %v5784_v3  ;;  %v415_v63 = vld [vmem:[#allocation7 + $0x50] sm:$0xff] }
  0xd0   :  { %v5771_v33 = vadd.f32 %v180_v9, %v179_v21  ;;  %v5787_v9 = vpack.c.bf16 %v411_v17, %v407_v8  ;;  %v414_v21 = vld [vmem:[#allocation7 + $0x48] sm:$0xff]  ;;  %v419_v2 = vld [vmem:[#allocation7 + $0x70] sm:$0xff] }
  0xd1   :  { %v5799_v8 = vpack.c.bf16 %v419_v2, %v415_v63  ;;  %v422_v17 = vld [vmem:[#allocation7 + $0x88] sm:$0xff]  ;;  %v423_v63 = vld [vmem:[#allocation7 + $0x90] sm:$0xff] }
  0xd2   :  { %5291 = vtanh.f32 %v5771_v33  ;;  %7036 = vst [vmem:[#allocation53_spill] sm:$0xff] %v5787_v9  ;;  %v427_v2 = vld [vmem:[#allocation7 + $0xb0] sm:$0xff] }
  0xd3   :  { %7040 = vst [vmem:[#allocation57_spill] sm:$0xff] %v5799_v8  ;;  %v5811_v53 = vpack.c.bf16 %v427_v2, %v423_v63  ;;  %v431_v63 = vld [vmem:[#allocation7 + $0xd0] sm:$0xff] }
  0xd4   :  { %v435_v2 = vld [vmem:[#allocation7 + $0xf0] sm:$0xff] }
  0xd5   :  { %7044 = vst [vmem:[#allocation61_spill] sm:$0xff] %v5811_v53 }
  0xdc   :  { %v5292_v29 = vpop.eup %5291 }
  0xdd   :  { %v5774_v34 = vmul.f32 %v5292_v29, %v178_v22  ;;  %v5792_v22 = vpack.c.bf16 %v418_v10, %v414_v21  ;;  %v420_v29 = vld [vmem:[#allocation7 + $0x78] sm:$0xff]  ;;  %v426_v21 = vld [vmem:[#allocation7 + $0xa8] sm:$0xff] }
  0xde   :  { %v5794_v42 = vpack.c.bf16 %v420_v29, %v416_v14  ;;  %v424_v10 = vld [vmem:[#allocation7 + $0x98] sm:$0xff]  ;;  %v421_v29 = vld [vmem:[#allocation7 + $0x80] sm:$0xff] }
  0xdf   :  { %313 = vmatmul.mubr.f32.vlgmr.msra.gmra.mrb[0].mxu0 %v5774_v34  ;;  %384 = vmatmul.mubr.f32.vlgmr.msra.gmra.mrb[0].mxu1 %v5774_v34  ;;  %7037 = vst [vmem:[#allocation54_spill] sm:$0xff] %v5792_v22  ;;  %v428_v14 = vld [vmem:[#allocation7 + $0xb8] sm:$0xff]  ;;  %v5808_v49 = vpack.c.bf16 %v425_v37, %v421_v29  ;;  %v433_v29 = vld [vmem:[#allocation7 + $0xe0] sm:$0xff] }
  0xe0   :  { %533 = vmatprep.mubr.f32.mxu0 %v6802_v0  ;;  %604 = vmatprep.mubr.f32.mxu1 %v6802_v0  ;;  %7038 = vst [vmem:[#allocation55_spill] sm:$0xff] %v5794_v42  ;;  %v5804_v0 = vpack.c.bf16 %v426_v21, %v422_v17  ;;  %v5806_v41 = vpack.c.bf16 %v428_v14, %v424_v10  ;;  %v434_v17 = vld [vmem:[#allocation7 + $0xe8] sm:$0xff]  ;;  %v432_v21 = vld [vmem:[#allocation7 + $0xd8] sm:$0xff]  ;;  %v429_v14 = vld [vmem:[#allocation7 + $0xc0] sm:$0xff] }
  0xe1   :  { %3878 = vmatpush1.bf16.msra.mxu0 %v5784_v3  ;;  %3910 = vmatpush1.bf16.msra.mxu1 %v5787_v9  ;;  %7043 = vst [vmem:[#allocation60_spill] sm:$0xff] %v5808_v49  ;;  %v5816_v44 = vpack.c.bf16 %v434_v17, %v430_v46  ;;  %v436_v10 = vld [vmem:[#allocation7 + $0xf8] sm:$0xff]  ;;  %v442_v46 = vld [vmem:[#allocation7 + $0x128] sm:$0xff] }
  0xe2   :  { %3880 = vmatprep.subr.bf16.mxu0 %v5792_v22  ;;  %3912 = vmatprep.subr.bf16.mxu1 %v5794_v42  ;;  %7041 = vst [vmem:[#allocation58_spill] sm:$0xff] %v5804_v0  ;;  %7042 = vst [vmem:[#allocation59_spill] sm:$0xff] %v5806_v41  ;;  %v5818_v37 = vpack.c.bf16 %v436_v10, %v432_v21  ;;  %v440_v17 = vld [vmem:[#allocation7 + $0x118] sm:$0xff]  ;;  %v437_v10 = vld [vmem:[#allocation7 + $0x100] sm:$0xff] }
  0xe3   :  { %7045 = vst [vmem:[#allocation62_spill] sm:$0xff] %v5816_v44  ;;  %v444_v21 = vld [vmem:[#allocation7 + $0x138] sm:$0xff]  ;;  %v612_v22 = vld [vmem:[#allocation3 + $0x8] sm:$0xff] }
  0xe4   :  { %7046 = vst [vmem:[#allocation63_spill] sm:$0xff] %v5818_v37  ;;  %v460_v42 = vld [vmem:[#allocation7 + $0x1b8] sm:$0xff] }
  0xe5   :  { %3882 = vmatpush1.bf16.msra.mxu0 %v5796_v62  ;;  %3914 = vmatpush1.bf16.msra.mxu1 %v5799_v8  ;;  %v5820_v8 = vpack.c.bf16 %v433_v29, %v429_v14  ;;  %v441_v14 = vld [vmem:[#allocation7 + $0x120] sm:$0xff]  ;;  %v5830_v29 = vpack.c.bf16 %v444_v21, %v440_v17  ;;  %v452_v17 = vld [vmem:[#allocation7 + $0x178] sm:$0xff] }
  0xe6   :  { %3884 = vmatprep.subr.bf16.mxu0 %v5804_v0  ;;  %3916 = vmatprep.subr.bf16.mxu1 %v5806_v41  ;;  %v5823_v41 = vpack.c.bf16 %v435_v2, %v431_v63  ;;  %v5832_v0 = vpack.c.bf16 %v441_v14, %v437_v10  ;;  %v439_v63 = vld [vmem:[#allocation7 + $0x110] sm:$0xff]  ;;  %v445_v21 = vld [vmem:[#allocation7 + $0x140] sm:$0xff]  ;;  %v456_v62 = vld [vmem:[#allocation7 + $0x198] sm:$0xff] }
  0xe7   :  { %7047 = vst [vmem:[#allocation64_spill] sm:$0xff] %v5820_v8  ;;  %7050 = vst [vmem:[#allocation67_spill] sm:$0xff] %v5830_v29  ;;  %v443_v2 = vld [vmem:[#allocation7 + $0x130] sm:$0xff]  ;;  %v449_v10 = vld [vmem:[#allocation7 + $0x160] sm:$0xff] }
  0xe8   :  { %7048 = vst [vmem:[#allocation65_spill] sm:$0xff] %v5823_v41  ;;  %7051 = vst [vmem:[#allocation68_spill] sm:$0xff] %v5832_v0  ;;  %v614_v9 = vld [vmem:[#allocation3 + $0x18] sm:$0xff] }
  0xe9   :  { %3886 = vmatpush1.bf16.msra.mxu0 %v5808_v49  ;;  %3918 = vmatpush1.bf16.msra.mxu1 %v5811_v53  ;;  %v438_v53 = vld [vmem:[#allocation7 + $0x108] sm:$0xff]  ;;  %v634_v3 = vld [vmem:[#allocation3 + $0xb8] sm:$0xff] }
  0xea   :  { %3888 = vmatprep.subr.bf16.mxu0 %v5816_v44  ;;  %3920 = vmatprep.subr.bf16.mxu1 %v5818_v37  ;;  %v5828_v49 = vpack.c.bf16 %v442_v46, %v438_v53  ;;  %v5835_v37 = vpack.c.bf16 %v443_v2, %v439_v63  ;;  %v450_v53 = vld [vmem:[#allocation7 + $0x168] sm:$0xff]  ;;  %v448_v46 = vld [vmem:[#allocation7 + $0x158] sm:$0xff]  ;;  %v5844_v44 = vpack.c.bf16 %v449_v10, %v445_v21  ;;  %v447_v63 = vld [vmem:[#allocation7 + $0x150] sm:$0xff] }
  0xeb   :  { %v5842_v14 = vpack.c.bf16 %v452_v17, %v448_v46  ;;  %v451_v2 = vld [vmem:[#allocation7 + $0x170] sm:$0xff]  ;;  %v453_v46 = vld [vmem:[#allocation7 + $0x180] sm:$0xff] }
  0xec   :  { %7049 = vst [vmem:[#allocation66_spill] sm:$0xff] %v5828_v49  ;;  %7052 = vst [vmem:[#allocation69_spill] sm:$0xff] %v5835_v37  ;;  %v457_v17 = vld [vmem:[#allocation7 + $0x1a0] sm:$0xff]  ;;  %v455_v21 = vld [vmem:[#allocation7 + $0x190] sm:$0xff] }
  0xed   :  { %3890 = vmatpush1.bf16.msra.mxu0 %v5820_v8  ;;  %3922 = vmatpush1.bf16.msra.mxu1 %v5823_v41  ;;  %v446_v41 = vld [vmem:[#allocation7 + $0x148] sm:$0xff]  ;;  %7054 = vst [vmem:[#allocation71_spill] sm:$0xff] %v5842_v14  ;;  %7055 = vst [vmem:[#allocation72_spill] sm:$0xff] %v5844_v44  ;;  %v5856_v10 = vpack.c.bf16 %v457_v17, %v453_v46  ;;  %v467_v46 = vld [vmem:[#allocation7 + $0x1f0] sm:$0xff] }
  0xee   :  { %3892 = vmatprep.subr.bf16.mxu0 %v5828_v49  ;;  %3924 = vmatprep.subr.bf16.mxu1 %v5830_v29  ;;  %v5840_v8 = vpack.c.bf16 %v450_v53, %v446_v41  ;;  %v454_v49 = vld [vmem:[#allocation7 + $0x188] sm:$0xff]  ;;  %v5853_v53 = vpack.c.bf16 %v460_v42, %v456_v62  ;;  %v464_v42 = vld [vmem:[#allocation7 + $0x1d8] sm:$0xff] }
  0xef   :  { %v458_v29 = vld [vmem:[#allocation7 + $0x1a8] sm:$0xff]  ;;  %7059 = vst [vmem:[#allocation76_spill] sm:$0xff] %v5856_v10  ;;  %v468_v62 = vld [vmem:[#allocation7 + $0x1f8] sm:$0xff] }
  0xf0   :  { %7053 = vst [vmem:[#allocation70_spill] sm:$0xff] %v5840_v8  ;;  %v5851_v41 = vpack.c.bf16 %v458_v29, %v454_v49  ;;  %7058 = vst [vmem:[#allocation75_spill] sm:$0xff] %v5853_v53  ;;  %v461_v29 = vld [vmem:[#allocation7 + $0x1c0] sm:$0xff] }
  0xf1   :  { %3894 = vmatpush1.bf16.msra.mxu0 %v5832_v0  ;;  %3926 = vmatpush1.bf16.msra.mxu1 %v5835_v37  ;;  %v5847_v0 = vpack.c.bf16 %v451_v2, %v447_v63  ;;  %v459_v63 = vld [vmem:[#allocation7 + $0x1b0] sm:$0xff]  ;;  %v462_v2 = vld [vmem:[#allocation7 + $0x1c8] sm:$0xff]  ;;  %v465_v37 = vld [vmem:[#allocation7 + $0x1e0] sm:$0xff] }
  0xf2   :  { %3896 = vmatprep.subr.bf16.mxu0 %v5840_v8  ;;  %3928 = vmatprep.subr.bf16.mxu1 %v5842_v14  ;;  %7057 = vst [vmem:[#allocation74_spill] sm:$0xff] %v5851_v41  ;;  %v466_v8 = vld [vmem:[#allocation7 + $0x1e8] sm:$0xff]  ;;  %v5860_v14 = vpack.c.bf16 %v459_v63, %v455_v21  ;;  %v5867_v17 = vpack.c.bf16 %v465_v37, %v461_v29  ;;  %v618_v63 = vld [vmem:[#allocation3 + $0x38] sm:$0xff] }
  0xf3   :  { %7056 = vst [vmem:[#allocation73_spill] sm:$0xff] %v5847_v0  ;;  %v5862_v49 = vpack.c.bf16 %v466_v8, %v462_v2  ;;  %v5876_v2 = vpack.c.bf16 %v618_v63, %v614_v9 }
  0xf4   :  { %7060 = vst [vmem:[#allocation77_spill] sm:$0xff] %v5860_v14  ;;  %7063 = vst [vmem:[#allocation80_spill] sm:$0xff] %v5867_v17 }
  0xf5   :  { %3898 = vmatpush1.bf16.msra.mxu0 %v5844_v44  ;;  %3930 = vmatpush1.bf16.msra.mxu1 %v5847_v0  ;;  %7061 = vst [vmem:[#allocation78_spill] sm:$0xff] %v5862_v49  ;;  %v5864_v44 = vpack.c.bf16 %v468_v62, %v464_v42  ;;  %v463_v0 = vld [vmem:[#allocation7 + $0x1d0] sm:$0xff]  ;;  %7066 = vst [vmem:[#allocation83_spill] sm:$0xff] %v5876_v2 }
  0xf6   :  { %3900 = vmatprep.subr.bf16.mxu0 %v5851_v41  ;;  %3932 = vmatprep.subr.bf16.mxu1 %v5853_v53  ;;  %v616_v41 = vld [vmem:[#allocation3 + $0x28] sm:$0xff]  ;;  %v5871_v8 = vpack.c.bf16 %v467_v46, %v463_v0  ;;  %v147_v0 = vld [vmem:[%s6798_s6] sm:$0xf] }
  0xf7   :  { %7062 = vst [vmem:[#allocation79_spill] sm:$0xff] %v5864_v44  ;;  %v5873_v21 = vpack.c.bf16 %v616_v41, %v612_v22  ;;  %v5886_v22 = vrot.slane %v147_v0, %v5729_v56  ;;  %v5889_v37 = vrot.slane %v147_v0, %v5731_v57  ;;  %v5892_v9 = vrot.slane %v147_v0, %v5733_v58  ;;  %v630_v53 = vld [vmem:[#allocation3 + $0x98] sm:$0xff] }
  0xf8   :  { %7064 = vst [vmem:[#allocation81_spill] sm:$0xff] %v5871_v8  ;;  %v5898_v56 = vrot.slane %v147_v0, %v5744_v4  ;;  %v611_v4 = vld [vmem:[#allocation3] sm:$0xff] }
  0xf9   :  { %3902 = vmatpush1.bf16.msra.mxu0 %v5856_v10  ;;  %3934 = vmatpush1.bf16.msra.mxu1 %v5860_v14  ;;  %7065 = vst [vmem:[#allocation82_spill] sm:$0xff] %v5873_v21  ;;  %7067 = vst [vmem:[#allocation84_spill] sm:$0xff] %v5886_v22  ;;  %v615_v0 = vld [vmem:[#allocation3 + $0x20] sm:$0xff]  ;;  %v628_v14 = vld [vmem:[#allocation3 + $0x88] sm:$0xff] }
  0xfa   :  { %3904 = vmatprep.subr.bf16.mxu0 %v5862_v49  ;;  %3936 = vmatprep.subr.bf16.mxu1 %v5864_v44  ;;  %7068 = vst [vmem:[#allocation85_spill] sm:$0xff] %v5889_v37  ;;  %7069 = vst [vmem:[#allocation86_spill] sm:$0xff] %v5892_v9  ;;  %v632_v10 = vld [vmem:[#allocation3 + $0xa8] sm:$0xff] }
  0xfb   :  { %7070 = vst [vmem:[#allocation87_spill] sm:$0xff] %v5898_v56 }
  0xfd   :  { %3906 = vmatpush1.bf16.msra.mxu0 %v5867_v17  ;;  %3938 = vmatpush1.bf16.msra.mxu1 %v5871_v8 }
  0xfe   :  { %3940 = vmatprep.subr.bf16.mxu0 %v5873_v21  ;;  %3972 = vmatprep.subr.bf16.mxu1 %v5876_v2 }
 0x1b2   :  { %v314_v41 = vpop.f32.mrb[0].mxu0  ;;  %v385_v42 = vpop.f32.mrb[0].mxu1 }
 0x1b3   :  { %v315_v62 = vadd.f32 %v314_v41, %v5886_v22  ;;  %v316_v29 = vpop.f32.mrb[1].mxu0  ;;  %v387_v46 = vpop.f32.mrb[1].mxu1  ;;  %v386_v57 = vadd.f32 %v385_v42, %v5898_v56  ;;  %v617_v42 = vld [vmem:[#allocation3 + $0x30] sm:$0xff]  ;;  %v620_v56 = vld [vmem:[#allocation3 + $0x48] sm:$0xff] }
 0x1b4   :  { %v317_v63 = vadd.f32 %v316_v29, %v5889_v37  ;;  %v388_v2 = vadd.f32 %v387_v46, %v5892_v9  ;;  %v622_v9 = vld [vmem:[#allocation3 + $0x58] sm:$0xff]  ;;  %v5904_v37 = vpack.c.bf16 %v615_v0, %v611_v4  ;;  %v631_v0 = vld [vmem:[#allocation3 + $0xa0] sm:$0xff] }
 0x1b5   :  { %5293 = vtanh.f32 %v315_v62 }
 0x1b6   :  { %5295 = vtanh.f32 %v317_v63  ;;  %v613_v63 = vld [vmem:[#allocation3 + $0x10] sm:$0xff] }
 0x1b7   :  { %5297 = vtanh.f32 %v388_v2 }
 0x1b8   :  { %5299 = vtanh.f32 %v386_v57 }
 0x1bf   :  { %v5294_v58 = vpop.eup %5293 }
 0x1c0   :  { %v394_v21 = vmul.f32 0.5, %v5294_v58  ;;  %v5296_v8 = vpop.eup %5295  ;;  %v624_v58 = vld [vmem:[#allocation3 + $0x68] sm:$0xff] }
 0x1c1   :  { %v395_v41 = vmul.f32 0.5, %v5296_v8  ;;  %v5298_v22 = vpop.eup %5297 }
 0x1c2   :  { %v397_v17 = vadd.f32 0.5, %v394_v21  ;;  %v5300_v2 = vpop.eup %5299  ;;  %v626_v21 = vld [vmem:[#allocation3 + $0x78] sm:$0xff] }
 0x1c3   :  { %v398_v44 = vadd.f32 0.5, %v395_v41  ;;  %v396_v46 = vmul.f32 0.5, %v5300_v2  ;;  %v5908_v41 = vpack.c.bf16 %v624_v58, %v620_v56  ;;  %v621_v2 = vld [vmem:[#allocation3 + $0x50] sm:$0xff]  ;;  %v627_v56 = vld [vmem:[#allocation3 + $0x80] sm:$0xff] }
 0x1c4   :  { %v401_v49 = vmul.f32 %v5298_v22, %v397_v17  ;;  %v5906_v17 = vpack.c.bf16 %v617_v42, %v613_v63  ;;  %v5922_v63 = vpack.c.bf16 %v634_v3, %v630_v53  ;;  %v629_v42 = vld [vmem:[#allocation3 + $0x90] sm:$0xff]  ;;  %v635_v3 = vld [vmem:[#allocation3 + $0xc0] sm:$0xff] }
 0x1c5   :  { %v400_v29 = vmul.f32 0.0, %v398_v44  ;;  %v399_v57 = vadd.f32 0.5, %v396_v46  ;;  %v619_v44 = vld [vmem:[#allocation3 + $0x40] sm:$0xff]  ;;  %7073 = vst [vmem:[#allocation90_spill] sm:$0xff] %v5908_v41  ;;  %v633_v58 = vld [vmem:[#allocation3 + $0xb0] sm:$0xff] }
 0x1c6   :  { %7072 = vst [vmem:[#allocation89_spill] sm:$0xff] %v5906_v17  ;;  %7078 = vst [vmem:[#allocation95_spill] sm:$0xff] %v5922_v63  ;;  %v639_v53 = vld [vmem:[#allocation3 + $0xe0] sm:$0xff] }
 0x1c7   :  { %v5901_v62 = vadd.f32 %v401_v49, %v400_v29  ;;  %v623_v49 = vld [vmem:[#allocation3 + $0x60] sm:$0xff]  ;;  %v5910_v29 = vpack.c.bf16 %v626_v21, %v622_v9  ;;  %v5920_v9 = vpack.c.bf16 %v632_v10, %v628_v14  ;;  %v636_v21 = vld [vmem:[#allocation3 + $0xc8] sm:$0xff]  ;;  %v5930_v14 = vpack.c.bf16 %v633_v58, %v629_v42 }
 0x1c8   :  { %v5914_v46 = vpack.c.bf16 %v623_v49, %v619_v44  ;;  %v7079_v44 = vmov 0.0   ;;  %v643_v42 = vld [vmem:[#allocation3 + $0x100] sm:$0xff] }
 0x1c9   :  { %7071 = vst [vmem:[#allocation88_spill] sm:$0xff] %v5901_v62  ;;  %5301 = vtanh.f32 %v5901_v62  ;;  %7074 = vst [vmem:[#allocation91_spill] sm:$0xff] %v5910_v29  ;;  %v625_v62 = vld [vmem:[#allocation3 + $0x70] sm:$0xff]  ;;  %v647_v58 = vld [vmem:[#allocation3 + $0x120] sm:$0xff] }
 0x1ca   :  { %7075 = vst [vmem:[#allocation92_spill] sm:$0xff] %v5914_v46  ;;  %v5916_v4 = vpack.c.bf16 %v625_v62, %v621_v2  ;;  %7077 = vst [vmem:[#allocation94_spill] sm:$0xff] %v5920_v9  ;;  %v5928_v62 = vpack.c.bf16 %v631_v0, %v627_v56  ;;  %v637_v2 = vld [vmem:[#allocation3 + $0xd0] sm:$0xff]  ;;  %v5940_v56 = vpack.c.bf16 %v639_v53, %v635_v3  ;;  %v651_v53 = vld [vmem:[#allocation3 + $0x140] sm:$0xff] }
 0x1cb   :  { %7081 = vst [vmem:[#allocation97_spill] sm:$0xff] %v5930_v14 }
 0x1cc   :  { %7076 = vst [vmem:[#allocation93_spill] sm:$0xff] %v5916_v4  ;;  %7080 = vst [vmem:[#allocation96_spill] sm:$0xff] %v5928_v62 }
 0x1cd   :  { %7084 = vst [vmem:[#allocation100_spill] sm:$0xff] %v5940_v56 }
 0x1d3   :  { %v5302_v8 = vpop.eup %5301 }
 0x1d4   :  { %v404_v22 = vmul.f32 %v5302_v8, %v399_v57  ;;  %v640_v57 = vld [vmem:[#allocation3 + $0xe8] sm:$0xff]  ;;  %v638_v8 = vld [vmem:[#allocation3 + $0xd8] sm:$0xff] }
 0x1d5   :  { %v5934_v10 = vpack.c.bf16 %v640_v57, %v636_v21 }
 0x1d6   :  { %534 = vmatmul.mubr.f32.vlgmr.msra.gmra.mrb[2].mxu0 %v404_v22  ;;  %605 = vmatmul.mubr.f32.vlgmr.msra.gmra.mrb[2].mxu1 %v404_v22  ;;  %v642_v22 = vld [vmem:[#allocation3 + $0xf8] sm:$0xff] }
 0x1d7   :  { %3942 = vmatpush1.bf16.msra.mxu0 %v5904_v37  ;;  %3974 = vmatpush1.bf16.msra.mxu1 %v5906_v17  ;;  %7082 = vst [vmem:[#allocation98_spill] sm:$0xff] %v5934_v10  ;;  %v5936_v49 = vpack.c.bf16 %v642_v22, %v638_v8  ;;  %v646_v17 = vld [vmem:[#allocation3 + $0x118] sm:$0xff]  ;;  %v645_v8 = vld [vmem:[#allocation3 + $0x110] sm:$0xff] }
 0x1d8   :  { %3944 = vmatprep.subr.bf16.mxu0 %v5908_v41  ;;  %3976 = vmatprep.subr.bf16.mxu1 %v5910_v29  ;;  %v641_v29 = vld [vmem:[#allocation3 + $0xf0] sm:$0xff]  ;;  %v644_v41 = vld [vmem:[#allocation3 + $0x108] sm:$0xff] }
 0x1d9   :  { %751 = vmatprep.mubr.f32.mxu0 %v7079_v44  ;;  %822 = vmatprep.mubr.f32.mxu1 %v7079_v44  ;;  %7083 = vst [vmem:[#allocation99_spill] sm:$0xff] %v5936_v49  ;;  %v5942_v0 = vpack.c.bf16 %v641_v29, %v637_v2  ;;  %v649_v22 = vld [vmem:[#allocation3 + $0x130] sm:$0xff]  ;;  %v5952_v29 = vpack.c.bf16 %v647_v58, %v643_v42  ;;  %v655_v2 = vld [vmem:[#allocation3 + $0x160] sm:$0xff] }
 0x1da   :  { %v5954_v3 = vpack.c.bf16 %v649_v22, %v645_v8  ;;  %v5964_v42 = vpack.c.bf16 %v655_v2, %v651_v53  ;;  %v659_v8 = vld [vmem:[#allocation3 + $0x180] sm:$0xff] }
 0x1db   :  { %3946 = vmatpush1.bf16.msra.mxu0 %v5914_v46  ;;  %3978 = vmatpush1.bf16.msra.mxu1 %v5916_v4  ;;  %v648_v46 = vld [vmem:[#allocation3 + $0x128] sm:$0xff]  ;;  %v650_v4 = vld [vmem:[#allocation3 + $0x138] sm:$0xff]  ;;  %7085 = vst [vmem:[#allocation101_spill] sm:$0xff] %v5942_v0  ;;  %7088 = vst [vmem:[#allocation104_spill] sm:$0xff] %v5952_v29 }
 0x1dc   :  { %3948 = vmatprep.subr.bf16.mxu0 %v5920_v9  ;;  %3980 = vmatprep.subr.bf16.mxu1 %v5922_v63  ;;  %v5946_v21 = vpack.c.bf16 %v648_v46, %v644_v41  ;;  %v5948_v57 = vpack.c.bf16 %v650_v4, %v646_v17  ;;  %v652_v63 = vld [vmem:[#allocation3 + $0x148] sm:$0xff]  ;;  %v654_v9 = vld [vmem:[#allocation3 + $0x158] sm:$0xff]  ;;  %7089 = vst [vmem:[#allocation105_spill] sm:$0xff] %v5954_v3  ;;  %v653_v46 = vld [vmem:[#allocation3 + $0x150] sm:$0xff] }
 0x1dd   :  { %v657_v4 = vld [vmem:[#allocation3 + $0x170] sm:$0xff]  ;;  %v663_v22 = vld [vmem:[#allocation3 + $0x1a0] sm:$0xff] }
 0x1de   :  { %7086 = vst [vmem:[#allocation102_spill] sm:$0xff] %v5946_v21  ;;  %7087 = vst [vmem:[#allocation103_spill] sm:$0xff] %v5948_v57  ;;  %v5966_v58 = vpack.c.bf16 %v657_v4, %v653_v46  ;;  %v5976_v53 = vpack.c.bf16 %v663_v22, %v659_v8  ;;  %v667_v46 = vld [vmem:[#allocation3 + $0x1c0] sm:$0xff]  ;;  %v673_v4 = vld [vmem:[#allocation3 + $0x1f0] sm:$0xff] }
 0x1df   :  { %3950 = vmatpush1.bf16.msra.mxu0 %v5928_v62  ;;  %3982 = vmatpush1.bf16.msra.mxu1 %v5930_v14  ;;  %v656_v62 = vld [vmem:[#allocation3 + $0x168] sm:$0xff]  ;;  %v658_v14 = vld [vmem:[#allocation3 + $0x178] sm:$0xff] }
 0x1e0   :  { %3952 = vmatprep.subr.bf16.mxu0 %v5934_v10  ;;  %3984 = vmatprep.subr.bf16.mxu1 %v5936_v49  ;;  %v5958_v17 = vpack.c.bf16 %v656_v62, %v652_v63  ;;  %v5960_v41 = vpack.c.bf16 %v658_v14, %v654_v9  ;;  %v660_v49 = vld [vmem:[#allocation3 + $0x188] sm:$0xff]  ;;  %v662_v10 = vld [vmem:[#allocation3 + $0x198] sm:$0xff]  ;;  %v661_v62 = vld [vmem:[#allocation3 + $0x190] sm:$0xff] }
 0x1e1   :  { %v665_v14 = vld [vmem:[#allocation3 + $0x1b0] sm:$0xff] }
 0x1e2   :  { %v5978_v2 = vpack.c.bf16 %v665_v14, %v661_v62  ;;  %v682_v62 = vrot.slane %v5755_v30, 2 }
 0x1e3   :  { %3954 = vmatpush1.bf16.msra.mxu0 %v5940_v56  ;;  %3986 = vmatpush1.bf16.msra.mxu1 %v5942_v0  ;;  %v664_v56 = vld [vmem:[#allocation3 + $0x1a8] sm:$0xff]  ;;  %v666_v0 = vld [vmem:[#allocation3 + $0x1b8] sm:$0xff] }
 0x1e4   :  { %3956 = vmatprep.subr.bf16.mxu0 %v5946_v21  ;;  %3988 = vmatprep.subr.bf16.mxu1 %v5948_v57  ;;  %v5970_v9 = vpack.c.bf16 %v664_v56, %v660_v49  ;;  %v5972_v63 = vpack.c.bf16 %v666_v0, %v662_v10  ;;  %v668_v57 = vld [vmem:[#allocation3 + $0x1c8] sm:$0xff]  ;;  %v670_v21 = vld [vmem:[#allocation3 + $0x1d8] sm:$0xff]  ;;  %v671_v56 = vld [vmem:[#allocation3 + $0x1e0] sm:$0xff] }
 0x1e5   :  { %v669_v0 = vld [vmem:[#allocation3 + $0x1d0] sm:$0xff]  ;;  %v5988_v8 = vpack.c.bf16 %v671_v56, %v667_v46 }
 0x1e6   :  { %v5990_v22 = vpack.c.bf16 %v673_v4, %v669_v0 }
 0x1e7   :  { %3958 = vmatpush1.bf16.msra.mxu0 %v5952_v29  ;;  %3990 = vmatpush1.bf16.msra.mxu1 %v5954_v3  ;;  %v672_v29 = vld [vmem:[#allocation3 + $0x1e8] sm:$0xff]  ;;  %v674_v3 = vld [vmem:[#allocation3 + $0x1f8] sm:$0xff] }
 0x1e8   :  { %3960 = vmatprep.subr.bf16.mxu0 %v5958_v17  ;;  %3992 = vmatprep.subr.bf16.mxu1 %v5960_v41  ;;  %v5982_v10 = vpack.c.bf16 %v672_v29, %v668_v57  ;;  %v5984_v49 = vpack.c.bf16 %v674_v3, %v670_v21  ;;  %v681_v21 = vrot.slane %v5768_v61, 2  ;;  %v680_v3 = vrot.slane %v5752_v28, 2 }
 0x1eb   :  { %3962 = vmatpush1.bf16.msra.mxu0 %v5964_v42  ;;  %3994 = vmatpush1.bf16.msra.mxu1 %v5966_v58 }
 0x1ec   :  { %3964 = vmatprep.subr.bf16.mxu0 %v5970_v9  ;;  %3996 = vmatprep.subr.bf16.mxu1 %v5972_v63 }
 0x1ef   :  { %3966 = vmatpush1.bf16.msra.mxu0 %v5976_v53  ;;  %3998 = vmatpush1.bf16.msra.mxu1 %v5978_v2 }
 0x1f0   :  { %3968 = vmatprep.subr.bf16.mxu0 %v5982_v10  ;;  %4000 = vmatprep.subr.bf16.mxu1 %v5984_v49 }
 0x1f3   :  { %3970 = vmatpush1.bf16.msra.mxu0 %v5988_v8  ;;  %4002 = vmatpush1.bf16.msra.mxu1 %v5990_v22 }
 0x1f4   :  { %4004 = vmatprep.subr.bf16.mxu0 %v5631_v7  ;;  %4036 = vmatprep.subr.bf16.mxu1 %v5633_v11 }
 0x1f6   :  { %752 = vmatmul.mubr.f32.vlgmr.msra.gmra.mrb[4].mxu0 %v5774_v34  ;;  %823 = vmatmul.mubr.f32.vlgmr.msra.gmra.mrb[4].mxu1 %v5774_v34  ;;  %v679_v34 = vrot.slane %v5750_v25, 2 }
 0x1f7   :  { %4006 = vmatpush1.bf16.msra.mxu0 %v5635_v12  ;;  %4038 = vmatpush1.bf16.msra.mxu1 %v5638_v15 }
 0x1f8   :  { %4008 = vmatprep.subr.bf16.mxu0 %v5643_v19  ;;  %4040 = vmatprep.subr.bf16.mxu1 %v5645_v23 }
 0x1f9   :  { %908 = vmatprep.mubr.f32.mxu0 %v7079_v44  ;;  %979 = vmatprep.mubr.f32.mxu1 %v7079_v44 }
 0x1fb   :  { %4010 = vmatpush1.bf16.msra.mxu0 %v5647_v24  ;;  %4042 = vmatpush1.bf16.msra.mxu1 %v5650_v27 }
 0x1fc   :  { %4012 = vmatprep.subr.bf16.mxu0 %v5655_v31  ;;  %4044 = vmatprep.subr.bf16.mxu1 %v5657_v35 }
 0x1ff   :  { %4014 = vmatpush1.bf16.msra.mxu0 %v5659_v36  ;;  %4046 = vmatpush1.bf16.msra.mxu1 %v5662_v39 }
 0x200   :  { %4016 = vmatprep.subr.bf16.mxu0 %v5667_v43  ;;  %4048 = vmatprep.subr.bf16.mxu1 %v5669_v47 }
 0x203   :  { %4018 = vmatpush1.bf16.msra.mxu0 %v5671_v48  ;;  %4050 = vmatpush1.bf16.msra.mxu1 %v5674_v51 }
 0x204   :  { %4020 = vmatprep.subr.bf16.mxu0 %v5679_v55  ;;  %4052 = vmatprep.subr.bf16.mxu1 %v5681_v59 }
 0x207   :  { %4022 = vmatpush1.bf16.msra.mxu0 %v5683_v60  ;;  %4054 = vmatpush1.bf16.msra.mxu1 %v5688_v1 }
 0x208   :  { %4024 = vmatprep.subr.bf16.mxu0 %v5692_v5  ;;  %4056 = vmatprep.subr.bf16.mxu1 %v5694_v6 }
 0x20b   :  { %4026 = vmatpush1.bf16.msra.mxu0 %v5697_v13  ;;  %4058 = vmatpush1.bf16.msra.mxu1 %v5701_v18 }
 0x20c   :  { %4028 = vmatprep.subr.bf16.mxu0 %v5703_v20  ;;  %4060 = vmatprep.subr.bf16.mxu1 %v5705_v26 }
 0x20f   :  { %4030 = vmatpush1.bf16.msra.mxu0 %v5708_v32  ;;  %4062 = vmatpush1.bf16.msra.mxu1 %v5712_v38 }
 0x210   :  { %4032 = vmatprep.subr.bf16.mxu0 %v5714_v40  ;;  %4064 = vmatprep.subr.bf16.mxu1 %v5717_v45 }
 0x213   :  { %4034 = vmatpush1.bf16.msra.mxu0 %v5720_v50  ;;  %4066 = vmatpush1.bf16.msra.mxu1 %v5724_v52 }
 0x214   :  { %4068 = vmatprep.subr.bf16.mxu0 %v5780_v54  ;;  %4100 = vmatprep.subr.bf16.mxu1 %v5782_v16 }
 0x2c9   :  { %v753_v57 = vpop.f32.mrb[4].mxu0  ;;  %v824_v29 = vpop.f32.mrb[4].mxu1 }
 0x2ca   :  { %v754_v14 = vadd.f32 %v753_v57, %v679_v34  ;;  %v825_v46 = vadd.f32 %v824_v29, %v681_v21  ;;  %v755_v56 = vpop.f32.mrb[5].mxu0  ;;  %v826_v0 = vpop.f32.mrb[5].mxu1 }
 0x2cb   :  { %v756_v4 = vadd.f32 %v755_v56, %v680_v3  ;;  %v827_v52 = vadd.f32 %v826_v0, %v682_v62  ;;  %v7101_v62 = vld [vmem:[#allocation62_spill] sm:$0xff]  ;;  %v7104_v56 = vld [vmem:[#allocation65_spill] sm:$0xff] }
 0x2cc   :  { %5303 = vtanh.f32 %v754_v14  ;;  %v7102_v14 = vld [vmem:[#allocation63_spill] sm:$0xff]  ;;  %v7105_v0 = vld [vmem:[#allocation66_spill] sm:$0xff] }
 0x2cd   :  { %5305 = vtanh.f32 %v756_v4  ;;  %v7106_v4 = vld [vmem:[#allocation67_spill] sm:$0xff] }
 0x2ce   :  { %5307 = vtanh.f32 %v827_v52 }
 0x2cf   :  { %5309 = vtanh.f32 %v825_v46  ;;  %v7103_v46 = vld [vmem:[#allocation64_spill] sm:$0xff] }
 0x2d6   :  { %v5304_v16 = vpop.eup %5303 }
 0x2d7   :  { %v833_v54 = vmul.f32 0.5, %v5304_v16  ;;  %v5306_v25 = vpop.eup %5305  ;;  %v7100_v16 = vld [vmem:[#allocation61_spill] sm:$0xff] }
 0x2d8   :  { %v834_v61 = vmul.f32 0.5, %v5306_v25  ;;  %v5308_v45 = vpop.eup %5307  ;;  %v7091_v25 = vld [vmem:[#allocation52_spill] sm:$0xff] }
 0x2d9   :  { %v836_v50 = vadd.f32 0.5, %v833_v54  ;;  %v5310_v21 = vpop.eup %5309  ;;  %v7099_v54 = vld [vmem:[#allocation60_spill] sm:$0xff] }
 0x2da   :  { %v837_v40 = vadd.f32 0.5, %v834_v61  ;;  %v835_v57 = vmul.f32 0.5, %v5310_v21  ;;  %v7092_v61 = vld [vmem:[#allocation53_spill] sm:$0xff]  ;;  %v7107_v21 = vld [vmem:[#allocation68_spill] sm:$0xff] }
 0x2db   :  { %v840_v28 = vmul.f32 %v5308_v45, %v836_v50  ;;  %v7093_v45 = vld [vmem:[#allocation54_spill] sm:$0xff]  ;;  %v7095_v50 = vld [vmem:[#allocation56_spill] sm:$0xff] }
 0x2dc   :  { %v839_v30 = vmul.f32 %v837_v40, %v5771_v33  ;;  %v838_v29 = vadd.f32 0.5, %v835_v57  ;;  %v7094_v40 = vld [vmem:[#allocation55_spill] sm:$0xff]  ;;  %v7108_v57 = vld [vmem:[#allocation69_spill] sm:$0xff] }
 0x2dd   :  { %v7098_v33 = vld [vmem:[#allocation59_spill] sm:$0xff] }
 0x2de   :  { %v6039_v34 = vadd.f32 %v840_v28, %v839_v30  ;;  %v7096_v28 = vld [vmem:[#allocation57_spill] sm:$0xff]  ;;  %v7097_v30 = vld [vmem:[#allocation58_spill] sm:$0xff] }
 0x2e0   :  { %7090 = vst [vmem:[#allocation106_spill] sm:$0xff] %v6039_v34  ;;  %5311 = vtanh.f32 %v6039_v34 }
 0x2ea   :  { %v5312_v3 = vpop.eup %5311 }
 0x2eb   :  { %v6042_v52 = vmul.f32 %v5312_v3, %v838_v29  ;;  %v7109_v29 = vld [vmem:[#allocation70_spill] sm:$0xff]  ;;  %v7110_v3 = vld [vmem:[#allocation71_spill] sm:$0xff] }
 0x2ed   :  { %909 = vmatmul.mubr.f32.vlgmr.msra.gmra.mrb[2].mxu0 %v6042_v52  ;;  %980 = vmatmul.mubr.f32.vlgmr.msra.gmra.mrb[2].mxu1 %v6042_v52 }
 0x2ee   :  { %4070 = vmatpush1.bf16.msra.mxu0 %v7091_v25  ;;  %4102 = vmatpush1.bf16.msra.mxu1 %v7092_v61 }
 0x2ef   :  { %4072 = vmatprep.subr.bf16.mxu0 %v7093_v45  ;;  %4104 = vmatprep.subr.bf16.mxu1 %v7094_v40 }
 0x2f0   :  { %1065 = vmatprep.mubr.f32.mxu0 %v7079_v44  ;;  %1136 = vmatprep.mubr.f32.mxu1 %v7079_v44 }
 0x2f2   :  { %4074 = vmatpush1.bf16.msra.mxu0 %v7095_v50  ;;  %4106 = vmatpush1.bf16.msra.mxu1 %v7096_v28 }
 0x2f3   :  { %4076 = vmatprep.subr.bf16.mxu0 %v7097_v30  ;;  %4108 = vmatprep.subr.bf16.mxu1 %v7098_v33  ;;  %v7124_v30 = vld [vmem:[#allocation85_spill] sm:$0xff] }
 0x2f6   :  { %4078 = vmatpush1.bf16.msra.mxu0 %v7099_v54  ;;  %4110 = vmatpush1.bf16.msra.mxu1 %v7100_v16  ;;  %v7111_v16 = vld [vmem:[#allocation72_spill] sm:$0xff] }
 0x2f7   :  { %4080 = vmatprep.subr.bf16.mxu0 %v7101_v62  ;;  %4112 = vmatprep.subr.bf16.mxu1 %v7102_v14  ;;  %v7112_v62 = vld [vmem:[#allocation73_spill] sm:$0xff]  ;;  %v7113_v14 = vld [vmem:[#allocation74_spill] sm:$0xff]  ;;  %v7123_v54 = vld [vmem:[#allocation84_spill] sm:$0xff] }
 0x2fa   :  { %4082 = vmatpush1.bf16.msra.mxu0 %v7103_v46  ;;  %4114 = vmatpush1.bf16.msra.mxu1 %v7104_v56  ;;  %v7114_v46 = vld [vmem:[#allocation75_spill] sm:$0xff]  ;;  %v7115_v56 = vld [vmem:[#allocation76_spill] sm:$0xff] }
 0x2fb   :  { %4084 = vmatprep.subr.bf16.mxu0 %v7105_v0  ;;  %4116 = vmatprep.subr.bf16.mxu1 %v7106_v4  ;;  %v7116_v0 = vld [vmem:[#allocation77_spill] sm:$0xff]  ;;  %v7117_v4 = vld [vmem:[#allocation78_spill] sm:$0xff] }
 0x2fe   :  { %4086 = vmatpush1.bf16.msra.mxu0 %v7107_v21  ;;  %4118 = vmatpush1.bf16.msra.mxu1 %v7108_v57  ;;  %v7118_v21 = vld [vmem:[#allocation79_spill] sm:$0xff]  ;;  %v7119_v57 = vld [vmem:[#allocation80_spill] sm:$0xff] }
 0x2ff   :  { %4088 = vmatprep.subr.bf16.mxu0 %v7109_v29  ;;  %4120 = vmatprep.subr.bf16.mxu1 %v7110_v3  ;;  %v7120_v29 = vld [vmem:[#allocation81_spill] sm:$0xff]  ;;  %v7121_v3 = vld [vmem:[#allocation82_spill] sm:$0xff] }
 0x302   :  { %4090 = vmatpush1.bf16.msra.mxu0 %v7111_v16  ;;  %4122 = vmatpush1.bf16.msra.mxu1 %v7112_v62  ;;  %v7122_v16 = vld [vmem:[#allocation83_spill] sm:$0xff] }
 0x303   :  { %4092 = vmatprep.subr.bf16.mxu0 %v7113_v14  ;;  %4124 = vmatprep.subr.bf16.mxu1 %v7114_v46 }
 0x306   :  { %4094 = vmatpush1.bf16.msra.mxu0 %v7115_v56  ;;  %4126 = vmatpush1.bf16.msra.mxu1 %v7116_v0 }
 0x307   :  { %4096 = vmatprep.subr.bf16.mxu0 %v7117_v4  ;;  %4128 = vmatprep.subr.bf16.mxu1 %v7118_v21  ;;  %v7125_v4 = vld [vmem:[#allocation86_spill] sm:$0xff] }
 0x30a   :  { %4098 = vmatpush1.bf16.msra.mxu0 %v7119_v57  ;;  %4130 = vmatpush1.bf16.msra.mxu1 %v7120_v29  ;;  %v7126_v57 = vld [vmem:[#allocation87_spill] sm:$0xff] }
 0x30b   :  { %4132 = vmatprep.subr.bf16.mxu0 %v7121_v3  ;;  %4164 = vmatprep.subr.bf16.mxu1 %v7122_v16 }
 0x3c0   :  { %v910_v62 = vpop.f32.mrb[2].mxu0  ;;  %v981_v14 = vpop.f32.mrb[2].mxu1 }
 0x3c1   :  { %v5219_v46 = vadd.f32 %v910_v62, %v7123_v54  ;;  %v912_v33 = vpop.f32.mrb[3].mxu0  ;;  %v983_v56 = vpop.f32.mrb[3].mxu1  ;;  %v5221_v21 = vadd.f32 %v981_v14, %v7126_v57  ;;  %v7127_v54 = vld [vmem:[#allocation88_spill] sm:$0xff] }
 0x3c2   :  { %v5220_v0 = vadd.f32 %v912_v33, %v7124_v30  ;;  %v5222_v28 = vadd.f32 %v983_v56, %v7125_v4 }
 0x3c3   :  { %5313 = vtanh.f32 %v5219_v46 }
 0x3c4   :  { %5315 = vtanh.f32 %v5220_v0  ;;  %v7129_v0 = vld [vmem:[#allocation90_spill] sm:$0xff] }
 0x3c5   :  { %5317 = vtanh.f32 %v5222_v28 }
 0x3c6   :  { %5319 = vtanh.f32 %v5221_v21  ;;  %v7136_v21 = vld [vmem:[#allocation97_spill] sm:$0xff] }
 0x3cd   :  { %v5314_v29 = vpop.eup %5313 }
 0x3ce   :  { %v990_v50 = vmul.f32 0.5, %v5314_v29  ;;  %v5316_v3 = vpop.eup %5315  ;;  %v7137_v29 = vld [vmem:[#allocation98_spill] sm:$0xff] }
 0x3cf   :  { %v991_v16 = vmul.f32 0.5, %v5316_v3  ;;  %v5318_v45 = vpop.eup %5317  ;;  %v7138_v3 = vld [vmem:[#allocation99_spill] sm:$0xff] }
 0x3d0   :  { %v993_v40 = vadd.f32 0.5, %v990_v50  ;;  %v5320_v33 = vpop.eup %5319  ;;  %v7128_v50 = vld [vmem:[#allocation89_spill] sm:$0xff] }
 0x3d1   :  { %v994_v61 = vadd.f32 0.5, %v991_v16  ;;  %v992_v46 = vmul.f32 0.5, %v5320_v33  ;;  %v7135_v16 = vld [vmem:[#allocation96_spill] sm:$0xff]  ;;  %v7140_v33 = vld [vmem:[#allocation101_spill] sm:$0xff] }
 0x3d2   :  { %v997_v62 = vmul.f32 %v5318_v45, %v993_v40  ;;  %v7130_v45 = vld [vmem:[#allocation91_spill] sm:$0xff]  ;;  %v7133_v40 = vld [vmem:[#allocation94_spill] sm:$0xff] }
 0x3d3   :  { %v996_v25 = vmul.f32 %v994_v61, %v7127_v54  ;;  %v995_v28 = vadd.f32 0.5, %v992_v46  ;;  %v7132_v61 = vld [vmem:[#allocation93_spill] sm:$0xff]  ;;  %v7134_v54 = vld [vmem:[#allocation95_spill] sm:$0xff]  ;;  %v7141_v46 = vld [vmem:[#allocation102_spill] sm:$0xff] }
 0x3d5   :  { %v6085_v34 = vadd.f32 %v997_v62, %v996_v25  ;;  %v7131_v25 = vld [vmem:[#allocation92_spill] sm:$0xff] }
 0x3d6   :  { %v7139_v62 = vld [vmem:[#allocation100_spill] sm:$0xff] }
 0x3d7   :  { %5321 = vtanh.f32 %v6085_v34 }
 0x3e1   :  { %v5322_v56 = vpop.eup %5321 }
 0x3e2   :  { %v1000_v14 = vmul.f32 %v5322_v56, %v995_v28  ;;  %v7142_v28 = vld [vmem:[#allocation103_spill] sm:$0xff]  ;;  %v7143_v56 = vld [vmem:[#allocation104_spill] sm:$0xff] }
 0x3e4   :  { %1066 = vmatmul.mubr.f32.vlgmr.msra.gmra.mrb[6].mxu0 %v1000_v14  ;;  %1137 = vmatmul.mubr.f32.vlgmr.msra.gmra.mrb[6].mxu1 %v1000_v14  ;;  %v7144_v14 = vld [vmem:[#allocation105_spill] sm:$0xff] }
 0x3e5   :  { %4134 = vmatpush1.bf16.msra.mxu0 %v5904_v37  ;;  %4166 = vmatpush1.bf16.msra.mxu1 %v7128_v50 }
 0x3e6   :  { %4136 = vmatprep.subr.bf16.mxu0 %v7129_v0  ;;  %4168 = vmatprep.subr.bf16.mxu1 %v7130_v45 }
 0x3e7   :  { %1215 = vmatprep.mubr.f32.mxu0 %v7079_v44  ;;  %1286 = vmatprep.mubr.f32.mxu1 %v7079_v44 }
 0x3e9   :  { %4138 = vmatpush1.bf16.msra.mxu0 %v7131_v25  ;;  %4170 = vmatpush1.bf16.msra.mxu1 %v7132_v61 }
 0x3ea   :  { %4140 = vmatprep.subr.bf16.mxu0 %v7133_v40  ;;  %4172 = vmatprep.subr.bf16.mxu1 %v7134_v54 }
 0x3ed   :  { %4142 = vmatpush1.bf16.msra.mxu0 %v7135_v16  ;;  %4174 = vmatpush1.bf16.msra.mxu1 %v7136_v21 }
 0x3ee   :  { %4144 = vmatprep.subr.bf16.mxu0 %v7137_v29  ;;  %4176 = vmatprep.subr.bf16.mxu1 %v7138_v3 }
 0x3f1   :  { %4146 = vmatpush1.bf16.msra.mxu0 %v7139_v62  ;;  %4178 = vmatpush1.bf16.msra.mxu1 %v7140_v33 }
 0x3f2   :  { %4148 = vmatprep.subr.bf16.mxu0 %v7141_v46  ;;  %4180 = vmatprep.subr.bf16.mxu1 %v7142_v28 }
 0x3f5   :  { %4150 = vmatpush1.bf16.msra.mxu0 %v7143_v56  ;;  %4182 = vmatpush1.bf16.msra.mxu1 %v7144_v14 }
 0x3f6   :  { %4152 = vmatprep.subr.bf16.mxu0 %v5958_v17  ;;  %4184 = vmatprep.subr.bf16.mxu1 %v5960_v41 }
 0x3f9   :  { %4154 = vmatpush1.bf16.msra.mxu0 %v5964_v42  ;;  %4186 = vmatpush1.bf16.msra.mxu1 %v5966_v58 }
 0x3fa   :  { %4156 = vmatprep.subr.bf16.mxu0 %v5970_v9  ;;  %4188 = vmatprep.subr.bf16.mxu1 %v5972_v63 }
 0x3fd   :  { %4158 = vmatpush1.bf16.msra.mxu0 %v5976_v53  ;;  %4190 = vmatpush1.bf16.msra.mxu1 %v5978_v2 }
 0x3fe   :  { %4160 = vmatprep.subr.bf16.mxu0 %v5982_v10  ;;  %4192 = vmatprep.subr.bf16.mxu1 %v5984_v49 }
 0x401   :  { %4162 = vmatpush1.bf16.msra.mxu0 %v5988_v8  ;;  %4194 = vmatpush1.bf16.msra.mxu1 %v5990_v22 }
 0x402   :  { %4196 = vmatprep.subr.bf16.mxu0 %v5631_v7  ;;  %4228 = vmatprep.subr.bf16.mxu1 %v5633_v11 }
 0x404   :  { %1216 = vmatmul.mubr.f32.vlgmr.msra.gmra.mrb[8].mxu0 %v6042_v52  ;;  %1287 = vmatmul.mubr.f32.vlgmr.msra.gmra.mrb[8].mxu1 %v6042_v52  ;;  %v7145_v52 = vld [vmem:[#allocation38_spill] sm:$0xff] }
 0x405   :  { %4198 = vmatpush1.bf16.msra.mxu0 %v5635_v12  ;;  %4230 = vmatpush1.bf16.msra.mxu1 %v5638_v15 }
 0x406   :  { %4200 = vmatprep.subr.bf16.mxu0 %v5643_v19  ;;  %4232 = vmatprep.subr.bf16.mxu1 %v5645_v23 }
 0x407   :  { %1372 = vmatprep.mubr.f32.mxu0 %v7079_v44  ;;  %1443 = vmatprep.mubr.f32.mxu1 %v7079_v44 }
 0x409   :  { %4202 = vmatpush1.bf16.msra.mxu0 %v5647_v24  ;;  %4234 = vmatpush1.bf16.msra.mxu1 %v5650_v27  ;;  %v7155_v27 = vld [vmem:[#allocation106_spill] sm:$0xff] }
 0x40a   :  { %4204 = vmatprep.subr.bf16.mxu0 %v5655_v31  ;;  %4236 = vmatprep.subr.bf16.mxu1 %v5657_v35 }
 0x40d   :  { %4206 = vmatpush1.bf16.msra.mxu0 %v5659_v36  ;;  %4238 = vmatpush1.bf16.msra.mxu1 %v5662_v39 }
 0x40e   :  { %4208 = vmatprep.subr.bf16.mxu0 %v5667_v43  ;;  %4240 = vmatprep.subr.bf16.mxu1 %v5669_v47 }
 0x411   :  { %4210 = vmatpush1.bf16.msra.mxu0 %v5671_v48  ;;  %4242 = vmatpush1.bf16.msra.mxu1 %v5674_v51  ;;  %v7153_v51 = vld [vmem:[#allocation43_spill] sm:$0xff]  ;;  %v7154_v48 = vld [vmem:[#allocation44_spill] sm:$0xff] }
 0x412   :  { %4212 = vmatprep.subr.bf16.mxu0 %v5679_v55  ;;  %4244 = vmatprep.subr.bf16.mxu1 %v5681_v59  ;;  %v7152_v59 = vld [vmem:[#allocation49_spill] sm:$0xff] }
 0x415   :  { %4214 = vmatpush1.bf16.msra.mxu0 %v5683_v60  ;;  %4246 = vmatpush1.bf16.msra.mxu1 %v5688_v1  ;;  %v7146_v60 = vld [vmem:[#allocation39_spill] sm:$0xff]  ;;  %v7147_v1 = vld [vmem:[#allocation40_spill] sm:$0xff] }
 0x416   :  { %4216 = vmatprep.subr.bf16.mxu0 %v5692_v5  ;;  %4248 = vmatprep.subr.bf16.mxu1 %v5694_v6  ;;  %v7148_v5 = vld [vmem:[#allocation41_spill] sm:$0xff]  ;;  %v7149_v6 = vld [vmem:[#allocation50_spill] sm:$0xff] }
 0x419   :  { %4218 = vmatpush1.bf16.msra.mxu0 %v5697_v13  ;;  %4250 = vmatpush1.bf16.msra.mxu1 %v5701_v18  ;;  %v7150_v13 = vld [vmem:[#allocation51_spill] sm:$0xff]  ;;  %v7151_v18 = vld [vmem:[#allocation42_spill] sm:$0xff] }
 0x41a   :  { %4220 = vmatprep.subr.bf16.mxu0 %v5703_v20  ;;  %4252 = vmatprep.subr.bf16.mxu1 %v5705_v26  ;;  %v1143_v20 = vrot.slane %v7151_v18, 4  ;;  %v1145_v26 = vrot.slane %v7152_v59, 4 }
 0x41d   :  { %4222 = vmatpush1.bf16.msra.mxu0 %v5708_v32  ;;  %4254 = vmatpush1.bf16.msra.mxu1 %v5712_v38  ;;  %v1144_v38 = vrot.slane %v7153_v51, 4 }
 0x41e   :  { %4224 = vmatprep.subr.bf16.mxu0 %v7145_v52  ;;  %4256 = vmatprep.subr.bf16.mxu1 %v7146_v60  ;;  %v1146_v52 = vrot.slane %v7154_v48, 4 }
 0x421   :  { %4226 = vmatpush1.bf16.msra.mxu0 %v7147_v1  ;;  %4258 = vmatpush1.bf16.msra.mxu1 %v7148_v5 }
 0x422   :  { %4260 = vmatprep.subr.bf16.mxu0 %v7149_v6  ;;  %4292 = vmatprep.subr.bf16.mxu1 %v7150_v13 }
 0x4d7   :  { %v1217_v55 = vpop.f32.mrb[8].mxu0  ;;  %v1288_v32 = vpop.f32.mrb[8].mxu1 }
 0x4d8   :  { %v1218_v47 = vadd.f32 %v1217_v55, %v1143_v20  ;;  %v1289_v60 = vadd.f32 %v1288_v32, %v1145_v26  ;;  %v1219_v43 = vpop.f32.mrb[9].mxu0  ;;  %v1290_v1 = vpop.f32.mrb[9].mxu1  ;;  %v7167_v20 = vld [vmem:[#allocation63_spill] sm:$0xff]  ;;  %v7168_v26 = vld [vmem:[#allocation64_spill] sm:$0xff]  ;;  %v7169_v32 = vld [vmem:[#allocation65_spill] sm:$0xff] }
 0x4d9   :  { %v1220_v39 = vadd.f32 %v1219_v43, %v1144_v38  ;;  %v1291_v5 = vadd.f32 %v1290_v1, %v1146_v52  ;;  %v7170_v38 = vld [vmem:[#allocation66_spill] sm:$0xff]  ;;  %v7171_v52 = vld [vmem:[#allocation67_spill] sm:$0xff] }
 0x4da   :  { %5323 = vtanh.f32 %v1218_v47 }
 0x4db   :  { %5325 = vtanh.f32 %v1220_v39 }
 0x4dc   :  { %5327 = vtanh.f32 %v1291_v5 }
 0x4dd   :  { %5329 = vtanh.f32 %v1289_v60  ;;  %v7156_v60 = vld [vmem:[#allocation52_spill] sm:$0xff] }
 0x4e4   :  { %v5324_v13 = vpop.eup %5323 }
 0x4e5   :  { %v1297_v6 = vmul.f32 0.5, %v5324_v13  ;;  %v5326_v18 = vpop.eup %5325  ;;  %v7165_v13 = vld [vmem:[#allocation61_spill] sm:$0xff] }
 0x4e6   :  { %v1298_v59 = vmul.f32 0.5, %v5326_v18  ;;  %v5328_v35 = vpop.eup %5327  ;;  %v7166_v18 = vld [vmem:[#allocation62_spill] sm:$0xff] }
 0x4e7   :  { %v1300_v36 = vadd.f32 0.5, %v1297_v6  ;;  %v5330_v43 = vpop.eup %5329  ;;  %v7164_v6 = vld [vmem:[#allocation60_spill] sm:$0xff] }
 0x4e8   :  { %v1301_v31 = vadd.f32 0.5, %v1298_v59  ;;  %v1299_v1 = vmul.f32 0.5, %v5330_v43  ;;  %v7157_v59 = vld [vmem:[#allocation53_spill] sm:$0xff]  ;;  %v7172_v43 = vld [vmem:[#allocation68_spill] sm:$0xff] }
 0x4e9   :  { %v1304_v51 = vmul.f32 %v5328_v35, %v1300_v36  ;;  %v7158_v35 = vld [vmem:[#allocation54_spill] sm:$0xff]  ;;  %v7161_v36 = vld [vmem:[#allocation57_spill] sm:$0xff] }
 0x4ea   :  { %v1303_v48 = vmul.f32 %v1301_v31, %v7155_v27  ;;  %v1302_v47 = vadd.f32 0.5, %v1299_v1  ;;  %v7159_v27 = vld [vmem:[#allocation55_spill] sm:$0xff]  ;;  %v7160_v31 = vld [vmem:[#allocation56_spill] sm:$0xff]  ;;  %v7173_v1 = vld [vmem:[#allocation69_spill] sm:$0xff] }
 0x4ec   :  { %v6163_v55 = vadd.f32 %v1304_v51, %v1303_v48  ;;  %v7162_v48 = vld [vmem:[#allocation58_spill] sm:$0xff]  ;;  %v7163_v51 = vld [vmem:[#allocation59_spill] sm:$0xff] }
 0x4ee   :  { %5331 = vtanh.f32 %v6163_v55 }
 0x4f8   :  { %v5332_v39 = vpop.eup %5331 }
 0x4f9   :  { %v6166_v5 = vmul.f32 %v5332_v39, %v1302_v47  ;;  %v7174_v47 = vld [vmem:[#allocation70_spill] sm:$0xff]  ;;  %v7175_v39 = vld [vmem:[#allocation71_spill] sm:$0xff] }
 0x4fb   :  { %1373 = vmatmul.mubr.f32.vlgmr.msra.gmra.mrb[6].mxu0 %v6166_v5  ;;  %1444 = vmatmul.mubr.f32.vlgmr.msra.gmra.mrb[6].mxu1 %v6166_v5 }
 0x4fc   :  { %4262 = vmatpush1.bf16.msra.mxu0 %v7156_v60  ;;  %4294 = vmatpush1.bf16.msra.mxu1 %v7157_v59 }
 0x4fd   :  { %4264 = vmatprep.subr.bf16.mxu0 %v7158_v35  ;;  %4296 = vmatprep.subr.bf16.mxu1 %v7159_v27 }
 0x4fe   :  { %1529 = vmatprep.mubr.f32.mxu0 %v7079_v44  ;;  %1600 = vmatprep.mubr.f32.mxu1 %v7079_v44 }
 0x500   :  { %4266 = vmatpush1.bf16.msra.mxu0 %v7160_v31  ;;  %4298 = vmatpush1.bf16.msra.mxu1 %v7161_v36 }
 0x501   :  { %4268 = vmatprep.subr.bf16.mxu0 %v7162_v48  ;;  %4300 = vmatprep.subr.bf16.mxu1 %v7163_v51 }
 0x504   :  { %4270 = vmatpush1.bf16.msra.mxu0 %v7164_v6  ;;  %4302 = vmatpush1.bf16.msra.mxu1 %v7165_v13  ;;  %v7176_v13 = vld [vmem:[#allocation72_spill] sm:$0xff] }
 0x505   :  { %4272 = vmatprep.subr.bf16.mxu0 %v7166_v18  ;;  %4304 = vmatprep.subr.bf16.mxu1 %v7167_v20  ;;  %v7177_v18 = vld [vmem:[#allocation73_spill] sm:$0xff]  ;;  %v7178_v20 = vld [vmem:[#allocation74_spill] sm:$0xff]  ;;  %v7188_v6 = vld [vmem:[#allocation84_spill] sm:$0xff] }
 0x508   :  { %4274 = vmatpush1.bf16.msra.mxu0 %v7168_v26  ;;  %4306 = vmatpush1.bf16.msra.mxu1 %v7169_v32  ;;  %v7179_v26 = vld [vmem:[#allocation75_spill] sm:$0xff]  ;;  %v7180_v32 = vld [vmem:[#allocation76_spill] sm:$0xff] }
 0x509   :  { %4276 = vmatprep.subr.bf16.mxu0 %v7170_v38  ;;  %4308 = vmatprep.subr.bf16.mxu1 %v7171_v52  ;;  %v7181_v38 = vld [vmem:[#allocation77_spill] sm:$0xff]  ;;  %v7182_v52 = vld [vmem:[#allocation78_spill] sm:$0xff] }
 0x50c   :  { %4278 = vmatpush1.bf16.msra.mxu0 %v7172_v43  ;;  %4310 = vmatpush1.bf16.msra.mxu1 %v7173_v1  ;;  %v7183_v43 = vld [vmem:[#allocation79_spill] sm:$0xff]  ;;  %v7184_v1 = vld [vmem:[#allocation80_spill] sm:$0xff] }
 0x50d   :  { %4280 = vmatprep.subr.bf16.mxu0 %v7174_v47  ;;  %4312 = vmatprep.subr.bf16.mxu1 %v7175_v39  ;;  %v7185_v47 = vld [vmem:[#allocation81_spill] sm:$0xff]  ;;  %v7186_v39 = vld [vmem:[#allocation82_spill] sm:$0xff] }
 0x510   :  { %4282 = vmatpush1.bf16.msra.mxu0 %v7176_v13  ;;  %4314 = vmatpush1.bf16.msra.mxu1 %v7177_v18  ;;  %v7187_v13 = vld [vmem:[#allocation83_spill] sm:$0xff] }
 0x511   :  { %4284 = vmatprep.subr.bf16.mxu0 %v7178_v20  ;;  %4316 = vmatprep.subr.bf16.mxu1 %v7179_v26 }
 0x514   :  { %4286 = vmatpush1.bf16.msra.mxu0 %v7180_v32  ;;  %4318 = vmatpush1.bf16.msra.mxu1 %v7181_v38 }
 0x515   :  { %4288 = vmatprep.subr.bf16.mxu0 %v7182_v52  ;;  %4320 = vmatprep.subr.bf16.mxu1 %v7183_v43 }
 0x518   :  { %4290 = vmatpush1.bf16.msra.mxu0 %v7184_v1  ;;  %4322 = vmatpush1.bf16.msra.mxu1 %v7185_v47 }
 0x519   :  { %4324 = vmatprep.subr.bf16.mxu0 %v7186_v39  ;;  %4356 = vmatprep.subr.bf16.mxu1 %v7187_v13 }
 0x5ce   :  { %v1374_v18 = vpop.f32.mrb[6].mxu0  ;;  %v1445_v20 = vpop.f32.mrb[6].mxu1 }
 0x5cf   :  { %v5223_v26 = vadd.f32 %v1374_v18, %v7188_v6  ;;  %v1376_v51 = vpop.f32.mrb[7].mxu0  ;;  %v1447_v32 = vpop.f32.mrb[7].mxu1  ;;  %v5225_v1 = vadd.f32 %v1445_v20, %v7126_v57 }
 0x5d0   :  { %v5224_v38 = vadd.f32 %v1376_v51, %v7124_v30  ;;  %v5226_v52 = vadd.f32 %v1447_v32, %v7125_v4 }
 0x5d1   :  { %5333 = vtanh.f32 %v5223_v26 }
 0x5d2   :  { %5335 = vtanh.f32 %v5224_v38 }
 0x5d3   :  { %5337 = vtanh.f32 %v5226_v52  ;;  %v7196_v52 = vld [vmem:[#allocation24_spill] sm:$0xff] }
 0x5d4   :  { %5339 = vtanh.f32 %v5225_v1  ;;  %v7198_v1 = vld [vmem:[#allocation26_spill] sm:$0xff] }
 0x5db   :  { %v5334_v47 = vpop.eup %5333 }
 0x5dc   :  { %v1454_v43 = vmul.f32 0.5, %v5334_v47  ;;  %v5336_v39 = vpop.eup %5335  ;;  %v7199_v47 = vld [vmem:[#allocation27_spill] sm:$0xff] }
 0x5dd   :  { %v1455_v13 = vmul.f32 0.5, %v5336_v39  ;;  %v5338_v36 = vpop.eup %5337  ;;  %v7200_v39 = vld [vmem:[#allocation28_spill] sm:$0xff] }
 0x5de   :  { %v1457_v48 = vadd.f32 0.5, %v1454_v43  ;;  %v5340_v51 = vpop.eup %5339  ;;  %v7197_v43 = vld [vmem:[#allocation25_spill] sm:$0xff] }
 0x5df   :  { %v1458_v31 = vadd.f32 0.5, %v1455_v13  ;;  %v1456_v26 = vmul.f32 0.5, %v5340_v51  ;;  %v7195_v13 = vld [vmem:[#allocation23_spill] sm:$0xff]  ;;  %v7202_v51 = vld [vmem:[#allocation30_spill] sm:$0xff] }
 0x5e0   :  { %v1461_v18 = vmul.f32 %v5338_v36, %v1457_v48  ;;  %v7191_v36 = vld [vmem:[#allocation19_spill] sm:$0xff]  ;;  %v7193_v48 = vld [vmem:[#allocation21_spill] sm:$0xff] }
 0x5e1   :  { %v1460_v6 = vmul.f32 %v1458_v31, %v6085_v34  ;;  %v1459_v32 = vadd.f32 0.5, %v1456_v26  ;;  %v7189_v34 = vld [vmem:[#allocation17_spill] sm:$0xff]  ;;  %v7190_v31 = vld [vmem:[#allocation18_spill] sm:$0xff]  ;;  %v7203_v26 = vld [vmem:[#allocation31_spill] sm:$0xff] }
 0x5e3   :  { %v6209_v27 = vadd.f32 %v1461_v18, %v1460_v6  ;;  %v7194_v6 = vld [vmem:[#allocation22_spill] sm:$0xff]  ;;  %v7201_v18 = vld [vmem:[#allocation29_spill] sm:$0xff] }
 0x5e5   :  { %5341 = vtanh.f32 %v6209_v27 }
 0x5ef   :  { %v5342_v38 = vpop.eup %5341 }
 0x5f0   :  { %v1464_v20 = vmul.f32 %v5342_v38, %v1459_v32  ;;  %v7204_v32 = vld [vmem:[#allocation32_spill] sm:$0xff]  ;;  %v7205_v38 = vld [vmem:[#allocation33_spill] sm:$0xff] }
 0x5f2   :  { %1530 = vmatmul.mubr.f32.vlgmr.msra.gmra.mrb[10].mxu0 %v1464_v20  ;;  %1601 = vmatmul.mubr.f32.vlgmr.msra.gmra.mrb[10].mxu1 %v1464_v20  ;;  %v7206_v20 = vld [vmem:[#allocation34_spill] sm:$0xff] }
 0x5f3   :  { %4326 = vmatpush1.bf16.msra.mxu0 %v5904_v37  ;;  %4358 = vmatpush1.bf16.msra.mxu1 %v7128_v50 }
 0x5f4   :  { %4328 = vmatprep.subr.bf16.mxu0 %v7129_v0  ;;  %4360 = vmatprep.subr.bf16.mxu1 %v7130_v45 }
 0x5f5   :  { %1679 = vmatprep.mubr.f32.mxu0 %v7079_v44  ;;  %1750 = vmatprep.mubr.f32.mxu1 %v7079_v44 }
 0x5f7   :  { %4330 = vmatpush1.bf16.msra.mxu0 %v7131_v25  ;;  %4362 = vmatpush1.bf16.msra.mxu1 %v7132_v61 }
 0x5f8   :  { %4332 = vmatprep.subr.bf16.mxu0 %v7133_v40  ;;  %4364 = vmatprep.subr.bf16.mxu1 %v7134_v54 }
 0x5fb   :  { %4334 = vmatpush1.bf16.msra.mxu0 %v7135_v16  ;;  %4366 = vmatpush1.bf16.msra.mxu1 %v7136_v21 }
 0x5fc   :  { %4336 = vmatprep.subr.bf16.mxu0 %v7137_v29  ;;  %4368 = vmatprep.subr.bf16.mxu1 %v7138_v3 }
 0x5ff   :  { %4338 = vmatpush1.bf16.msra.mxu0 %v7139_v62  ;;  %4370 = vmatpush1.bf16.msra.mxu1 %v7140_v33 }
 0x600   :  { %4340 = vmatprep.subr.bf16.mxu0 %v7141_v46  ;;  %4372 = vmatprep.subr.bf16.mxu1 %v7142_v28 }
 0x603   :  { %4342 = vmatpush1.bf16.msra.mxu0 %v7143_v56  ;;  %4374 = vmatpush1.bf16.msra.mxu1 %v7144_v14 }
 0x604   :  { %4344 = vmatprep.subr.bf16.mxu0 %v5958_v17  ;;  %4376 = vmatprep.subr.bf16.mxu1 %v5960_v41 }
 0x607   :  { %4346 = vmatpush1.bf16.msra.mxu0 %v5964_v42  ;;  %4378 = vmatpush1.bf16.msra.mxu1 %v5966_v58 }
 0x608   :  { %4348 = vmatprep.subr.bf16.mxu0 %v5970_v9  ;;  %4380 = vmatprep.subr.bf16.mxu1 %v5972_v63 }
 0x60b   :  { %4350 = vmatpush1.bf16.msra.mxu0 %v5976_v53  ;;  %4382 = vmatpush1.bf16.msra.mxu1 %v5978_v2 }
 0x60c   :  { %4352 = vmatprep.subr.bf16.mxu0 %v5982_v10  ;;  %4384 = vmatprep.subr.bf16.mxu1 %v5984_v49 }
 0x60f   :  { %4354 = vmatpush1.bf16.msra.mxu0 %v5988_v8  ;;  %4386 = vmatpush1.bf16.msra.mxu1 %v5990_v22 }
 0x610   :  { %4388 = vmatprep.subr.bf16.mxu0 %v5631_v7  ;;  %4420 = vmatprep.subr.bf16.mxu1 %v5633_v11 }
 0x612   :  { %1680 = vmatmul.mubr.f32.vlgmr.msra.gmra.mrb[12].mxu0 %v6166_v5  ;;  %1751 = vmatmul.mubr.f32.vlgmr.msra.gmra.mrb[12].mxu1 %v6166_v5  ;;  %v7192_v5 = vld [vmem:[#allocation20_spill] sm:$0xff] }
 0x613   :  { %4390 = vmatpush1.bf16.msra.mxu0 %v5635_v12  ;;  %4422 = vmatpush1.bf16.msra.mxu1 %v5638_v15 }
 0x614   :  { %4392 = vmatprep.subr.bf16.mxu0 %v5643_v19  ;;  %4424 = vmatprep.subr.bf16.mxu1 %v5645_v23 }
 0x615   :  { %1836 = vmatprep.mubr.f32.mxu0 %v7079_v44  ;;  %1907 = vmatprep.mubr.f32.mxu1 %v7079_v44 }
 0x617   :  { %4394 = vmatpush1.bf16.msra.mxu0 %v5647_v24  ;;  %4426 = vmatpush1.bf16.msra.mxu1 %v7189_v34 }
 0x618   :  { %4396 = vmatprep.subr.bf16.mxu0 %v7190_v31  ;;  %4428 = vmatprep.subr.bf16.mxu1 %v7191_v36 }
 0x61b   :  { %4398 = vmatpush1.bf16.msra.mxu0 %v7192_v5  ;;  %4430 = vmatpush1.bf16.msra.mxu1 %v7193_v48  ;;  %v7218_v48 = vld [vmem:[#allocation43_spill] sm:$0xff]  ;;  %v7219_v5 = vld [vmem:[#allocation44_spill] sm:$0xff] }
 0x61c   :  { %4400 = vmatprep.subr.bf16.mxu0 %v7194_v6  ;;  %4432 = vmatprep.subr.bf16.mxu1 %v7195_v13  ;;  %v7217_v13 = vld [vmem:[#allocation49_spill] sm:$0xff] }
 0x61f   :  { %4402 = vmatpush1.bf16.msra.mxu0 %v7196_v52  ;;  %4434 = vmatpush1.bf16.msra.mxu1 %v7197_v43  ;;  %v7207_v52 = vld [vmem:[#allocation35_spill] sm:$0xff]  ;;  %v7208_v43 = vld [vmem:[#allocation36_spill] sm:$0xff] }
 0x620   :  { %4404 = vmatprep.subr.bf16.mxu0 %v7198_v1  ;;  %4436 = vmatprep.subr.bf16.mxu1 %v7199_v47  ;;  %v7209_v1 = vld [vmem:[#allocation37_spill] sm:$0xff]  ;;  %v7210_v47 = vld [vmem:[#allocation38_spill] sm:$0xff] }
 0x623   :  { %4406 = vmatpush1.bf16.msra.mxu0 %v7200_v39  ;;  %4438 = vmatpush1.bf16.msra.mxu1 %v7201_v18  ;;  %v7211_v39 = vld [vmem:[#allocation39_spill] sm:$0xff]  ;;  %v7212_v18 = vld [vmem:[#allocation40_spill] sm:$0xff] }
 0x624   :  { %4408 = vmatprep.subr.bf16.mxu0 %v7202_v51  ;;  %4440 = vmatprep.subr.bf16.mxu1 %v7203_v26  ;;  %v7213_v51 = vld [vmem:[#allocation41_spill] sm:$0xff]  ;;  %v7214_v26 = vld [vmem:[#allocation50_spill] sm:$0xff] }
 0x627   :  { %4410 = vmatpush1.bf16.msra.mxu0 %v7204_v32  ;;  %4442 = vmatpush1.bf16.msra.mxu1 %v7205_v38  ;;  %v7215_v32 = vld [vmem:[#allocation51_spill] sm:$0xff]  ;;  %v7216_v38 = vld [vmem:[#allocation42_spill] sm:$0xff] }
 0x628   :  { %4412 = vmatprep.subr.bf16.mxu0 %v7206_v20  ;;  %4444 = vmatprep.subr.bf16.mxu1 %v7207_v52  ;;  %v1607_v20 = vrot.slane %v7216_v38, 6  ;;  %v1609_v52 = vrot.slane %v7217_v13, 6 }
 0x62b   :  { %4414 = vmatpush1.bf16.msra.mxu0 %v7208_v43  ;;  %4446 = vmatpush1.bf16.msra.mxu1 %v7209_v1  ;;  %v1608_v1 = vrot.slane %v7218_v48, 6 }
 0x62c   :  { %4416 = vmatprep.subr.bf16.mxu0 %v7210_v47  ;;  %4448 = vmatprep.subr.bf16.mxu1 %v7211_v39  ;;  %v1610_v47 = vrot.slane %v7219_v5, 6 }
 0x62f   :  { %4418 = vmatpush1.bf16.msra.mxu0 %v7212_v18  ;;  %4450 = vmatpush1.bf16.msra.mxu1 %v7213_v51 }
 0x630   :  { %4452 = vmatprep.subr.bf16.mxu0 %v7214_v26  ;;  %4484 = vmatprep.subr.bf16.mxu1 %v7215_v32 }
 0x6e5   :  { %v1681_v6 = vpop.f32.mrb[12].mxu0  ;;  %v1752_v43 = vpop.f32.mrb[12].mxu1 }
 0x6e6   :  { %v1682_v36 = vadd.f32 %v1681_v6, %v1607_v20  ;;  %v1753_v39 = vadd.f32 %v1752_v43, %v1609_v52  ;;  %v1683_v31 = vpop.f32.mrb[13].mxu0  ;;  %v1754_v18 = vpop.f32.mrb[13].mxu1  ;;  %v7231_v20 = vld [vmem:[#allocation66_spill] sm:$0xff] }
 0x6e7   :  { %v1684_v34 = vadd.f32 %v1683_v31, %v1608_v1  ;;  %v1755_v51 = vadd.f32 %v1754_v18, %v1610_v47  ;;  %v7224_v1 = vld [vmem:[#allocation59_spill] sm:$0xff]  ;;  %v7225_v47 = vld [vmem:[#allocation60_spill] sm:$0xff]  ;;  %v7227_v18 = vld [vmem:[#allocation62_spill] sm:$0xff] }
 0x6e8   :  { %5343 = vtanh.f32 %v1682_v36 }
 0x6e9   :  { %5345 = vtanh.f32 %v1684_v34 }
 0x6ea   :  { %5347 = vtanh.f32 %v1755_v51  ;;  %v7228_v51 = vld [vmem:[#allocation63_spill] sm:$0xff] }
 0x6eb   :  { %5349 = vtanh.f32 %v1753_v39  ;;  %v7226_v39 = vld [vmem:[#allocation61_spill] sm:$0xff] }
 0x6f2   :  { %v5344_v32 = vpop.eup %5343 }
 0x6f3   :  { %v1761_v26 = vmul.f32 0.5, %v5344_v32  ;;  %v5346_v38 = vpop.eup %5345  ;;  %v7230_v32 = vld [vmem:[#allocation65_spill] sm:$0xff] }
 0x6f4   :  { %v1762_v13 = vmul.f32 0.5, %v5346_v38  ;;  %v5348_v23 = vpop.eup %5347  ;;  %v7232_v38 = vld [vmem:[#allocation67_spill] sm:$0xff] }
 0x6f5   :  { %v1764_v24 = vadd.f32 0.5, %v1761_v26  ;;  %v5350_v31 = vpop.eup %5349  ;;  %v7229_v26 = vld [vmem:[#allocation64_spill] sm:$0xff] }
 0x6f6   :  { %v1765_v19 = vadd.f32 0.5, %v1762_v13  ;;  %v1763_v52 = vmul.f32 0.5, %v5350_v31  ;;  %v7233_v13 = vld [vmem:[#allocation68_spill] sm:$0xff]  ;;  %v7236_v31 = vld [vmem:[#allocation71_spill] sm:$0xff] }
 0x6f7   :  { %v1768_v48 = vmul.f32 %v5348_v23, %v1764_v24  ;;  %v7221_v23 = vld [vmem:[#allocation56_spill] sm:$0xff]  ;;  %v7222_v24 = vld [vmem:[#allocation57_spill] sm:$0xff] }
 0x6f8   :  { %v1767_v5 = vmul.f32 %v1765_v19, %v6163_v55  ;;  %v1766_v36 = vadd.f32 0.5, %v1763_v52  ;;  %v7220_v19 = vld [vmem:[#allocation55_spill] sm:$0xff]  ;;  %v7223_v55 = vld [vmem:[#allocation58_spill] sm:$0xff]  ;;  %v7237_v52 = vld [vmem:[#allocation72_spill] sm:$0xff] }
 0x6fa   :  { %v6287_v6 = vadd.f32 %v1768_v48, %v1767_v5  ;;  %v7234_v48 = vld [vmem:[#allocation69_spill] sm:$0xff]  ;;  %v7235_v5 = vld [vmem:[#allocation70_spill] sm:$0xff] }
 0x6fc   :  { %5351 = vtanh.f32 %v6287_v6 }
 0x706   :  { %v5352_v34 = vpop.eup %5351 }
 0x707   :  { %v6290_v43 = vmul.f32 %v5352_v34, %v1766_v36  ;;  %v7238_v36 = vld [vmem:[#allocation73_spill] sm:$0xff]  ;;  %v7239_v34 = vld [vmem:[#allocation74_spill] sm:$0xff] }
 0x709   :  { %1837 = vmatmul.mubr.f32.vlgmr.msra.gmra.mrb[10].mxu0 %v6290_v43  ;;  %1908 = vmatmul.mubr.f32.vlgmr.msra.gmra.mrb[10].mxu1 %v6290_v43 }
 0x70a   :  { %4454 = vmatpush1.bf16.msra.mxu0 %v7156_v60  ;;  %4486 = vmatpush1.bf16.msra.mxu1 %v7157_v59 }
 0x70b   :  { %4456 = vmatprep.subr.bf16.mxu0 %v7158_v35  ;;  %4488 = vmatprep.subr.bf16.mxu1 %v7220_v19 }
 0x70c   :  { %1993 = vmatprep.mubr.f32.mxu0 %v7079_v44  ;;  %2064 = vmatprep.mubr.f32.mxu1 %v7079_v44 }
 0x70e   :  { %4458 = vmatpush1.bf16.msra.mxu0 %v7221_v23  ;;  %4490 = vmatpush1.bf16.msra.mxu1 %v7222_v24 }
 0x70f   :  { %4460 = vmatprep.subr.bf16.mxu0 %v7223_v55  ;;  %4492 = vmatprep.subr.bf16.mxu1 %v7224_v1 }
 0x712   :  { %4462 = vmatpush1.bf16.msra.mxu0 %v7225_v47  ;;  %4494 = vmatpush1.bf16.msra.mxu1 %v7226_v39 }
 0x713   :  { %4464 = vmatprep.subr.bf16.mxu0 %v7227_v18  ;;  %4496 = vmatprep.subr.bf16.mxu1 %v7228_v51  ;;  %v7249_v51 = vld [vmem:[#allocation84_spill] sm:$0xff] }
 0x716   :  { %4466 = vmatpush1.bf16.msra.mxu0 %v7229_v26  ;;  %4498 = vmatpush1.bf16.msra.mxu1 %v7230_v32  ;;  %v7240_v26 = vld [vmem:[#allocation75_spill] sm:$0xff]  ;;  %v7241_v32 = vld [vmem:[#allocation76_spill] sm:$0xff] }
 0x717   :  { %4468 = vmatprep.subr.bf16.mxu0 %v7231_v20  ;;  %4500 = vmatprep.subr.bf16.mxu1 %v7232_v38  ;;  %v7242_v20 = vld [vmem:[#allocation77_spill] sm:$0xff]  ;;  %v7243_v38 = vld [vmem:[#allocation78_spill] sm:$0xff] }
 0x71a   :  { %4470 = vmatpush1.bf16.msra.mxu0 %v7233_v13  ;;  %4502 = vmatpush1.bf16.msra.mxu1 %v7234_v48  ;;  %v7244_v13 = vld [vmem:[#allocation79_spill] sm:$0xff]  ;;  %v7245_v48 = vld [vmem:[#allocation80_spill] sm:$0xff] }
 0x71b   :  { %4472 = vmatprep.subr.bf16.mxu0 %v7235_v5  ;;  %4504 = vmatprep.subr.bf16.mxu1 %v7236_v31  ;;  %v7246_v5 = vld [vmem:[#allocation81_spill] sm:$0xff]  ;;  %v7247_v31 = vld [vmem:[#allocation82_spill] sm:$0xff] }
 0x71e   :  { %4474 = vmatpush1.bf16.msra.mxu0 %v7237_v52  ;;  %4506 = vmatpush1.bf16.msra.mxu1 %v7238_v36  ;;  %v7248_v52 = vld [vmem:[#allocation83_spill] sm:$0xff] }
 0x71f   :  { %4476 = vmatprep.subr.bf16.mxu0 %v7239_v34  ;;  %4508 = vmatprep.subr.bf16.mxu1 %v7240_v26 }
 0x722   :  { %4478 = vmatpush1.bf16.msra.mxu0 %v7241_v32  ;;  %4510 = vmatpush1.bf16.msra.mxu1 %v7242_v20 }
 0x723   :  { %4480 = vmatprep.subr.bf16.mxu0 %v7243_v38  ;;  %4512 = vmatprep.subr.bf16.mxu1 %v7244_v13 }
 0x726   :  { %4482 = vmatpush1.bf16.msra.mxu0 %v7245_v48  ;;  %4514 = vmatpush1.bf16.msra.mxu1 %v7246_v5 }
 0x727   :  { %4516 = vmatprep.subr.bf16.mxu0 %v7247_v31  ;;  %4548 = vmatprep.subr.bf16.mxu1 %v7248_v52 }
 0x7dc   :  { %v1838_v36 = vpop.f32.mrb[10].mxu0  ;;  %v1909_v34 = vpop.f32.mrb[10].mxu1 }
 0x7dd   :  { %v5227_v26 = vadd.f32 %v1838_v36, %v7249_v51  ;;  %v1840_v18 = vpop.f32.mrb[11].mxu0  ;;  %v1911_v32 = vpop.f32.mrb[11].mxu1  ;;  %v5229_v48 = vadd.f32 %v1909_v34, %v7126_v57  ;;  %v7261_v34 = vld [vmem:[#allocation25_spill] sm:$0xff] }
 0x7de   :  { %v5228_v20 = vadd.f32 %v1840_v18, %v7124_v30  ;;  %v5230_v38 = vadd.f32 %v1911_v32, %v7125_v4 }
 0x7df   :  { %5353 = vtanh.f32 %v5227_v26 }
 0x7e0   :  { %5355 = vtanh.f32 %v5228_v20 }
 0x7e1   :  { %5357 = vtanh.f32 %v5230_v38 }
 0x7e2   :  { %5359 = vtanh.f32 %v5229_v48  ;;  %v7257_v48 = vld [vmem:[#allocation21_spill] sm:$0xff] }
 0x7e9   :  { %v5354_v5 = vpop.eup %5353 }
 0x7ea   :  { %v1918_v13 = vmul.f32 0.5, %v5354_v5  ;;  %v5356_v31 = vpop.eup %5355  ;;  %v7258_v5 = vld [vmem:[#allocation22_spill] sm:$0xff] }
 0x7eb   :  { %v1919_v52 = vmul.f32 0.5, %v5356_v31  ;;  %v5358_v47 = vpop.eup %5357  ;;  %v7259_v31 = vld [vmem:[#allocation23_spill] sm:$0xff] }
 0x7ec   :  { %v1921_v39 = vadd.f32 0.5, %v1918_v13  ;;  %v5360_v18 = vpop.eup %5359  ;;  %v7255_v13 = vld [vmem:[#allocation19_spill] sm:$0xff] }
 0x7ed   :  { %v1922_v1 = vadd.f32 0.5, %v1919_v52  ;;  %v1920_v26 = vmul.f32 0.5, %v5360_v18  ;;  %v7260_v52 = vld [vmem:[#allocation24_spill] sm:$0xff]  ;;  %v7263_v18 = vld [vmem:[#allocation27_spill] sm:$0xff] }
 0x7ee   :  { %v1925_v36 = vmul.f32 %v5358_v47, %v1921_v39  ;;  %v7252_v47 = vld [vmem:[#allocation16_spill] sm:$0xff]  ;;  %v7253_v39 = vld [vmem:[#allocation17_spill] sm:$0xff] }
 0x7ef   :  { %v1924_v51 = vmul.f32 %v1922_v1, %v6209_v27  ;;  %v1923_v32 = vadd.f32 0.5, %v1920_v26  ;;  %v7250_v27 = vld [vmem:[#allocation14_spill] sm:$0xff]  ;;  %v7251_v1 = vld [vmem:[#allocation15_spill] sm:$0xff]  ;;  %v7264_v26 = vld [vmem:[#allocation28_spill] sm:$0xff] }
 0x7f1   :  { %v6333_v55 = vadd.f32 %v1925_v36, %v1924_v51  ;;  %v7254_v51 = vld [vmem:[#allocation18_spill] sm:$0xff] }
 0x7f2   :  { %v7262_v36 = vld [vmem:[#allocation26_spill] sm:$0xff] }
 0x7f3   :  { %5361 = vtanh.f32 %v6333_v55 }
 0x7fd   :  { %v5362_v20 = vpop.eup %5361 }
 0x7fe   :  { %v1928_v38 = vmul.f32 %v5362_v20, %v1923_v32  ;;  %v7265_v32 = vld [vmem:[#allocation29_spill] sm:$0xff]  ;;  %v7266_v20 = vld [vmem:[#allocation30_spill] sm:$0xff] }
 0x800   :  { %1994 = vmatmul.mubr.f32.vlgmr.msra.gmra.mrb[14].mxu0 %v1928_v38  ;;  %2065 = vmatmul.mubr.f32.vlgmr.msra.gmra.mrb[14].mxu1 %v1928_v38  ;;  %v7267_v38 = vld [vmem:[#allocation31_spill] sm:$0xff] }
 0x801   :  { %4518 = vmatpush1.bf16.msra.mxu0 %v5904_v37  ;;  %4550 = vmatpush1.bf16.msra.mxu1 %v7128_v50 }
 0x802   :  { %4520 = vmatprep.subr.bf16.mxu0 %v7129_v0  ;;  %4552 = vmatprep.subr.bf16.mxu1 %v7130_v45 }
 0x803   :  { %2135 = vmatprep.mubr.f32.mxu0 %v7079_v44  ;;  %2206 = vmatprep.mubr.f32.mxu1 %v7079_v44 }
 0x805   :  { %4522 = vmatpush1.bf16.msra.mxu0 %v7131_v25  ;;  %4554 = vmatpush1.bf16.msra.mxu1 %v7132_v61 }
 0x806   :  { %4524 = vmatprep.subr.bf16.mxu0 %v7133_v40  ;;  %4556 = vmatprep.subr.bf16.mxu1 %v7134_v54 }
 0x809   :  { %4526 = vmatpush1.bf16.msra.mxu0 %v7135_v16  ;;  %4558 = vmatpush1.bf16.msra.mxu1 %v7136_v21 }
 0x80a   :  { %4528 = vmatprep.subr.bf16.mxu0 %v7137_v29  ;;  %4560 = vmatprep.subr.bf16.mxu1 %v7138_v3 }
 0x80d   :  { %4530 = vmatpush1.bf16.msra.mxu0 %v7139_v62  ;;  %4562 = vmatpush1.bf16.msra.mxu1 %v7140_v33 }
 0x80e   :  { %4532 = vmatprep.subr.bf16.mxu0 %v7141_v46  ;;  %4564 = vmatprep.subr.bf16.mxu1 %v7142_v28 }
 0x811   :  { %4534 = vmatpush1.bf16.msra.mxu0 %v7143_v56  ;;  %4566 = vmatpush1.bf16.msra.mxu1 %v7144_v14 }
 0x812   :  { %4536 = vmatprep.subr.bf16.mxu0 %v5958_v17  ;;  %4568 = vmatprep.subr.bf16.mxu1 %v5960_v41 }
 0x815   :  { %4538 = vmatpush1.bf16.msra.mxu0 %v5964_v42  ;;  %4570 = vmatpush1.bf16.msra.mxu1 %v5966_v58 }
 0x816   :  { %4540 = vmatprep.subr.bf16.mxu0 %v5970_v9  ;;  %4572 = vmatprep.subr.bf16.mxu1 %v5972_v63 }
 0x819   :  { %4542 = vmatpush1.bf16.msra.mxu0 %v5976_v53  ;;  %4574 = vmatpush1.bf16.msra.mxu1 %v5978_v2 }
 0x81a   :  { %4544 = vmatprep.subr.bf16.mxu0 %v5982_v10  ;;  %4576 = vmatprep.subr.bf16.mxu1 %v5984_v49 }
 0x81d   :  { %4546 = vmatpush1.bf16.msra.mxu0 %v5988_v8  ;;  %4578 = vmatpush1.bf16.msra.mxu1 %v5990_v22 }
 0x81e   :  { %4580 = vmatprep.subr.bf16.mxu0 %v5631_v7  ;;  %4612 = vmatprep.subr.bf16.mxu1 %v5633_v11 }
 0x820   :  { %2136 = vmatmul.mubr.f32.vlgmr.msra.gmra.mrb[16].mxu0 %v6290_v43  ;;  %2207 = vmatmul.mubr.f32.vlgmr.msra.gmra.mrb[16].mxu1 %v6290_v43  ;;  %v7256_v43 = vld [vmem:[#allocation20_spill] sm:$0xff] }
 0x821   :  { %4582 = vmatpush1.bf16.msra.mxu0 %v5635_v12  ;;  %4614 = vmatpush1.bf16.msra.mxu1 %v5638_v15 }
 0x822   :  { %4584 = vmatprep.subr.bf16.mxu0 %v7250_v27  ;;  %4616 = vmatprep.subr.bf16.mxu1 %v7251_v1 }
 0x823   :  { %2292 = vmatprep.mubr.f32.mxu0 %v7079_v44  ;;  %2363 = vmatprep.mubr.f32.mxu1 %v7079_v44 }
 0x825   :  { %4586 = vmatpush1.bf16.msra.mxu0 %v7252_v47  ;;  %4618 = vmatpush1.bf16.msra.mxu1 %v7253_v39 }
 0x826   :  { %4588 = vmatprep.subr.bf16.mxu0 %v7254_v51  ;;  %4620 = vmatprep.subr.bf16.mxu1 %v7255_v13  ;;  %v7281_v51 = vld [vmem:[#allocation46_spill] sm:$0xff] }
 0x829   :  { %4590 = vmatpush1.bf16.msra.mxu0 %v7256_v43  ;;  %4622 = vmatpush1.bf16.msra.mxu1 %v7257_v48  ;;  %v7268_v48 = vld [vmem:[#allocation32_spill] sm:$0xff]  ;;  %v7280_v43 = vld [vmem:[#allocation45_spill] sm:$0xff] }
 0x82a   :  { %4592 = vmatprep.subr.bf16.mxu0 %v7258_v5  ;;  %4624 = vmatprep.subr.bf16.mxu1 %v7259_v31  ;;  %v7269_v5 = vld [vmem:[#allocation33_spill] sm:$0xff]  ;;  %v7270_v31 = vld [vmem:[#allocation34_spill] sm:$0xff] }
 0x82d   :  { %4594 = vmatpush1.bf16.msra.mxu0 %v7260_v52  ;;  %4626 = vmatpush1.bf16.msra.mxu1 %v7261_v34  ;;  %v7271_v52 = vld [vmem:[#allocation35_spill] sm:$0xff]  ;;  %v7272_v34 = vld [vmem:[#allocation36_spill] sm:$0xff] }
 0x82e   :  { %4596 = vmatprep.subr.bf16.mxu0 %v7262_v36  ;;  %4628 = vmatprep.subr.bf16.mxu1 %v7263_v18  ;;  %v7273_v36 = vld [vmem:[#allocation37_spill] sm:$0xff]  ;;  %v7274_v18 = vld [vmem:[#allocation38_spill] sm:$0xff] }
 0x831   :  { %4598 = vmatpush1.bf16.msra.mxu0 %v7264_v26  ;;  %4630 = vmatpush1.bf16.msra.mxu1 %v7265_v32  ;;  %v7275_v26 = vld [vmem:[#allocation39_spill] sm:$0xff]  ;;  %v7276_v32 = vld [vmem:[#allocation40_spill] sm:$0xff] }
 0x832   :  { %4600 = vmatprep.subr.bf16.mxu0 %v7266_v20  ;;  %4632 = vmatprep.subr.bf16.mxu1 %v7267_v38  ;;  %v7277_v20 = vld [vmem:[#allocation41_spill] sm:$0xff]  ;;  %v7278_v38 = vld [vmem:[#allocation50_spill] sm:$0xff] }
 0x835   :  { %4602 = vmatpush1.bf16.msra.mxu0 %v7268_v48  ;;  %4634 = vmatpush1.bf16.msra.mxu1 %v7269_v5  ;;  %v7279_v48 = vld [vmem:[#allocation51_spill] sm:$0xff] }
 0x836   :  { %4604 = vmatprep.subr.bf16.mxu0 %v7270_v31  ;;  %4636 = vmatprep.subr.bf16.mxu1 %v7271_v52 }
 0x839   :  { %4606 = vmatpush1.bf16.msra.mxu0 %v7272_v34  ;;  %4638 = vmatpush1.bf16.msra.mxu1 %v7273_v36 }
 0x83a   :  { %4608 = vmatprep.subr.bf16.mxu0 %v7274_v18  ;;  %4640 = vmatprep.subr.bf16.mxu1 %v7275_v26  ;;  %v7282_v18 = vld [vmem:[#allocation48_spill] sm:$0xff] }
 0x83d   :  { %4610 = vmatpush1.bf16.msra.mxu0 %v7276_v32  ;;  %4642 = vmatpush1.bf16.msra.mxu1 %v7277_v20  ;;  %v7283_v32 = vld [vmem:[#allocation47_spill] sm:$0xff] }
 0x83e   :  { %4644 = vmatprep.subr.bf16.mxu0 %v7278_v38  ;;  %4676 = vmatprep.subr.bf16.mxu1 %v7279_v48 }
 0x8f3   :  { %v2137_v5 = vpop.f32.mrb[16].mxu0  ;;  %v2208_v31 = vpop.f32.mrb[16].mxu1 }
 0x8f4   :  { %v2138_v52 = vadd.f32 %v2137_v5, %v7280_v43  ;;  %v2139_v13 = vpop.f32.mrb[17].mxu0  ;;  %v2210_v34 = vpop.f32.mrb[17].mxu1  ;;  %v2209_v26 = vadd.f32 %v2208_v31, %v7283_v32 }
 0x8f5   :  { %v2140_v36 = vadd.f32 %v2139_v13, %v7281_v51  ;;  %v2211_v39 = vadd.f32 %v2210_v34, %v7282_v18 }
 0x8f6   :  { %5363 = vtanh.f32 %v2138_v52 }
 0x8f7   :  { %5365 = vtanh.f32 %v2140_v36  ;;  %v7291_v36 = vld [vmem:[#allocation65_spill] sm:$0xff] }
 0x8f8   :  { %5367 = vtanh.f32 %v2211_v39 }
 0x8f9   :  { %5369 = vtanh.f32 %v2209_v26  ;;  %v7292_v26 = vld [vmem:[#allocation66_spill] sm:$0xff] }
 0x900   :  { %v5364_v20 = vpop.eup %5363 }
 0x901   :  { %v2217_v47 = vmul.f32 0.5, %v5364_v20  ;;  %v5366_v38 = vpop.eup %5365  ;;  %v7293_v20 = vld [vmem:[#allocation67_spill] sm:$0xff] }
 0x902   :  { %v2218_v48 = vmul.f32 0.5, %v5366_v38  ;;  %v5368_v27 = vpop.eup %5367  ;;  %v7294_v38 = vld [vmem:[#allocation68_spill] sm:$0xff] }
 0x903   :  { %v2220_v1 = vadd.f32 0.5, %v2217_v47  ;;  %v5370_v13 = vpop.eup %5369  ;;  %v7288_v47 = vld [vmem:[#allocation62_spill] sm:$0xff] }
 0x904   :  { %v2221_v15 = vadd.f32 0.5, %v2218_v48  ;;  %v2219_v52 = vmul.f32 0.5, %v5370_v13  ;;  %v7290_v48 = vld [vmem:[#allocation64_spill] sm:$0xff]  ;;  %v7296_v13 = vld [vmem:[#allocation70_spill] sm:$0xff] }
 0x905   :  { %v2224_v5 = vmul.f32 %v5368_v27, %v2220_v1  ;;  %v7286_v27 = vld [vmem:[#allocation60_spill] sm:$0xff]  ;;  %v7287_v1 = vld [vmem:[#allocation61_spill] sm:$0xff] }
 0x906   :  { %v2223_v43 = vmul.f32 %v2221_v15, %v6287_v6  ;;  %v2222_v39 = vadd.f32 0.5, %v2219_v52  ;;  %v7284_v15 = vld [vmem:[#allocation58_spill] sm:$0xff]  ;;  %v7285_v6 = vld [vmem:[#allocation59_spill] sm:$0xff] }
 0x907   :  { %v7297_v52 = vld [vmem:[#allocation71_spill] sm:$0xff] }
 0x908   :  { %v6411_v12 = vadd.f32 %v2224_v5, %v2223_v43  ;;  %v7289_v43 = vld [vmem:[#allocation63_spill] sm:$0xff]  ;;  %v7295_v5 = vld [vmem:[#allocation69_spill] sm:$0xff] }
 0x90a   :  { %5371 = vtanh.f32 %v6411_v12 }
 0x914   :  { %v5372_v34 = vpop.eup %5371 }
 0x915   :  { %v6414_v31 = vmul.f32 %v5372_v34, %v2222_v39  ;;  %v7298_v39 = vld [vmem:[#allocation72_spill] sm:$0xff]  ;;  %v7299_v34 = vld [vmem:[#allocation73_spill] sm:$0xff] }
 0x917   :  { %2293 = vmatmul.mubr.f32.vlgmr.msra.gmra.mrb[14].mxu0 %v6414_v31  ;;  %2364 = vmatmul.mubr.f32.vlgmr.msra.gmra.mrb[14].mxu1 %v6414_v31 }
 0x918   :  { %4646 = vmatpush1.bf16.msra.mxu0 %v7156_v60  ;;  %4678 = vmatpush1.bf16.msra.mxu1 %v7157_v59 }
 0x919   :  { %4648 = vmatprep.subr.bf16.mxu0 %v7158_v35  ;;  %4680 = vmatprep.subr.bf16.mxu1 %v7220_v19 }
 0x91a   :  { %2449 = vmatprep.mubr.f32.mxu0 %v7079_v44  ;;  %2520 = vmatprep.mubr.f32.mxu1 %v7079_v44 }
 0x91c   :  { %4650 = vmatpush1.bf16.msra.mxu0 %v7221_v23  ;;  %4682 = vmatpush1.bf16.msra.mxu1 %v7222_v24 }
 0x91d   :  { %4652 = vmatprep.subr.bf16.mxu0 %v7284_v15  ;;  %4684 = vmatprep.subr.bf16.mxu1 %v7285_v6 }
 0x920   :  { %4654 = vmatpush1.bf16.msra.mxu0 %v7286_v27  ;;  %4686 = vmatpush1.bf16.msra.mxu1 %v7287_v1 }
 0x921   :  { %4656 = vmatprep.subr.bf16.mxu0 %v7288_v47  ;;  %4688 = vmatprep.subr.bf16.mxu1 %v7289_v43  ;;  %v7300_v43 = vld [vmem:[#allocation74_spill] sm:$0xff]  ;;  %v7310_v47 = vld [vmem:[#allocation84_spill] sm:$0xff] }
 0x924   :  { %4658 = vmatpush1.bf16.msra.mxu0 %v7290_v48  ;;  %4690 = vmatpush1.bf16.msra.mxu1 %v7291_v36  ;;  %v7301_v48 = vld [vmem:[#allocation75_spill] sm:$0xff]  ;;  %v7302_v36 = vld [vmem:[#allocation76_spill] sm:$0xff] }
 0x925   :  { %4660 = vmatprep.subr.bf16.mxu0 %v7292_v26  ;;  %4692 = vmatprep.subr.bf16.mxu1 %v7293_v20  ;;  %v7303_v26 = vld [vmem:[#allocation77_spill] sm:$0xff]  ;;  %v7304_v20 = vld [vmem:[#allocation78_spill] sm:$0xff] }
 0x928   :  { %4662 = vmatpush1.bf16.msra.mxu0 %v7294_v38  ;;  %4694 = vmatpush1.bf16.msra.mxu1 %v7295_v5  ;;  %v7305_v38 = vld [vmem:[#allocation79_spill] sm:$0xff]  ;;  %v7306_v5 = vld [vmem:[#allocation80_spill] sm:$0xff] }
 0x929   :  { %4664 = vmatprep.subr.bf16.mxu0 %v7296_v13  ;;  %4696 = vmatprep.subr.bf16.mxu1 %v7297_v52  ;;  %v7307_v13 = vld [vmem:[#allocation81_spill] sm:$0xff]  ;;  %v7308_v52 = vld [vmem:[#allocation82_spill] sm:$0xff] }
 0x92c   :  { %4666 = vmatpush1.bf16.msra.mxu0 %v7298_v39  ;;  %4698 = vmatpush1.bf16.msra.mxu1 %v7299_v34  ;;  %v7309_v39 = vld [vmem:[#allocation83_spill] sm:$0xff] }
 0x92d   :  { %4668 = vmatprep.subr.bf16.mxu0 %v7300_v43  ;;  %4700 = vmatprep.subr.bf16.mxu1 %v7301_v48 }
 0x930   :  { %4670 = vmatpush1.bf16.msra.mxu0 %v7302_v36  ;;  %4702 = vmatpush1.bf16.msra.mxu1 %v7303_v26 }
 0x931   :  { %4672 = vmatprep.subr.bf16.mxu0 %v7304_v20  ;;  %4704 = vmatprep.subr.bf16.mxu1 %v7305_v38 }
 0x934   :  { %4674 = vmatpush1.bf16.msra.mxu0 %v7306_v5  ;;  %4706 = vmatpush1.bf16.msra.mxu1 %v7307_v13 }
 0x935   :  { %4708 = vmatprep.subr.bf16.mxu0 %v7308_v52  ;;  %4740 = vmatprep.subr.bf16.mxu1 %v7309_v39 }
 0x9ea   :  { %v2294_v34 = vpop.f32.mrb[14].mxu0  ;;  %v2365_v43 = vpop.f32.mrb[14].mxu1 }
 0x9eb   :  { %v5231_v48 = vadd.f32 %v2294_v34, %v7310_v47  ;;  %v2296_v1 = vpop.f32.mrb[15].mxu0  ;;  %v2367_v36 = vpop.f32.mrb[15].mxu1  ;;  %v5233_v5 = vadd.f32 %v2365_v43, %v7126_v57 }
 0x9ec   :  { %v5232_v26 = vadd.f32 %v2296_v1, %v7124_v30  ;;  %v5234_v20 = vadd.f32 %v2367_v36, %v7125_v4 }
 0x9ed   :  { %5373 = vtanh.f32 %v5231_v48 }
 0x9ee   :  { %5375 = vtanh.f32 %v5232_v26 }
 0x9ef   :  { %5377 = vtanh.f32 %v5234_v20  ;;  %v7316_v20 = vld [vmem:[#allocation17_spill] sm:$0xff] }
 0x9f0   :  { %5379 = vtanh.f32 %v5233_v5  ;;  %v7318_v5 = vld [vmem:[#allocation19_spill] sm:$0xff] }
 0x9f7   :  { %v5374_v13 = vpop.eup %5373 }
 0x9f8   :  { %v2374_v38 = vmul.f32 0.5, %v5374_v13  ;;  %v5376_v52 = vpop.eup %5375  ;;  %v7320_v13 = vld [vmem:[#allocation21_spill] sm:$0xff] }
 0x9f9   :  { %v2375_v39 = vmul.f32 0.5, %v5376_v52  ;;  %v5378_v6 = vpop.eup %5377  ;;  %v7321_v52 = vld [vmem:[#allocation22_spill] sm:$0xff] }
 0x9fa   :  { %v2377_v27 = vadd.f32 0.5, %v2374_v38  ;;  %v5380_v1 = vpop.eup %5379  ;;  %v7317_v38 = vld [vmem:[#allocation18_spill] sm:$0xff] }
 0x9fb   :  { %v2378_v15 = vadd.f32 0.5, %v2375_v39  ;;  %v2376_v48 = vmul.f32 0.5, %v5380_v1  ;;  %v7322_v39 = vld [vmem:[#allocation23_spill] sm:$0xff]  ;;  %v7324_v1 = vld [vmem:[#allocation25_spill] sm:$0xff] }
 0x9fc   :  { %v2381_v34 = vmul.f32 %v5378_v6, %v2377_v27  ;;  %v7313_v6 = vld [vmem:[#allocation14_spill] sm:$0xff]  ;;  %v7314_v27 = vld [vmem:[#allocation15_spill] sm:$0xff] }
 0x9fd   :  { %v2380_v47 = vmul.f32 %v2378_v15, %v6333_v55  ;;  %v2379_v36 = vadd.f32 0.5, %v2376_v48  ;;  %v7311_v55 = vld [vmem:[#allocation12_spill] sm:$0xff]  ;;  %v7312_v15 = vld [vmem:[#allocation13_spill] sm:$0xff]  ;;  %v7325_v48 = vld [vmem:[#allocation26_spill] sm:$0xff] }
 0x9ff   :  { %v6457_v24 = vadd.f32 %v2381_v34, %v2380_v47  ;;  %v7315_v47 = vld [vmem:[#allocation16_spill] sm:$0xff] }
 0xa00   :  { %v7323_v34 = vld [vmem:[#allocation24_spill] sm:$0xff] }
 0xa01   :  { %5381 = vtanh.f32 %v6457_v24 }
 0xa0b   :  { %v5382_v26 = vpop.eup %5381 }
 0xa0c   :  { %v2384_v43 = vmul.f32 %v5382_v26, %v2379_v36  ;;  %v7326_v36 = vld [vmem:[#allocation27_spill] sm:$0xff]  ;;  %v7327_v26 = vld [vmem:[#allocation28_spill] sm:$0xff] }
 0xa0e   :  { %2450 = vmatmul.mubr.f32.vlgmr.msra.gmra.mrb[18].mxu0 %v2384_v43  ;;  %2521 = vmatmul.mubr.f32.vlgmr.msra.gmra.mrb[18].mxu1 %v2384_v43  ;;  %v7328_v43 = vld [vmem:[#allocation29_spill] sm:$0xff] }
 0xa0f   :  { %4710 = vmatpush1.bf16.msra.mxu0 %v5904_v37  ;;  %4742 = vmatpush1.bf16.msra.mxu1 %v7128_v50 }
 0xa10   :  { %4712 = vmatprep.subr.bf16.mxu0 %v7129_v0  ;;  %4744 = vmatprep.subr.bf16.mxu1 %v7130_v45 }
 0xa11   :  { %2603 = vmatprep.mubr.f32.mxu0 %v7079_v44  ;;  %2674 = vmatprep.mubr.f32.mxu1 %v7079_v44 }
 0xa13   :  { %4714 = vmatpush1.bf16.msra.mxu0 %v7131_v25  ;;  %4746 = vmatpush1.bf16.msra.mxu1 %v7132_v61 }
 0xa14   :  { %4716 = vmatprep.subr.bf16.mxu0 %v7133_v40  ;;  %4748 = vmatprep.subr.bf16.mxu1 %v7134_v54 }
 0xa17   :  { %4718 = vmatpush1.bf16.msra.mxu0 %v7135_v16  ;;  %4750 = vmatpush1.bf16.msra.mxu1 %v7136_v21 }
 0xa18   :  { %4720 = vmatprep.subr.bf16.mxu0 %v7137_v29  ;;  %4752 = vmatprep.subr.bf16.mxu1 %v7138_v3 }
 0xa1b   :  { %4722 = vmatpush1.bf16.msra.mxu0 %v7139_v62  ;;  %4754 = vmatpush1.bf16.msra.mxu1 %v7140_v33 }
 0xa1c   :  { %4724 = vmatprep.subr.bf16.mxu0 %v7141_v46  ;;  %4756 = vmatprep.subr.bf16.mxu1 %v7142_v28 }
 0xa1f   :  { %4726 = vmatpush1.bf16.msra.mxu0 %v7143_v56  ;;  %4758 = vmatpush1.bf16.msra.mxu1 %v7144_v14 }
 0xa20   :  { %4728 = vmatprep.subr.bf16.mxu0 %v5958_v17  ;;  %4760 = vmatprep.subr.bf16.mxu1 %v5960_v41 }
 0xa23   :  { %4730 = vmatpush1.bf16.msra.mxu0 %v5964_v42  ;;  %4762 = vmatpush1.bf16.msra.mxu1 %v5966_v58 }
 0xa24   :  { %4732 = vmatprep.subr.bf16.mxu0 %v5970_v9  ;;  %4764 = vmatprep.subr.bf16.mxu1 %v5972_v63 }
 0xa27   :  { %4734 = vmatpush1.bf16.msra.mxu0 %v5976_v53  ;;  %4766 = vmatpush1.bf16.msra.mxu1 %v5978_v2 }
 0xa28   :  { %4736 = vmatprep.subr.bf16.mxu0 %v5982_v10  ;;  %4768 = vmatprep.subr.bf16.mxu1 %v5984_v49 }
 0xa2b   :  { %4738 = vmatpush1.bf16.msra.mxu0 %v5988_v8  ;;  %4770 = vmatpush1.bf16.msra.mxu1 %v5990_v22 }
 0xa2c   :  { %4772 = vmatprep.subr.bf16.mxu0 %v5631_v7  ;;  %4804 = vmatprep.subr.bf16.mxu1 %v5633_v11 }
 0xa2e   :  { %2604 = vmatmul.mubr.f32.vlgmr.msra.gmra.mrb[20].mxu0 %v6414_v31  ;;  %2675 = vmatmul.mubr.f32.vlgmr.msra.gmra.mrb[20].mxu1 %v6414_v31  ;;  %v7319_v31 = vld [vmem:[#allocation20_spill] sm:$0xff] }
 0xa2f   :  { %4774 = vmatpush1.bf16.msra.mxu0 %v7311_v55  ;;  %4806 = vmatpush1.bf16.msra.mxu1 %v7312_v15 }
 0xa30   :  { %4776 = vmatprep.subr.bf16.mxu0 %v7313_v6  ;;  %4808 = vmatprep.subr.bf16.mxu1 %v7314_v27 }
 0xa31   :  { %2760 = vmatprep.mubr.f32.mxu0 %v7079_v44  ;;  %2831 = vmatprep.mubr.f32.mxu1 %v7079_v44 }
 0xa33   :  { %4778 = vmatpush1.bf16.msra.mxu0 %v7315_v47  ;;  %4810 = vmatpush1.bf16.msra.mxu1 %v7316_v20 }
 0xa34   :  { %4780 = vmatprep.subr.bf16.mxu0 %v7317_v38  ;;  %4812 = vmatprep.subr.bf16.mxu1 %v7318_v5  ;;  %v7329_v5 = vld [vmem:[#allocation30_spill] sm:$0xff] }
 0xa37   :  { %4782 = vmatpush1.bf16.msra.mxu0 %v7319_v31  ;;  %4814 = vmatpush1.bf16.msra.mxu1 %v7320_v13  ;;  %v7330_v31 = vld [vmem:[#allocation31_spill] sm:$0xff]  ;;  %v7331_v13 = vld [vmem:[#allocation32_spill] sm:$0xff] }
 0xa38   :  { %4784 = vmatprep.subr.bf16.mxu0 %v7321_v52  ;;  %4816 = vmatprep.subr.bf16.mxu1 %v7322_v39  ;;  %v7332_v52 = vld [vmem:[#allocation33_spill] sm:$0xff]  ;;  %v7333_v39 = vld [vmem:[#allocation34_spill] sm:$0xff] }
 0xa3b   :  { %4786 = vmatpush1.bf16.msra.mxu0 %v7323_v34  ;;  %4818 = vmatpush1.bf16.msra.mxu1 %v7324_v1  ;;  %v7334_v34 = vld [vmem:[#allocation35_spill] sm:$0xff]  ;;  %v7335_v1 = vld [vmem:[#allocation36_spill] sm:$0xff] }
 0xa3c   :  { %4788 = vmatprep.subr.bf16.mxu0 %v7325_v48  ;;  %4820 = vmatprep.subr.bf16.mxu1 %v7326_v36  ;;  %v7336_v48 = vld [vmem:[#allocation37_spill] sm:$0xff]  ;;  %v7337_v36 = vld [vmem:[#allocation38_spill] sm:$0xff] }
 0xa3f   :  { %4790 = vmatpush1.bf16.msra.mxu0 %v7327_v26  ;;  %4822 = vmatpush1.bf16.msra.mxu1 %v7328_v43  ;;  %v7338_v26 = vld [vmem:[#allocation39_spill] sm:$0xff]  ;;  %v7339_v43 = vld [vmem:[#allocation40_spill] sm:$0xff] }
 0xa40   :  { %4792 = vmatprep.subr.bf16.mxu0 %v7329_v5  ;;  %4824 = vmatprep.subr.bf16.mxu1 %v7330_v31  ;;  %v7340_v5 = vld [vmem:[#allocation41_spill] sm:$0xff]  ;;  %v7341_v31 = vld [vmem:[#allocation50_spill] sm:$0xff] }
 0xa43   :  { %4794 = vmatpush1.bf16.msra.mxu0 %v7331_v13  ;;  %4826 = vmatpush1.bf16.msra.mxu1 %v7332_v52  ;;  %v7342_v13 = vld [vmem:[#allocation51_spill] sm:$0xff]  ;;  %v7343_v52 = vld [vmem:[#allocation45_spill] sm:$0xff] }
 0xa44   :  { %4796 = vmatprep.subr.bf16.mxu0 %v7333_v39  ;;  %4828 = vmatprep.subr.bf16.mxu1 %v7334_v34  ;;  %v2531_v39 = vrot.slane %v7343_v52, 2 }
 0xa47   :  { %4798 = vmatpush1.bf16.msra.mxu0 %v7335_v1  ;;  %4830 = vmatpush1.bf16.msra.mxu1 %v7336_v48  ;;  %v2532_v1 = vrot.slane %v7281_v51, 2 }
 0xa48   :  { %4800 = vmatprep.subr.bf16.mxu0 %v7337_v36  ;;  %4832 = vmatprep.subr.bf16.mxu1 %v7338_v26  ;;  %v2534_v36 = vrot.slane %v7282_v18, 2 }
 0xa4b   :  { %4802 = vmatpush1.bf16.msra.mxu0 %v7339_v43  ;;  %4834 = vmatpush1.bf16.msra.mxu1 %v7340_v5 }
 0xa4c   :  { %4836 = vmatprep.subr.bf16.mxu0 %v7341_v31  ;;  %4868 = vmatprep.subr.bf16.mxu1 %v7342_v13  ;;  %v2533_v31 = vrot.slane %v7283_v32, 2 }
 0xb01   :  { %v2605_v38 = vpop.f32.mrb[20].mxu0  ;;  %v2676_v34 = vpop.f32.mrb[20].mxu1 }
 0xb02   :  { %v2606_v20 = vadd.f32 %v2605_v38, %v2531_v39  ;;  %v2607_v48 = vpop.f32.mrb[21].mxu0  ;;  %v2678_v47 = vpop.f32.mrb[21].mxu1  ;;  %v2677_v5 = vadd.f32 %v2676_v34, %v2533_v31  ;;  %v7353_v34 = vld [vmem:[#allocation66_spill] sm:$0xff] }
 0xb03   :  { %v2608_v26 = vadd.f32 %v2607_v48, %v2532_v1  ;;  %v2679_v43 = vadd.f32 %v2678_v47, %v2534_v36  ;;  %v7354_v36 = vld [vmem:[#allocation67_spill] sm:$0xff] }
 0xb04   :  { %5383 = vtanh.f32 %v2606_v20 }
 0xb05   :  { %5385 = vtanh.f32 %v2608_v26  ;;  %v7355_v26 = vld [vmem:[#allocation68_spill] sm:$0xff] }
 0xb06   :  { %5387 = vtanh.f32 %v2679_v43  ;;  %v7356_v43 = vld [vmem:[#allocation69_spill] sm:$0xff] }
 0xb07   :  { %5389 = vtanh.f32 %v2677_v5  ;;  %v7350_v5 = vld [vmem:[#allocation63_spill] sm:$0xff] }
 0xb0e   :  { %v5384_v13 = vpop.eup %5383 }
 0xb0f   :  { %v2685_v27 = vmul.f32 0.5, %v5384_v13  ;;  %v5386_v52 = vpop.eup %5385  ;;  %v7351_v13 = vld [vmem:[#allocation64_spill] sm:$0xff] }
 0xb10   :  { %v2686_v15 = vmul.f32 0.5, %v5386_v52  ;;  %v5388_v51 = vpop.eup %5387  ;;  %v7352_v52 = vld [vmem:[#allocation65_spill] sm:$0xff] }
 0xb11   :  { %v2688_v6 = vadd.f32 0.5, %v2685_v27  ;;  %v5390_v47 = vpop.eup %5389  ;;  %v7349_v27 = vld [vmem:[#allocation62_spill] sm:$0xff] }
 0xb12   :  { %v2689_v38 = vadd.f32 0.5, %v2686_v15  ;;  %v2687_v20 = vmul.f32 0.5, %v5390_v47  ;;  %v7347_v15 = vld [vmem:[#allocation60_spill] sm:$0xff] }
 0xb13   :  { %v2692_v39 = vmul.f32 %v5388_v51, %v2688_v6  ;;  %v7345_v51 = vld [vmem:[#allocation58_spill] sm:$0xff]  ;;  %v7348_v6 = vld [vmem:[#allocation61_spill] sm:$0xff]  ;;  %v7359_v47 = vld [vmem:[#allocation72_spill] sm:$0xff] }
 0xb14   :  { %v2691_v18 = vmul.f32 %v2689_v38, %v6411_v12  ;;  %v2690_v1 = vadd.f32 0.5, %v2687_v20  ;;  %v7344_v12 = vld [vmem:[#allocation57_spill] sm:$0xff]  ;;  %v7357_v38 = vld [vmem:[#allocation70_spill] sm:$0xff] }
 0xb15   :  { %v7360_v20 = vld [vmem:[#allocation73_spill] sm:$0xff] }
 0xb16   :  { %v6535_v55 = vadd.f32 %v2692_v39, %v2691_v18  ;;  %v7346_v18 = vld [vmem:[#allocation59_spill] sm:$0xff] }
 0xb17   :  { %v7358_v39 = vld [vmem:[#allocation71_spill] sm:$0xff] }
 0xb18   :  { %5391 = vtanh.f32 %v6535_v55 }
 0xb22   :  { %v5392_v48 = vpop.eup %5391 }
 0xb23   :  { %v6538_v31 = vmul.f32 %v5392_v48, %v2690_v1  ;;  %v7361_v1 = vld [vmem:[#allocation74_spill] sm:$0xff]  ;;  %v7362_v48 = vld [vmem:[#allocation75_spill] sm:$0xff] }
 0xb25   :  { %2761 = vmatmul.mubr.f32.vlgmr.msra.gmra.mrb[18].mxu0 %v6538_v31  ;;  %2832 = vmatmul.mubr.f32.vlgmr.msra.gmra.mrb[18].mxu1 %v6538_v31 }
 0xb26   :  { %4838 = vmatpush1.bf16.msra.mxu0 %v7156_v60  ;;  %4870 = vmatpush1.bf16.msra.mxu1 %v7157_v59 }
 0xb27   :  { %4840 = vmatprep.subr.bf16.mxu0 %v7158_v35  ;;  %4872 = vmatprep.subr.bf16.mxu1 %v7220_v19 }
 0xb28   :  { %2917 = vmatprep.mubr.f32.mxu0 %v7079_v44  ;;  %2988 = vmatprep.mubr.f32.mxu1 %v7079_v44 }
 0xb2a   :  { %4842 = vmatpush1.bf16.msra.mxu0 %v7221_v23  ;;  %4874 = vmatpush1.bf16.msra.mxu1 %v7344_v12 }
 0xb2b   :  { %4844 = vmatprep.subr.bf16.mxu0 %v7345_v51  ;;  %4876 = vmatprep.subr.bf16.mxu1 %v7346_v18 }
 0xb2e   :  { %4846 = vmatpush1.bf16.msra.mxu0 %v7347_v15  ;;  %4878 = vmatpush1.bf16.msra.mxu1 %v7348_v6 }
 0xb2f   :  { %4848 = vmatprep.subr.bf16.mxu0 %v7349_v27  ;;  %4880 = vmatprep.subr.bf16.mxu1 %v7350_v5 }
 0xb32   :  { %4850 = vmatpush1.bf16.msra.mxu0 %v7351_v13  ;;  %4882 = vmatpush1.bf16.msra.mxu1 %v7352_v52  ;;  %v7363_v52 = vld [vmem:[#allocation76_spill] sm:$0xff] }
 0xb33   :  { %4852 = vmatprep.subr.bf16.mxu0 %v7353_v34  ;;  %4884 = vmatprep.subr.bf16.mxu1 %v7354_v36  ;;  %v7364_v34 = vld [vmem:[#allocation77_spill] sm:$0xff]  ;;  %v7365_v36 = vld [vmem:[#allocation78_spill] sm:$0xff]  ;;  %v7371_v13 = vld [vmem:[#allocation84_spill] sm:$0xff] }
 0xb36   :  { %4854 = vmatpush1.bf16.msra.mxu0 %v7355_v26  ;;  %4886 = vmatpush1.bf16.msra.mxu1 %v7356_v43  ;;  %v7366_v26 = vld [vmem:[#allocation79_spill] sm:$0xff]  ;;  %v7367_v43 = vld [vmem:[#allocation80_spill] sm:$0xff] }
 0xb37   :  { %4856 = vmatprep.subr.bf16.mxu0 %v7357_v38  ;;  %4888 = vmatprep.subr.bf16.mxu1 %v7358_v39  ;;  %v7368_v38 = vld [vmem:[#allocation81_spill] sm:$0xff]  ;;  %v7369_v39 = vld [vmem:[#allocation82_spill] sm:$0xff] }
 0xb3a   :  { %4858 = vmatpush1.bf16.msra.mxu0 %v7359_v47  ;;  %4890 = vmatpush1.bf16.msra.mxu1 %v7360_v20  ;;  %v7370_v47 = vld [vmem:[#allocation83_spill] sm:$0xff] }
 0xb3b   :  { %4860 = vmatprep.subr.bf16.mxu0 %v7361_v1  ;;  %4892 = vmatprep.subr.bf16.mxu1 %v7362_v48 }
 0xb3e   :  { %4862 = vmatpush1.bf16.msra.mxu0 %v7363_v52  ;;  %4894 = vmatpush1.bf16.msra.mxu1 %v7364_v34 }
 0xb3f   :  { %4864 = vmatprep.subr.bf16.mxu0 %v7365_v36  ;;  %4896 = vmatprep.subr.bf16.mxu1 %v7366_v26 }
 0xb42   :  { %4866 = vmatpush1.bf16.msra.mxu0 %v7367_v43  ;;  %4898 = vmatpush1.bf16.msra.mxu1 %v7368_v38 }
 0xb43   :  { %4900 = vmatprep.subr.bf16.mxu0 %v7369_v39  ;;  %4932 = vmatprep.subr.bf16.mxu1 %v7370_v47 }
 0xbf8   :  { %v2762_v20 = vpop.f32.mrb[18].mxu0  ;;  %v2833_v1 = vpop.f32.mrb[18].mxu1 }
 0xbf9   :  { %v5235_v48 = vadd.f32 %v2762_v20, %v7371_v13  ;;  %v2764_v5 = vpop.f32.mrb[19].mxu0  ;;  %v2835_v52 = vpop.f32.mrb[19].mxu1  ;;  %v5237_v43 = vadd.f32 %v2833_v1, %v7126_v57 }
 0xbfa   :  { %v5236_v34 = vadd.f32 %v2764_v5, %v7124_v30  ;;  %v5238_v36 = vadd.f32 %v2835_v52, %v7125_v4 }
 0xbfb   :  { %5393 = vtanh.f32 %v5235_v48  ;;  %v7383_v48 = vld [vmem:[#allocation23_spill] sm:$0xff] }
 0xbfc   :  { %5395 = vtanh.f32 %v5236_v34 }
 0xbfd   :  { %5397 = vtanh.f32 %v5238_v36 }
 0xbfe   :  { %5399 = vtanh.f32 %v5237_v43  ;;  %v7378_v43 = vld [vmem:[#allocation18_spill] sm:$0xff] }
 0xc05   :  { %v5394_v38 = vpop.eup %5393 }
 0xc06   :  { %v2842_v26 = vmul.f32 0.5, %v5394_v38  ;;  %v5396_v39 = vpop.eup %5395  ;;  %v7379_v38 = vld [vmem:[#allocation19_spill] sm:$0xff] }
 0xc07   :  { %v2843_v47 = vmul.f32 0.5, %v5396_v39  ;;  %v5398_v6 = vpop.eup %5397  ;;  %v7381_v39 = vld [vmem:[#allocation21_spill] sm:$0xff] }
 0xc08   :  { %v2845_v27 = vadd.f32 0.5, %v2842_v26  ;;  %v5400_v5 = vpop.eup %5399  ;;  %v7377_v26 = vld [vmem:[#allocation17_spill] sm:$0xff] }
 0xc09   :  { %v2846_v15 = vadd.f32 0.5, %v2843_v47  ;;  %v2844_v52 = vmul.f32 0.5, %v5400_v5  ;;  %v7382_v47 = vld [vmem:[#allocation22_spill] sm:$0xff]  ;;  %v7385_v5 = vld [vmem:[#allocation25_spill] sm:$0xff] }
 0xc0a   :  { %v2849_v20 = vmul.f32 %v5398_v6, %v2845_v27  ;;  %v7374_v6 = vld [vmem:[#allocation14_spill] sm:$0xff]  ;;  %v7375_v27 = vld [vmem:[#allocation15_spill] sm:$0xff] }
 0xc0b   :  { %v2848_v13 = vmul.f32 %v2846_v15, %v6457_v24  ;;  %v2847_v34 = vadd.f32 0.5, %v2844_v52  ;;  %v7372_v24 = vld [vmem:[#allocation12_spill] sm:$0xff]  ;;  %v7373_v15 = vld [vmem:[#allocation13_spill] sm:$0xff]  ;;  %v7386_v52 = vld [vmem:[#allocation26_spill] sm:$0xff] }
 0xc0d   :  { %v6581_v18 = vadd.f32 %v2849_v20, %v2848_v13  ;;  %v7376_v13 = vld [vmem:[#allocation16_spill] sm:$0xff] }
 0xc0e   :  { %v7384_v20 = vld [vmem:[#allocation24_spill] sm:$0xff] }
 0xc0f   :  { %5401 = vtanh.f32 %v6581_v18 }
 0xc19   :  { %v5402_v36 = vpop.eup %5401 }
 0xc1a   :  { %v2852_v1 = vmul.f32 %v5402_v36, %v2847_v34  ;;  %v7387_v34 = vld [vmem:[#allocation27_spill] sm:$0xff]  ;;  %v7388_v36 = vld [vmem:[#allocation28_spill] sm:$0xff] }
 0xc1c   :  { %2918 = vmatmul.mubr.f32.vlgmr.msra.gmra.mrb[22].mxu0 %v2852_v1  ;;  %2989 = vmatmul.mubr.f32.vlgmr.msra.gmra.mrb[22].mxu1 %v2852_v1  ;;  %v7389_v1 = vld [vmem:[#allocation29_spill] sm:$0xff] }
 0xc1d   :  { %4902 = vmatpush1.bf16.msra.mxu0 %v5904_v37  ;;  %4934 = vmatpush1.bf16.msra.mxu1 %v7128_v50 }
 0xc1e   :  { %4904 = vmatprep.subr.bf16.mxu0 %v7129_v0  ;;  %4936 = vmatprep.subr.bf16.mxu1 %v7130_v45 }
 0xc1f   :  { %3067 = vmatprep.mubr.f32.mxu0 %v7079_v44  ;;  %3138 = vmatprep.mubr.f32.mxu1 %v7079_v44 }
 0xc21   :  { %4906 = vmatpush1.bf16.msra.mxu0 %v7131_v25  ;;  %4938 = vmatpush1.bf16.msra.mxu1 %v7132_v61 }
 0xc22   :  { %4908 = vmatprep.subr.bf16.mxu0 %v7133_v40  ;;  %4940 = vmatprep.subr.bf16.mxu1 %v7134_v54 }
 0xc25   :  { %4910 = vmatpush1.bf16.msra.mxu0 %v7135_v16  ;;  %4942 = vmatpush1.bf16.msra.mxu1 %v7136_v21 }
 0xc26   :  { %4912 = vmatprep.subr.bf16.mxu0 %v7137_v29  ;;  %4944 = vmatprep.subr.bf16.mxu1 %v7138_v3 }
 0xc29   :  { %4914 = vmatpush1.bf16.msra.mxu0 %v7139_v62  ;;  %4946 = vmatpush1.bf16.msra.mxu1 %v7140_v33 }
 0xc2a   :  { %4916 = vmatprep.subr.bf16.mxu0 %v7141_v46  ;;  %4948 = vmatprep.subr.bf16.mxu1 %v7142_v28 }
 0xc2d   :  { %4918 = vmatpush1.bf16.msra.mxu0 %v7143_v56  ;;  %4950 = vmatpush1.bf16.msra.mxu1 %v7144_v14 }
 0xc2e   :  { %4920 = vmatprep.subr.bf16.mxu0 %v5958_v17  ;;  %4952 = vmatprep.subr.bf16.mxu1 %v5960_v41 }
 0xc31   :  { %4922 = vmatpush1.bf16.msra.mxu0 %v5964_v42  ;;  %4954 = vmatpush1.bf16.msra.mxu1 %v5966_v58 }
 0xc32   :  { %4924 = vmatprep.subr.bf16.mxu0 %v5970_v9  ;;  %4956 = vmatprep.subr.bf16.mxu1 %v5972_v63 }
 0xc35   :  { %4926 = vmatpush1.bf16.msra.mxu0 %v5976_v53  ;;  %4958 = vmatpush1.bf16.msra.mxu1 %v5978_v2 }
 0xc36   :  { %4928 = vmatprep.subr.bf16.mxu0 %v5982_v10  ;;  %4960 = vmatprep.subr.bf16.mxu1 %v5984_v49 }
 0xc39   :  { %4930 = vmatpush1.bf16.msra.mxu0 %v5988_v8  ;;  %4962 = vmatpush1.bf16.msra.mxu1 %v5990_v22 }
 0xc3a   :  { %4964 = vmatprep.subr.bf16.mxu0 %v5631_v7  ;;  %4996 = vmatprep.subr.bf16.mxu1 %v5633_v11 }
 0xc3c   :  { %3068 = vmatmul.mubr.f32.vlgmr.msra.gmra.mrb[24].mxu0 %v6538_v31  ;;  %3139 = vmatmul.mubr.f32.vlgmr.msra.gmra.mrb[24].mxu1 %v6538_v31  ;;  %v7380_v31 = vld [vmem:[#allocation20_spill] sm:$0xff] }
 0xc3d   :  { %4966 = vmatpush1.bf16.msra.mxu0 %v7372_v24  ;;  %4998 = vmatpush1.bf16.msra.mxu1 %v7373_v15 }
 0xc3e   :  { %4968 = vmatprep.subr.bf16.mxu0 %v7374_v6  ;;  %5000 = vmatprep.subr.bf16.mxu1 %v7375_v27  ;;  %v7406_v27 = vld [vmem:[#allocation48_spill] sm:$0xff] }
 0xc3f   :  { %3224 = vmatprep.mubr.f32.mxu0 %v7079_v44  ;;  %3295 = vmatprep.mubr.f32.mxu1 %v7079_v44 }
 0xc41   :  { %4970 = vmatpush1.bf16.msra.mxu0 %v7376_v13  ;;  %5002 = vmatpush1.bf16.msra.mxu1 %v7377_v26  ;;  %v7405_v26 = vld [vmem:[#allocation46_spill] sm:$0xff] }
 0xc42   :  { %4972 = vmatprep.subr.bf16.mxu0 %v7378_v43  ;;  %5004 = vmatprep.subr.bf16.mxu1 %v7379_v38  ;;  %v7390_v38 = vld [vmem:[#allocation30_spill] sm:$0xff] }
 0xc45   :  { %4974 = vmatpush1.bf16.msra.mxu0 %v7380_v31  ;;  %5006 = vmatpush1.bf16.msra.mxu1 %v7381_v39  ;;  %v7391_v31 = vld [vmem:[#allocation31_spill] sm:$0xff]  ;;  %v7392_v39 = vld [vmem:[#allocation32_spill] sm:$0xff] }
 0xc46   :  { %4976 = vmatprep.subr.bf16.mxu0 %v7382_v47  ;;  %5008 = vmatprep.subr.bf16.mxu1 %v7383_v48  ;;  %v7393_v47 = vld [vmem:[#allocation33_spill] sm:$0xff]  ;;  %v7394_v48 = vld [vmem:[#allocation34_spill] sm:$0xff] }
 0xc49   :  { %4978 = vmatpush1.bf16.msra.mxu0 %v7384_v20  ;;  %5010 = vmatpush1.bf16.msra.mxu1 %v7385_v5  ;;  %v7395_v20 = vld [vmem:[#allocation35_spill] sm:$0xff]  ;;  %v7396_v5 = vld [vmem:[#allocation36_spill] sm:$0xff] }
 0xc4a   :  { %4980 = vmatprep.subr.bf16.mxu0 %v7386_v52  ;;  %5012 = vmatprep.subr.bf16.mxu1 %v7387_v34  ;;  %v7397_v52 = vld [vmem:[#allocation37_spill] sm:$0xff]  ;;  %v7398_v34 = vld [vmem:[#allocation38_spill] sm:$0xff] }
 0xc4d   :  { %4982 = vmatpush1.bf16.msra.mxu0 %v7388_v36  ;;  %5014 = vmatpush1.bf16.msra.mxu1 %v7389_v1  ;;  %v7399_v36 = vld [vmem:[#allocation39_spill] sm:$0xff]  ;;  %v7400_v1 = vld [vmem:[#allocation40_spill] sm:$0xff] }
 0xc4e   :  { %4984 = vmatprep.subr.bf16.mxu0 %v7390_v38  ;;  %5016 = vmatprep.subr.bf16.mxu1 %v7391_v31  ;;  %v7401_v38 = vld [vmem:[#allocation41_spill] sm:$0xff]  ;;  %v7402_v31 = vld [vmem:[#allocation50_spill] sm:$0xff] }
 0xc51   :  { %4986 = vmatpush1.bf16.msra.mxu0 %v7392_v39  ;;  %5018 = vmatpush1.bf16.msra.mxu1 %v7393_v47  ;;  %v7403_v39 = vld [vmem:[#allocation51_spill] sm:$0xff]  ;;  %v7404_v47 = vld [vmem:[#allocation45_spill] sm:$0xff] }
 0xc52   :  { %4988 = vmatprep.subr.bf16.mxu0 %v7394_v48  ;;  %5020 = vmatprep.subr.bf16.mxu1 %v7395_v20  ;;  %v2995_v48 = vrot.slane %v7404_v47, 4 }
 0xc55   :  { %4990 = vmatpush1.bf16.msra.mxu0 %v7396_v5  ;;  %5022 = vmatpush1.bf16.msra.mxu1 %v7397_v52  ;;  %v2996_v5 = vrot.slane %v7405_v26, 4 }
 0xc56   :  { %4992 = vmatprep.subr.bf16.mxu0 %v7398_v34  ;;  %5024 = vmatprep.subr.bf16.mxu1 %v7399_v36  ;;  %v2998_v34 = vrot.slane %v7406_v27, 4 }
 0xc59   :  { %4994 = vmatpush1.bf16.msra.mxu0 %v7400_v1  ;;  %5026 = vmatpush1.bf16.msra.mxu1 %v7401_v38 }
 0xc5a   :  { %5028 = vmatprep.subr.bf16.mxu0 %v7402_v31  ;;  %5060 = vmatprep.subr.bf16.mxu1 %v7403_v39  ;;  %v2997_v31 = vrot.slane %v7283_v32, 4 }
 0xd0f   :  { %v3069_v43 = vpop.f32.mrb[24].mxu0  ;;  %v3140_v20 = vpop.f32.mrb[24].mxu1 }
 0xd10   :  { %v3070_v13 = vadd.f32 %v3069_v43, %v2995_v48  ;;  %v3071_v52 = vpop.f32.mrb[25].mxu0  ;;  %v3142_v6 = vpop.f32.mrb[25].mxu1  ;;  %v3141_v38 = vadd.f32 %v3140_v20, %v2997_v31  ;;  %v7425_v31 = vld [vmem:[#allocation77_spill] sm:$0xff] }
 0xd11   :  { %v3072_v36 = vadd.f32 %v3071_v52, %v2996_v5  ;;  %v3143_v1 = vadd.f32 %v3142_v6, %v2998_v34  ;;  %v7422_v34 = vld [vmem:[#allocation74_spill] sm:$0xff] }
 0xd12   :  { %5403 = vtanh.f32 %v3070_v13 }
 0xd13   :  { %5405 = vtanh.f32 %v3072_v36  ;;  %v7423_v36 = vld [vmem:[#allocation75_spill] sm:$0xff] }
 0xd14   :  { %5407 = vtanh.f32 %v3143_v1  ;;  %v7424_v1 = vld [vmem:[#allocation76_spill] sm:$0xff] }
 0xd15   :  { %5409 = vtanh.f32 %v3141_v38  ;;  %v7420_v38 = vld [vmem:[#allocation72_spill] sm:$0xff] }
 0xd1c   :  { %v5404_v39 = vpop.eup %5403 }
 0xd1d   :  { %v3149_v15 = vmul.f32 0.5, %v5404_v39  ;;  %v5406_v47 = vpop.eup %5405  ;;  %v7426_v39 = vld [vmem:[#allocation78_spill] sm:$0xff] }
 0xd1e   :  { %v3150_v11 = vmul.f32 0.5, %v5406_v47  ;;  %v5408_v26 = vpop.eup %5407  ;;  %v7421_v47 = vld [vmem:[#allocation73_spill] sm:$0xff] }
 0xd1f   :  { %v3152_v24 = vadd.f32 0.5, %v3149_v15  ;;  %v5410_v6 = vpop.eup %5409  ;;  %v7414_v15 = vld [vmem:[#allocation66_spill] sm:$0xff] }
 0xd20   :  { %v3153_v43 = vadd.f32 0.5, %v3150_v11  ;;  %v3151_v13 = vmul.f32 0.5, %v5410_v6  ;;  %v7407_v11 = vld [vmem:[#allocation59_spill] sm:$0xff]  ;;  %v7429_v6 = vld [vmem:[#allocation81_spill] sm:$0xff] }
 0xd21   :  { %v3156_v48 = vmul.f32 %v5408_v26, %v3152_v24  ;;  %v7413_v24 = vld [vmem:[#allocation65_spill] sm:$0xff]  ;;  %v7419_v26 = vld [vmem:[#allocation71_spill] sm:$0xff] }
 0xd22   :  { %v3155_v27 = vmul.f32 %v3153_v43, %v6535_v55  ;;  %v3154_v5 = vadd.f32 0.5, %v3151_v13  ;;  %v7408_v55 = vld [vmem:[#allocation60_spill] sm:$0xff]  ;;  %v7427_v43 = vld [vmem:[#allocation79_spill] sm:$0xff]  ;;  %v7430_v13 = vld [vmem:[#allocation82_spill] sm:$0xff] }
 0xd24   :  { %v6659_v7 = vadd.f32 %v3156_v48, %v3155_v27  ;;  %v7418_v27 = vld [vmem:[#allocation70_spill] sm:$0xff]  ;;  %v7428_v48 = vld [vmem:[#allocation80_spill] sm:$0xff] }
 0xd26   :  { %5411 = vtanh.f32 %v6659_v7 }
 0xd30   :  { %v5412_v52 = vpop.eup %5411 }
 0xd31   :  { %v6662_v20 = vmul.f32 %v5412_v52, %v3154_v5  ;;  %v7431_v5 = vld [vmem:[#allocation83_spill] sm:$0xff] }
 0xd33   :  { %3225 = vmatmul.mubr.f32.vlgmr.msra.gmra.mrb[22].mxu0 %v6662_v20  ;;  %3296 = vmatmul.mubr.f32.vlgmr.msra.gmra.mrb[22].mxu1 %v6662_v20 }
 0xd34   :  { %5030 = vmatpush1.bf16.msra.mxu0 %v7156_v60  ;;  %5062 = vmatpush1.bf16.msra.mxu1 %v7157_v59  ;;  %v7409_v60 = vld [vmem:[#allocation61_spill] sm:$0xff]  ;;  %v7410_v59 = vld [vmem:[#allocation62_spill] sm:$0xff] }
 0xd35   :  { %5032 = vmatprep.subr.bf16.mxu0 %v7158_v35  ;;  %5064 = vmatprep.subr.bf16.mxu1 %v7220_v19  ;;  %v7411_v35 = vld [vmem:[#allocation63_spill] sm:$0xff]  ;;  %v7412_v19 = vld [vmem:[#allocation64_spill] sm:$0xff] }
 0xd36   :  { %3381 = vmatprep.mubr.f32.mxu0 %v7079_v44  ;;  %3452 = vmatprep.mubr.f32.mxu1 %v7079_v44 }
 0xd38   :  { %5034 = vmatpush1.bf16.msra.mxu0 %v7221_v23  ;;  %5066 = vmatpush1.bf16.msra.mxu1 %v7344_v12  ;;  %v7415_v23 = vld [vmem:[#allocation67_spill] sm:$0xff]  ;;  %v7416_v12 = vld [vmem:[#allocation68_spill] sm:$0xff] }
 0xd39   :  { %5036 = vmatprep.subr.bf16.mxu0 %v7345_v51  ;;  %5068 = vmatprep.subr.bf16.mxu1 %v7407_v11  ;;  %v7417_v51 = vld [vmem:[#allocation69_spill] sm:$0xff] }
 0xd3c   :  { %5038 = vmatpush1.bf16.msra.mxu0 %v7408_v55  ;;  %5070 = vmatpush1.bf16.msra.mxu1 %v7409_v60  ;;  %v7432_v55 = vld [vmem:[#allocation84_spill] sm:$0xff] }
 0xd3d   :  { %5040 = vmatprep.subr.bf16.mxu0 %v7410_v59  ;;  %5072 = vmatprep.subr.bf16.mxu1 %v7411_v35 }
 0xd40   :  { %5042 = vmatpush1.bf16.msra.mxu0 %v7412_v19  ;;  %5074 = vmatpush1.bf16.msra.mxu1 %v7413_v24 }
 0xd41   :  { %5044 = vmatprep.subr.bf16.mxu0 %v7414_v15  ;;  %5076 = vmatprep.subr.bf16.mxu1 %v7415_v23 }
 0xd44   :  { %5046 = vmatpush1.bf16.msra.mxu0 %v7416_v12  ;;  %5078 = vmatpush1.bf16.msra.mxu1 %v7417_v51 }
 0xd45   :  { %5048 = vmatprep.subr.bf16.mxu0 %v7418_v27  ;;  %5080 = vmatprep.subr.bf16.mxu1 %v7419_v26 }
 0xd48   :  { %5050 = vmatpush1.bf16.msra.mxu0 %v7420_v38  ;;  %5082 = vmatpush1.bf16.msra.mxu1 %v7421_v47 }
 0xd49   :  { %5052 = vmatprep.subr.bf16.mxu0 %v7422_v34  ;;  %5084 = vmatprep.subr.bf16.mxu1 %v7423_v36 }
 0xd4c   :  { %5054 = vmatpush1.bf16.msra.mxu0 %v7424_v1  ;;  %5086 = vmatpush1.bf16.msra.mxu1 %v7425_v31 }
 0xd4d   :  { %5056 = vmatprep.subr.bf16.mxu0 %v7426_v39  ;;  %5088 = vmatprep.subr.bf16.mxu1 %v7427_v43 }
 0xd50   :  { %5058 = vmatpush1.bf16.msra.mxu0 %v7428_v48  ;;  %5090 = vmatpush1.bf16.msra.mxu1 %v7429_v6 }
 0xd51   :  { %5092 = vmatprep.subr.bf16.mxu0 %v7430_v13  ;;  %5124 = vmatprep.subr.bf16.mxu1 %v7431_v5 }
 0xe06   :  { %v3226_v52 = vpop.f32.mrb[22].mxu0  ;;  %v3297_v11 = vpop.f32.mrb[22].mxu1 }
 0xe07   :  { %v5239_v60 = vadd.f32 %v3226_v52, %v7432_v55  ;;  %v3228_v59 = vpop.f32.mrb[23].mxu0  ;;  %v3299_v35 = vpop.f32.mrb[23].mxu1  ;;  %v5241_v15 = vadd.f32 %v3297_v11, %v7126_v57  ;;  %v7466_v11 = vld [vmem:[#allocation46_spill] sm:$0xff] }
 0xe08   :  { %v5240_v19 = vadd.f32 %v3228_v59, %v7124_v30  ;;  %v5242_v24 = vadd.f32 %v3299_v35, %v7125_v4 }
 0xe09   :  { %5413 = vtanh.f32 %v5239_v60  ;;  %v3460_v60 = vrot.slane %v7466_v11, 6 }
 0xe0a   :  { %5415 = vtanh.f32 %v5240_v19  ;;  %v7467_v19 = vld [vmem:[#allocation48_spill] sm:$0xff] }
 0xe0b   :  { %5417 = vtanh.f32 %v5242_v24  ;;  %v3462_v24 = vrot.slane %v7467_v19, 6 }
 0xe0c   :  { %5419 = vtanh.f32 %v5241_v15 }
 0xe13   :  { %v5414_v23 = vpop.eup %5413 }
 0xe14   :  { %v3306_v12 = vmul.f32 0.5, %v5414_v23  ;;  %v5416_v51 = vpop.eup %5415 }
 0xe15   :  { %v3307_v26 = vmul.f32 0.5, %v5416_v51  ;;  %v5418_v38 = vpop.eup %5417  ;;  %v3461_v51 = vrot.slane %v7283_v32, 6 }
 0xe16   :  { %v3309_v27 = vadd.f32 0.5, %v3306_v12  ;;  %v5420_v31 = vpop.eup %5419 }
 0xe17   :  { %v3310_v47 = vadd.f32 0.5, %v3307_v26  ;;  %v3308_v39 = vmul.f32 0.5, %v5420_v31 }
 0xe18   :  { %v3313_v34 = vmul.f32 %v5418_v38, %v3309_v27 }
 0xe19   :  { %v3312_v36 = vmul.f32 %v3310_v47, %v6581_v18  ;;  %v3311_v43 = vadd.f32 0.5, %v3308_v39  ;;  %v7464_v18 = vld [vmem:[#allocation41_spill] sm:$0xff] }
 0xe1b   :  { %v6705_v1 = vadd.f32 %v3313_v34, %v3312_v36 }
 0xe1d   :  { %5421 = vtanh.f32 %v6705_v1 }
 0xe27   :  { %v5422_v48 = vpop.eup %5421 }
 0xe28   :  { %v3316_v6 = vmul.f32 %v5422_v48, %v3311_v43 }
 0xe2a   :  { %3382 = vmatmul.mubr.f32.vlgmr.msra.gmra.mrb[26].mxu0 %v3316_v6  ;;  %3453 = vmatmul.mubr.f32.vlgmr.msra.gmra.mrb[26].mxu1 %v3316_v6 }
 0xe2b   :  { %5094 = vmatpush1.bf16.msra.mxu0 %v5904_v37  ;;  %5126 = vmatpush1.bf16.msra.mxu1 %v7128_v50  ;;  %v7433_v37 = vld [vmem:[#allocation10_spill] sm:$0xff]  ;;  %v7446_v50 = vld [vmem:[#allocation23_spill] sm:$0xff] }
 0xe2c   :  { %5096 = vmatprep.subr.bf16.mxu0 %v7129_v0  ;;  %5128 = vmatprep.subr.bf16.mxu1 %v7130_v45  ;;  %v7447_v0 = vld [vmem:[#allocation24_spill] sm:$0xff]  ;;  %v7448_v45 = vld [vmem:[#allocation25_spill] sm:$0xff] }
 0xe2d   :  { %3531 = vmatprep.mubr.f32.mxu0 %v7079_v44  ;;  %3602 = vmatprep.mubr.f32.mxu1 %v7079_v44 }
 0xe2f   :  { %5098 = vmatpush1.bf16.msra.mxu0 %v7131_v25  ;;  %5130 = vmatpush1.bf16.msra.mxu1 %v7132_v61  ;;  %v7450_v25 = vld [vmem:[#allocation27_spill] sm:$0xff]  ;;  %v7451_v61 = vld [vmem:[#allocation28_spill] sm:$0xff] }
 0xe30   :  { %5100 = vmatprep.subr.bf16.mxu0 %v7133_v40  ;;  %5132 = vmatprep.subr.bf16.mxu1 %v7134_v54  ;;  %v7452_v40 = vld [vmem:[#allocation29_spill] sm:$0xff]  ;;  %v7453_v54 = vld [vmem:[#allocation30_spill] sm:$0xff] }
 0xe33   :  { %5102 = vmatpush1.bf16.msra.mxu0 %v7135_v16  ;;  %5134 = vmatpush1.bf16.msra.mxu1 %v7136_v21  ;;  %v7454_v16 = vld [vmem:[#allocation31_spill] sm:$0xff]  ;;  %v7455_v21 = vld [vmem:[#allocation32_spill] sm:$0xff] }
 0xe34   :  { %5104 = vmatprep.subr.bf16.mxu0 %v7137_v29  ;;  %5136 = vmatprep.subr.bf16.mxu1 %v7138_v3  ;;  %v7456_v29 = vld [vmem:[#allocation33_spill] sm:$0xff]  ;;  %v7457_v3 = vld [vmem:[#allocation34_spill] sm:$0xff] }
 0xe37   :  { %5106 = vmatpush1.bf16.msra.mxu0 %v7139_v62  ;;  %5138 = vmatpush1.bf16.msra.mxu1 %v7140_v33  ;;  %v7458_v62 = vld [vmem:[#allocation35_spill] sm:$0xff]  ;;  %v7459_v33 = vld [vmem:[#allocation36_spill] sm:$0xff] }
 0xe38   :  { %5108 = vmatprep.subr.bf16.mxu0 %v7141_v46  ;;  %5140 = vmatprep.subr.bf16.mxu1 %v7142_v28  ;;  %v7460_v46 = vld [vmem:[#allocation37_spill] sm:$0xff]  ;;  %v7461_v28 = vld [vmem:[#allocation38_spill] sm:$0xff] }
 0xe3b   :  { %5110 = vmatpush1.bf16.msra.mxu0 %v7143_v56  ;;  %5142 = vmatpush1.bf16.msra.mxu1 %v7144_v14  ;;  %v7462_v56 = vld [vmem:[#allocation39_spill] sm:$0xff]  ;;  %v7463_v14 = vld [vmem:[#allocation40_spill] sm:$0xff] }
 0xe3c   :  { %5112 = vmatprep.subr.bf16.mxu0 %v5958_v17  ;;  %5144 = vmatprep.subr.bf16.mxu1 %v5960_v41  ;;  %v7434_v17 = vld [vmem:[#allocation11_spill] sm:$0xff]  ;;  %v7435_v41 = vld [vmem:[#allocation12_spill] sm:$0xff] }
 0xe3f   :  { %5114 = vmatpush1.bf16.msra.mxu0 %v5964_v42  ;;  %5146 = vmatpush1.bf16.msra.mxu1 %v5966_v58  ;;  %v7436_v42 = vld [vmem:[#allocation13_spill] sm:$0xff]  ;;  %v7437_v58 = vld [vmem:[#allocation14_spill] sm:$0xff] }
 0xe40   :  { %5116 = vmatprep.subr.bf16.mxu0 %v5970_v9  ;;  %5148 = vmatprep.subr.bf16.mxu1 %v5972_v63  ;;  %v7438_v9 = vld [vmem:[#allocation15_spill] sm:$0xff]  ;;  %v7439_v63 = vld [vmem:[#allocation16_spill] sm:$0xff] }
 0xe43   :  { %5118 = vmatpush1.bf16.msra.mxu0 %v5976_v53  ;;  %5150 = vmatpush1.bf16.msra.mxu1 %v5978_v2  ;;  %v7440_v53 = vld [vmem:[#allocation17_spill] sm:$0xff]  ;;  %v7441_v2 = vld [vmem:[#allocation18_spill] sm:$0xff] }
 0xe44   :  { %5120 = vmatprep.subr.bf16.mxu0 %v5982_v10  ;;  %5152 = vmatprep.subr.bf16.mxu1 %v5984_v49  ;;  %v7442_v10 = vld [vmem:[#allocation19_spill] sm:$0xff]  ;;  %v7443_v49 = vld [vmem:[#allocation20_spill] sm:$0xff] }
 0xe47   :  { %5122 = vmatpush1.bf16.msra.mxu0 %v5988_v8  ;;  %5154 = vmatpush1.bf16.msra.mxu1 %v5990_v22  ;;  %v7444_v8 = vld [vmem:[#allocation21_spill] sm:$0xff]  ;;  %v7445_v22 = vld [vmem:[#allocation22_spill] sm:$0xff] }
 0xe48   :  { %5156 = vmatprep.subr.bf16.mxu0 %v7433_v37  ;;  %5188 = vmatprep.subr.bf16.mxu1 %v7434_v17 }
 0xe4a   :  { %3532 = vmatmul.mubr.f32.vlgmr.msra.gmra.mrb[28].mxu0 %v6662_v20  ;;  %3603 = vmatmul.mubr.f32.vlgmr.msra.gmra.mrb[28].mxu1 %v6662_v20  ;;  %v7465_v20 = vld [vmem:[#allocation45_spill] sm:$0xff] }
 0xe4b   :  { %5158 = vmatpush1.bf16.msra.mxu0 %v7435_v41  ;;  %5190 = vmatpush1.bf16.msra.mxu1 %v7436_v42  ;;  %v3459_v13 = vrot.slane %v7465_v20, 6 }
 0xe4c   :  { %5160 = vmatprep.subr.bf16.mxu0 %v7437_v58  ;;  %5192 = vmatprep.subr.bf16.mxu1 %v7438_v9 }
 0xe4d   :  { %3688 = vmatprep.mubr.f32.mxu0 %v7079_v44  ;;  %3759 = vmatprep.mubr.f32.mxu1 %v7079_v44  ;;  %v7449_v44 = vld [vmem:[#allocation26_spill] sm:$0xff] }
 0xe4f   :  { %5162 = vmatpush1.bf16.msra.mxu0 %v7439_v63  ;;  %5194 = vmatpush1.bf16.msra.mxu1 %v7440_v53 }
 0xe50   :  { %5164 = vmatprep.subr.bf16.mxu0 %v7441_v2  ;;  %5196 = vmatprep.subr.bf16.mxu1 %v7442_v10 }
 0xe53   :  { %5166 = vmatpush1.bf16.msra.mxu0 %v7443_v49  ;;  %5198 = vmatpush1.bf16.msra.mxu1 %v7444_v8 }
 0xe54   :  { %5168 = vmatprep.subr.bf16.mxu0 %v7445_v22  ;;  %5200 = vmatprep.subr.bf16.mxu1 %v7446_v50 }
 0xe57   :  { %5170 = vmatpush1.bf16.msra.mxu0 %v7447_v0  ;;  %5202 = vmatpush1.bf16.msra.mxu1 %v7448_v45 }
 0xe58   :  { %5172 = vmatprep.subr.bf16.mxu0 %v7449_v44  ;;  %5204 = vmatprep.subr.bf16.mxu1 %v7450_v25 }
 0xe5b   :  { %5174 = vmatpush1.bf16.msra.mxu0 %v7451_v61  ;;  %5206 = vmatpush1.bf16.msra.mxu1 %v7452_v40 }
 0xe5c   :  { %5176 = vmatprep.subr.bf16.mxu0 %v7453_v54  ;;  %5208 = vmatprep.subr.bf16.mxu1 %v7454_v16 }
 0xe5f   :  { %5178 = vmatpush1.bf16.msra.mxu0 %v7455_v21  ;;  %5210 = vmatpush1.bf16.msra.mxu1 %v7456_v29 }
 0xe60   :  { %5180 = vmatprep.subr.bf16.mxu0 %v7457_v3  ;;  %5212 = vmatprep.subr.bf16.mxu1 %v7458_v62  ;;  %v3810_v62 = vld [vmem:[#allocation2] ss:$0 sm:$0xff] }
 0xe63   :  { %5182 = vmatpush1.bf16.msra.mxu0 %v7459_v33  ;;  %5214 = vmatpush1.bf16.msra.mxu1 %v7460_v46 }
 0xe64   :  { %5184 = vmatprep.subr.bf16.mxu0 %v7461_v28  ;;  %5216 = vmatprep.subr.bf16.mxu1 %v7462_v56 }
 0xe67   :  { %5186 = vmatpush1.bf16.msra.mxu0 %v7463_v14  ;;  %5218 = vmatpush1.bf16.msra.mxu1 %v7464_v18 }
 0xf1d   :  { %v3533_v5 = vpop.f32.mrb[28].mxu0  ;;  %v3604_v52 = vpop.f32.mrb[28].mxu1 }
 0xf1e   :  { %v3534_v59 = vadd.f32 %v3533_v5, %v3459_v13  ;;  %v3535_v35 = vpop.f32.mrb[29].mxu0  ;;  %v3606_v15 = vpop.f32.mrb[29].mxu1  ;;  %v3605_v27 = vadd.f32 %v3604_v52, %v3461_v51 }
 0xf1f   :  { %v3536_v23 = vadd.f32 %v3535_v35, %v3460_v60  ;;  %v3607_v12 = vadd.f32 %v3606_v15, %v3462_v24 }
 0xf20   :  { %5423 = vtanh.f32 %v3534_v59 }
 0xf21   :  { %5425 = vtanh.f32 %v3536_v23 }
 0xf22   :  { %5427 = vtanh.f32 %v3607_v12 }
 0xf23   :  { %5429 = vtanh.f32 %v3605_v27 }
 0xf2a   :  { %v5424_v26 = vpop.eup %5423 }
 0xf2b   :  { %v3613_v38 = vmul.f32 0.5, %v5424_v26  ;;  %v5426_v47 = vpop.eup %5425 }
 0xf2c   :  { %v3614_v36 = vmul.f32 0.5, %v5426_v47  ;;  %v5428_v31 = vpop.eup %5427 }
 0xf2d   :  { %v3616_v34 = vadd.f32 0.5, %v3613_v38  ;;  %v5430_v37 = vpop.eup %5429 }
 0xf2e   :  { %v3617_v39 = vadd.f32 0.5, %v3614_v36  ;;  %v3615_v17 = vmul.f32 0.5, %v5430_v37 }
 0xf2f   :  { %v3620_v43 = vmul.f32 %v5428_v31, %v3616_v34 }
 0xf30   :  { %v3619_v48 = vmul.f32 %v3617_v39, %v6659_v7  ;;  %v3618_v41 = vadd.f32 0.5, %v3615_v17 }
 0xf32   :  { %v3621_v6 = vadd.f32 %v3620_v43, %v3619_v48 }
 0xf34   :  { %5431 = vtanh.f32 %v3621_v6 }
 0xf3e   :  { %v5432_v42 = vpop.eup %5431 }
 0xf3f   :  { %v3623_v58 = vmul.f32 %v5432_v42, %v3618_v41 }
 0xf41   :  { %3689 = vmatmul.mubr.f32.vlgmr.msra.gmra.mrb[26].mxu0 %v3623_v58  ;;  %3760 = vmatmul.mubr.f32.vlgmr.msra.gmra.mrb[26].mxu1 %v3623_v58 }
0x1014   :  { %v3690_v32 = vpop.f32.mrb[26].mxu0  ;;  %v3761_v9 = vpop.f32.mrb[26].mxu1 }
0x1015   :  { %v5243_v63 = vadd.f32 %v3690_v32, %v7432_v55  ;;  %v3692_v53 = vpop.f32.mrb[27].mxu0  ;;  %v3763_v2 = vpop.f32.mrb[27].mxu1  ;;  %v5245_v49 = vadd.f32 %v3761_v9, %v7126_v57  ;;  %v3809_v57 = vld [vmem:[%s6799_s7] ss:$0 sm:$0xff] }
0x1016   :  { %v5244_v10 = vadd.f32 %v3692_v53, %v7124_v30  ;;  %v5246_v7 = vadd.f32 %v3763_v2, %v7125_v4 }
0x1017   :  { %5433 = vtanh.f32 %v5243_v63 }
0x1018   :  { %5435 = vtanh.f32 %v5244_v10 }
0x1019   :  { %5437 = vtanh.f32 %v5246_v7 }
0x101a   :  { %5439 = vtanh.f32 %v5245_v49 }
0x1021   :  { %v5434_v8 = vpop.eup %5433 }
0x1022   :  { %v3770_v22 = vmul.f32 0.5, %v5434_v8  ;;  %v5436_v50 = vpop.eup %5435 }
0x1023   :  { %v3771_v45 = vmul.f32 0.5, %v5436_v50  ;;  %v5438_v44 = vpop.eup %5437 }
0x1024   :  { %v3773_v0 = vadd.f32 0.5, %v3770_v22  ;;  %v5440_v30 = vpop.eup %5439 }
0x1025   :  { %v3774_v25 = vadd.f32 0.5, %v3771_v45  ;;  %v3772_v54 = vmul.f32 0.5, %v5440_v30 }
0x1026   :  { %v3777_v55 = vmul.f32 %v5438_v44, %v3773_v0 }
0x1027   :  { %v3776_v61 = vmul.f32 %v3774_v25, %v6705_v1  ;;  %v3775_v4 = vadd.f32 0.5, %v3772_v54 }
0x1029   :  { %v3778_v40 = vadd.f32 %v3777_v55, %v3776_v61 }
0x102b   :  { %5441 = vtanh.f32 %v3778_v40 }
0x1035   :  { %v5442_v16 = vpop.eup %5441 }
0x1036   :  { %v3780_v21 = vmul.f32 %v5442_v16, %v3775_v4 }
0x1038   :  { %v3788_v29 = vmul.f32 %v3809_v57, %v3780_v21 }
0x103a   :  { %v3790_v3 = vsel %vm3789_vm0, %v3788_v29, 0.0 }
0x103b   :  { %3791 = vadd.xlane.f32.xlu1 %v3790_v3 }
0x10c8   :  { %v3792_v33 = vpop.xlane.xlu1 %3791 }
0x10c9   :  { %v3800_v46 = vadd.f32 %v3810_v62, %v3792_v33 }
0x10cb   :  { %3802 = vst.msk [vmem:[%s6801_s9] sm:$0x3] %vm3801_vm1, %v3800_v46 }
0x10cc   :  { %3807 = vsyncpa [#allocation4], 1 }
0x10cd   :  { %3808 = vsyncpa [#allocation6], 1 }

</bundles_post_ra>
